<compile_context>
chip_gen: v6e
topology: v6e:2x2x1
jax: 0.10.0
libtpu: 0.0.40
codegen_flags: <defaults>
</compile_context>

<pallas_src>
import jax
import jax.numpy as jnp
from jax.experimental import pallas as pl
from jax.experimental.pallas import tpu as pltpu

N_NODES = 64            # padded dense graph size (nmax=37 in the transform)
F_IN = 16               # synthetic dataset.num_features
HIDDEN = 64             # nn = 64 in the module
FC1 = 32
OUT_PAD = 128           # lane-dense padded fc2 output (real output = column 0)
NUM_CONV = 4
G_PAD = 8               # pooled-row / output padding -> full 8-sublane f32 tile
BATCH = 8               # total graphs


def chebnet_kernel(l_ref, x_ref, p_ref, wc_ref, wfc_ref, b_ref, out_ref):
    G = l_ref.shape[1]                 # graphs in this block (4 on v7x, 8 else)
    h_bf = x_ref[0]                    # [GN, HIDDEN] bf16 (features zero-padded)
    biases = b_ref[...]                # [8, 128] f32 bias slab

    h_f32 = None
    # 4x (ChebConv K=2 + ReLU), statically unrolled for LLO visibility.
    for i in range(NUM_CONV):
        # T1 = L~ @ h, per graph (block-diagonal structure without the zeros);
        # 64-row slices of h are sublane-tile aligned -> no relayout copies.
        parts = []
        for g in range(G):
            hg = h_bf[g * N_NODES:(g + 1) * N_NODES, :]
            parts.append(
                jnp.dot(l_ref[0, g], hg, preferred_element_type=jnp.float32))
        t1 = jnp.concatenate(parts, axis=0).astype(jnp.bfloat16)   # [GN, HIDDEN]

        # out = T0 @ W0 + T1 @ W1 + b   (two K=64 MXU dots, no lane concat)
        z = (jnp.dot(h_bf, wc_ref[i, 0], preferred_element_type=jnp.float32)
             + jnp.dot(t1, wc_ref[i, 1], preferred_element_type=jnp.float32)
             + biases[i, :HIDDEN])
        h_f32 = jnp.maximum(z, 0.0)
        h_bf = h_f32.astype(jnp.bfloat16)

    # masked global_add_pool: [G_PAD, GN] @ [GN, HIDDEN], kept in f32.
    pooled = jnp.dot(p_ref[0], h_f32, preferred_element_type=jnp.float32)

    # FC head in f32 (tiny), lane-padded to 128 for dense stores.
    h1 = jnp.maximum(
        jnp.dot(pooled, wfc_ref[:HIDDEN, :], preferred_element_type=jnp.float32)
        + biases[4, :], 0.0)                                        # [G_PAD, 128]
    y = (jnp.dot(h1, wfc_ref[HIDDEN:, :], preferred_element_type=jnp.float32)
         + biases[5, :])                                            # [G_PAD, 128]
    out_ref[0] = y                     # full (8,128) f32 tile (lane 0 is real)


def chebnet_forward(Lg, Xblk, Pblk, packed):
    """Lg: [nb, G, N, N] bf16, Xblk: [nb, G*N, HIDDEN] bf16, Pblk: [nb, 8, G*N] f32."""
    wcs, wfc, bias_slab = packed
    nb, G = Lg.shape[0], Lg.shape[1]
    GN = G * N_NODES

    in_specs = [
        pl.BlockSpec((1, G, N_NODES, N_NODES), lambda b: (b, 0, 0, 0)),  # per-graph L~
        pl.BlockSpec((1, GN, HIDDEN), lambda b: (b, 0, 0)),              # X (padded feats)
        pl.BlockSpec((1, G_PAD, GN), lambda b: (b, 0, 0)),               # pooling matrix
        pl.BlockSpec((NUM_CONV, 2, HIDDEN, HIDDEN), lambda b: (0, 0, 0, 0)),  # Cheb W slab
        pl.BlockSpec((HIDDEN + OUT_PAD, OUT_PAD), lambda b: (0, 0)),     # fc1+fc2 W slab
        pl.BlockSpec((G_PAD, OUT_PAD), lambda b: (0, 0)),                # bias slab
    ]

    out = pl.pallas_call(
        chebnet_kernel,
        out_shape=jax.ShapeDtypeStruct((nb, G_PAD, OUT_PAD), jnp.float32),
        grid=(nb,),
        in_specs=in_specs,
        out_specs=pl.BlockSpec((1, G_PAD, OUT_PAD), lambda b: (b, 0, 0)),
        compiler_params=pltpu.CompilerParams(
            dimension_semantics=("parallel",)),
    )(Lg, Xblk, Pblk, wcs, wfc, bias_slab)

    # Only the first G rows of each block are real graphs, only lane 0 is real.
    return out[:, :G, :1].reshape(nb * G, 1)                            # [B, 1]


def graphs_per_block():
    """v7x has 2 TensorCores/chip -> two 4-graph 'parallel' steps.
    v5e/v6e are single-TC -> one 8-graph (512-node) step (less per-step overhead)."""
    try:
        kind = jax.devices()[0].device_kind.lower()
    except Exception:
        kind = ""
    return 4 if "v7" in kind else 8


def build_scaled_laplacian(A, mask):
    """A: [B,N,N] symmetric adjacency (zero diag, zero padded rows/cols)."""
    deg = jnp.sum(A, axis=-1)
    dinv = jnp.where(deg > 0, 1.0 / jnp.sqrt(jnp.maximum(deg, 1e-12)), 0.0)
    A_norm = A * dinv[:, :, None] * dinv[:, None, :]
    I = jnp.eye(A.shape[-1], dtype=A.dtype)[None]
    m2 = mask[:, :, None] * mask[:, None, :]
    Lap = (I - A_norm) * m2                        # sym-normalized Laplacian (real nodes)
    lmax = jnp.max(jnp.linalg.eigvalsh(Lap), axis=-1)     # data.lmax equivalent
    lmax = jnp.where(lmax > 1e-6, lmax, 2.0)       # PyG lambda_max fallback guard
    return (2.0 / lmax)[:, None, None] * Lap - I * m2


def build_block_inputs(Lt, X, mask, g_per_block):
    """Pack B graphs into B//G blocks of G graphs (per-graph L, masked pool matrix)."""
    B = Lt.shape[0]
    G = g_per_block
    assert B % G == 0
    nb = B // G
    GN = G * N_NODES

    Lg = Lt.reshape(nb, G, N_NODES, N_NODES).astype(jnp.bfloat16)       # [nb,G,N,N]

    Xp = jnp.zeros((B, N_NODES, HIDDEN), jnp.float32).at[:, :, :F_IN].set(X)
    Xblk = Xp.reshape(nb, GN, HIDDEN).astype(jnp.bfloat16)              # [nb,GN,H]

    # Pooling matrix: row g sums the real nodes of graph g; rows G..7 are zero
    # padding so the pooled/output tile is a full 8-sublane f32 tile.
    m = mask.reshape(nb, G, N_NODES)
    eye = jnp.eye(G_PAD, G, dtype=jnp.float32)                          # [8, G]
    Pblk = (eye[None, :, :, None] * m[:, None, :, :]).reshape(nb, G_PAD, GN)
    return Lg, Xblk, Pblk.astype(jnp.float32)


def pack_params(params):
    (w10, w11, b1, w20, w21, b2, w30, w31, b3, w40, w41, b4,
     wf1, bf1, wf2, bf2) = params

    def pad_in(w):   # [F_IN, HIDDEN] -> [HIDDEN, HIDDEN] (zero rows beyond F_IN)
        return jnp.zeros((HIDDEN, HIDDEN), jnp.float32).at[:F_IN].set(w)

    # Chebyshev weights: [layer, k, 64, 64] bf16 (two K=64 dots per layer).
    wcs = jnp.stack([
        jnp.stack([pad_in(w10), pad_in(w11)]),
        jnp.stack([w20, w21]),
        jnp.stack([w30, w31]),
        jnp.stack([w40, w41]),
    ]).astype(jnp.bfloat16)                                   # [4, 2, 64, 64]

    # FC weight slab (f32): rows 0..63 = fc1 W (cols 0..31 real),
    # rows 64..191 = fc2 W (rows 64..95, col 0 real).
    wfc = jnp.zeros((HIDDEN + OUT_PAD, OUT_PAD), jnp.float32)
    wfc = wfc.at[:HIDDEN, :FC1].set(wf1)
    wfc = wfc.at[HIDDEN:HIDDEN + FC1, :1].set(wf2)

    # Bias slab [8,128] f32: rows 0..3 conv biases, row 4 fc1 bias, row 5 fc2 bias.
    bias = jnp.zeros((G_PAD, OUT_PAD), jnp.float32)
    bias = bias.at[0, :HIDDEN].set(b1[0])
    bias = bias.at[1, :HIDDEN].set(b2[0])
    bias = bias.at[2, :HIDDEN].set(b3[0])
    bias = bias.at[3, :HIDDEN].set(b4[0])
    bias = bias.at[4, :FC1].set(bf1[0])
    bias = bias.at[5, :1].set(bf2[0])
    return (wcs, wfc, bias)


def ref_forward(Lt, X, mask, params):
    (w10, w11, b1, w20, w21, b2, w30, w31, b3, w40, w41, b4,
     wf1, bf1, wf2, bf2) = params

    def layer(h, w0, w1, b):
        t1 = jnp.einsum('bnm,bmf->bnf', Lt, h)
        return jax.nn.relu(h @ w0 + t1 @ w1 + b)

    h = layer(X, w10, w11, b1)
    h = layer(h, w20, w21, b2)
    h = layer(h, w30, w31, b3)
    h = layer(h, w40, w41, b4)
    g = jnp.einsum('bn,bnh->bh', mask, h)                     # masked global_add_pool
    h1 = jax.nn.relu(g @ wf1 + bf1)
    return h1 @ wf2 + bf2


def init_params(key):
    ks = jax.random.split(key, 16)

    def w(k, shape, fan_in):
        return jax.random.normal(k, shape, jnp.float32) / jnp.sqrt(fan_in)

    return (
        # conv1: ChebConv(F_IN, HIDDEN, K=2) -> W_0, W_1, bias
        w(ks[0], (F_IN, HIDDEN), F_IN), w(ks[1], (F_IN, HIDDEN), F_IN),
        0.01 * jax.random.normal(ks[2], (1, HIDDEN), jnp.float32),
        # conv2..conv4: ChebConv(HIDDEN, HIDDEN, K=2)
        w(ks[3], (HIDDEN, HIDDEN), HIDDEN), w(ks[4], (HIDDEN, HIDDEN), HIDDEN),
        0.01 * jax.random.normal(ks[5], (1, HIDDEN), jnp.float32),
        w(ks[6], (HIDDEN, HIDDEN), HIDDEN), w(ks[7], (HIDDEN, HIDDEN), HIDDEN),
        0.01 * jax.random.normal(ks[8], (1, HIDDEN), jnp.float32),
        w(ks[9], (HIDDEN, HIDDEN), HIDDEN), w(ks[10], (HIDDEN, HIDDEN), HIDDEN),
        0.01 * jax.random.normal(ks[11], (1, HIDDEN), jnp.float32),
        # fc1: Linear(64, 32)
        w(ks[12], (HIDDEN, FC1), HIDDEN),
        0.01 * jax.random.normal(ks[13], (1, FC1), jnp.float32),
        # fc2: Linear(32, 1)
        w(ks[14], (FC1, 1), FC1),
        0.01 * jax.random.normal(ks[15], (1, 1), jnp.float32),
    )


if __name__ == "__main__":
    key = jax.random.PRNGKey(0)
    k_adj, k_x, k_w = jax.random.split(key, 3)

    # Deterministic synthetic batch of variable-size dense graphs
    # (stand-in for ZINC graphs; nmax=37 -> padded to N_NODES=64).
    n_real = jnp.array([30, 37, 28, 33, 35, 29, 36, 32], dtype=jnp.int32)
    mask = (jnp.arange(N_NODES)[None, :] < n_real[:, None]).astype(jnp.float32)

    u = jax.random.uniform(k_adj, (BATCH, N_NODES, N_NODES))
    u = 0.5 * (u + jnp.swapaxes(u, -1, -2))
    A = (u > 0.8).astype(jnp.float32)
    A = A * (1.0 - jnp.eye(N_NODES, dtype=jnp.float32))[None]
    A = A * mask[:, :, None] * mask[:, None, :]

    Lt = build_scaled_laplacian(A, mask)                      # [B, N, N]
    X = jax.random.normal(k_x, (BATCH, N_NODES, F_IN), jnp.float32)
    X = X * mask[:, :, None]

    params = init_params(k_w)
    G = graphs_per_block()                                    # 8 (v5e/v6e) or 4 (v7x)
    Lg, Xblk, Pblk = build_block_inputs(Lt, X, mask, G)
    packed = pack_params(params)

    out = chebnet_forward(Lg, Xblk, Pblk, packed)             # [B, 1]
    out = jax.block_until_ready(out)

    expected = ref_forward(Lt, X, mask, params)
    assert out.shape == (BATCH, 1)
    max_err = float(jnp.max(jnp.abs(out - expected)))
    scale = max(float(jnp.max(jnp.abs(expected))), 1.0)
    if max_err > 5e-2 * scale:   # bf16 MXU operands in the conv stack vs f32 reference
        raise AssertionError(
            f"Pallas kernel mismatch vs JAX reference: max_err={max_err}, scale={scale}")

    print("KERNEL_OK")
</pallas_src>

<mosaic_0001>
module attributes {stable_mosaic.version = 11 : i64} {
  func.func @chebnet_kernel(%arg0: i32, %arg1: memref<1x8x64x64xbf16, #tpu.memory_space<vmem>>, %arg2: memref<1x512x64xbf16, #tpu.memory_space<vmem>>, %arg3: memref<1x8x512xf32, #tpu.memory_space<vmem>>, %arg4: memref<4x2x64x64xbf16, #tpu.memory_space<vmem>>, %arg5: memref<192x128xf32, #tpu.memory_space<vmem>>, %arg6: memref<8x128xf32, #tpu.memory_space<vmem>>, %arg7: memref<1x8x128xf32, #tpu.memory_space<vmem>>) attributes {dimension_semantics = [#tpu.dimension_semantics<parallel>], iteration_bounds = array<i64: 1>, scalar_prefetch = 0 : i64, scratch_operands = 0 : i64, tpu.core_type = #tpu.core_type<tc>, window_params = [{transform_indices = @transform_0, window_bounds = array<i64: 1, 8, 64, 64>}, {transform_indices = @transform_1, window_bounds = array<i64: 1, 512, 64>}, {transform_indices = @transform_2, window_bounds = array<i64: 1, 8, 512>}, {pipeline_mode = #tpu.pipeline_mode<synchronous>, transform_indices = @transform_3, window_bounds = array<i64: 4, 2, 64, 64>}, {pipeline_mode = #tpu.pipeline_mode<synchronous>, transform_indices = @transform_4, window_bounds = array<i64: 192, 128>}, {pipeline_mode = #tpu.pipeline_mode<synchronous>, transform_indices = @transform_5, window_bounds = array<i64: 8, 128>}, {transform_indices = @transform_6, window_bounds = array<i64: 1, 8, 128>}]} {
    %c0 = arith.constant 0 : index
    %c0_0 = arith.constant 0 : index
    %c0_1 = arith.constant 0 : index
    %0 = vector.load %arg2[%c0, %c0_0, %c0_1] : memref<1x512x64xbf16, #tpu.memory_space<vmem>>, vector<1x512x64xbf16>
    %1 = vector.shape_cast %0 : vector<1x512x64xbf16> to vector<512x64xbf16>
    %c0_2 = arith.constant 0 : index
    %c0_3 = arith.constant 0 : index
    %2 = vector.load %arg6[%c0_2, %c0_3] : memref<8x128xf32, #tpu.memory_space<vmem>>, vector<8x128xf32>
    %3 = vector.extract_strided_slice %1 {offsets = [0, 0], sizes = [64, 64], strides = [1, 1]} : vector<512x64xbf16> to vector<64x64xbf16>
    %c0_4 = arith.constant 0 : index
    %c0_5 = arith.constant 0 : index
    %c0_6 = arith.constant 0 : index
    %c0_7 = arith.constant 0 : index
    %4 = vector.load %arg1[%c0_4, %c0_5, %c0_6, %c0_7] : memref<1x8x64x64xbf16, #tpu.memory_space<vmem>>, vector<1x1x64x64xbf16>
    %5 = vector.shape_cast %4 : vector<1x1x64x64xbf16> to vector<64x64xbf16>
    %cst = arith.constant dense<0.000000e+00> : vector<64x64xf32>
    %6 = tpu.matmul %5, %3, %cst {dimension_numbers = #tpu.dot_dimension_numbers<[1], [0], [0], [1], [0, 0, 1, 1], [], []>} : vector<64x64xbf16>, vector<64x64xbf16>, vector<64x64xf32> -> vector<64x64xf32>
    %7 = vector.extract_strided_slice %1 {offsets = [64, 0], sizes = [64, 64], strides = [1, 1]} : vector<512x64xbf16> to vector<64x64xbf16>
    %c0_8 = arith.constant 0 : index
    %c1 = arith.constant 1 : index
    %c0_9 = arith.constant 0 : index
    %c0_10 = arith.constant 0 : index
    %8 = vector.load %arg1[%c0_8, %c1, %c0_9, %c0_10] : memref<1x8x64x64xbf16, #tpu.memory_space<vmem>>, vector<1x1x64x64xbf16>
    %9 = vector.shape_cast %8 : vector<1x1x64x64xbf16> to vector<64x64xbf16>
    %cst_11 = arith.constant dense<0.000000e+00> : vector<64x64xf32>
    %10 = tpu.matmul %9, %7, %cst_11 {dimension_numbers = #tpu.dot_dimension_numbers<[1], [0], [0], [1], [0, 0, 1, 1], [], []>} : vector<64x64xbf16>, vector<64x64xbf16>, vector<64x64xf32> -> vector<64x64xf32>
    %11 = vector.extract_strided_slice %1 {offsets = [128, 0], sizes = [64, 64], strides = [1, 1]} : vector<512x64xbf16> to vector<64x64xbf16>
    %c0_12 = arith.constant 0 : index
    %c2 = arith.constant 2 : index
    %c0_13 = arith.constant 0 : index
    %c0_14 = arith.constant 0 : index
    %12 = vector.load %arg1[%c0_12, %c2, %c0_13, %c0_14] : memref<1x8x64x64xbf16, #tpu.memory_space<vmem>>, vector<1x1x64x64xbf16>
    %13 = vector.shape_cast %12 : vector<1x1x64x64xbf16> to vector<64x64xbf16>
    %cst_15 = arith.constant dense<0.000000e+00> : vector<64x64xf32>
    %14 = tpu.matmul %13, %11, %cst_15 {dimension_numbers = #tpu.dot_dimension_numbers<[1], [0], [0], [1], [0, 0, 1, 1], [], []>} : vector<64x64xbf16>, vector<64x64xbf16>, vector<64x64xf32> -> vector<64x64xf32>
    %15 = vector.extract_strided_slice %1 {offsets = [192, 0], sizes = [64, 64], strides = [1, 1]} : vector<512x64xbf16> to vector<64x64xbf16>
    %c0_16 = arith.constant 0 : index
    %c3 = arith.constant 3 : index
    %c0_17 = arith.constant 0 : index
    %c0_18 = arith.constant 0 : index
    %16 = vector.load %arg1[%c0_16, %c3, %c0_17, %c0_18] : memref<1x8x64x64xbf16, #tpu.memory_space<vmem>>, vector<1x1x64x64xbf16>
    %17 = vector.shape_cast %16 : vector<1x1x64x64xbf16> to vector<64x64xbf16>
    %cst_19 = arith.constant dense<0.000000e+00> : vector<64x64xf32>
    %18 = tpu.matmul %17, %15, %cst_19 {dimension_numbers = #tpu.dot_dimension_numbers<[1], [0], [0], [1], [0, 0, 1, 1], [], []>} : vector<64x64xbf16>, vector<64x64xbf16>, vector<64x64xf32> -> vector<64x64xf32>
    %19 = vector.extract_strided_slice %1 {offsets = [256, 0], sizes = [64, 64], strides = [1, 1]} : vector<512x64xbf16> to vector<64x64xbf16>
    %c0_20 = arith.constant 0 : index
    %c4 = arith.constant 4 : index
    %c0_21 = arith.constant 0 : index
    %c0_22 = arith.constant 0 : index
    %20 = vector.load %arg1[%c0_20, %c4, %c0_21, %c0_22] : memref<1x8x64x64xbf16, #tpu.memory_space<vmem>>, vector<1x1x64x64xbf16>
    %21 = vector.shape_cast %20 : vector<1x1x64x64xbf16> to vector<64x64xbf16>
    %cst_23 = arith.constant dense<0.000000e+00> : vector<64x64xf32>
    %22 = tpu.matmul %21, %19, %cst_23 {dimension_numbers = #tpu.dot_dimension_numbers<[1], [0], [0], [1], [0, 0, 1, 1], [], []>} : vector<64x64xbf16>, vector<64x64xbf16>, vector<64x64xf32> -> vector<64x64xf32>
    %23 = vector.extract_strided_slice %1 {offsets = [320, 0], sizes = [64, 64], strides = [1, 1]} : vector<512x64xbf16> to vector<64x64xbf16>
    %c0_24 = arith.constant 0 : index
    %c5 = arith.constant 5 : index
    %c0_25 = arith.constant 0 : index
    %c0_26 = arith.constant 0 : index
    %24 = vector.load %arg1[%c0_24, %c5, %c0_25, %c0_26] : memref<1x8x64x64xbf16, #tpu.memory_space<vmem>>, vector<1x1x64x64xbf16>
    %25 = vector.shape_cast %24 : vector<1x1x64x64xbf16> to vector<64x64xbf16>
    %cst_27 = arith.constant dense<0.000000e+00> : vector<64x64xf32>
    %26 = tpu.matmul %25, %23, %cst_27 {dimension_numbers = #tpu.dot_dimension_numbers<[1], [0], [0], [1], [0, 0, 1, 1], [], []>} : vector<64x64xbf16>, vector<64x64xbf16>, vector<64x64xf32> -> vector<64x64xf32>
    %27 = vector.extract_strided_slice %1 {offsets = [384, 0], sizes = [64, 64], strides = [1, 1]} : vector<512x64xbf16> to vector<64x64xbf16>
    %c0_28 = arith.constant 0 : index
    %c6 = arith.constant 6 : index
    %c0_29 = arith.constant 0 : index
    %c0_30 = arith.constant 0 : index
    %28 = vector.load %arg1[%c0_28, %c6, %c0_29, %c0_30] : memref<1x8x64x64xbf16, #tpu.memory_space<vmem>>, vector<1x1x64x64xbf16>
    %29 = vector.shape_cast %28 : vector<1x1x64x64xbf16> to vector<64x64xbf16>
    %cst_31 = arith.constant dense<0.000000e+00> : vector<64x64xf32>
    %30 = tpu.matmul %29, %27, %cst_31 {dimension_numbers = #tpu.dot_dimension_numbers<[1], [0], [0], [1], [0, 0, 1, 1], [], []>} : vector<64x64xbf16>, vector<64x64xbf16>, vector<64x64xf32> -> vector<64x64xf32>
    %31 = vector.extract_strided_slice %1 {offsets = [448, 0], sizes = [64, 64], strides = [1, 1]} : vector<512x64xbf16> to vector<64x64xbf16>
    %c0_32 = arith.constant 0 : index
    %c7 = arith.constant 7 : index
    %c0_33 = arith.constant 0 : index
    %c0_34 = arith.constant 0 : index
    %32 = vector.load %arg1[%c0_32, %c7, %c0_33, %c0_34] : memref<1x8x64x64xbf16, #tpu.memory_space<vmem>>, vector<1x1x64x64xbf16>
    %33 = vector.shape_cast %32 : vector<1x1x64x64xbf16> to vector<64x64xbf16>
    %cst_35 = arith.constant dense<0.000000e+00> : vector<64x64xf32>
    %34 = tpu.matmul %33, %31, %cst_35 {dimension_numbers = #tpu.dot_dimension_numbers<[1], [0], [0], [1], [0, 0, 1, 1], [], []>} : vector<64x64xbf16>, vector<64x64xbf16>, vector<64x64xf32> -> vector<64x64xf32>
    %35 = tpu.concatenate %6, %10, %14, %18, %22, %26, %30, %34 in 0 : vector<64x64xf32>, vector<64x64xf32>, vector<64x64xf32>, vector<64x64xf32>, vector<64x64xf32>, vector<64x64xf32>, vector<64x64xf32>, vector<64x64xf32> -> vector<512x64xf32>
    %36 = arith.truncf %35 : vector<512x64xf32> to vector<512x64xbf16>
    %c0_36 = arith.constant 0 : index
    %c0_37 = arith.constant 0 : index
    %c0_38 = arith.constant 0 : index
    %c0_39 = arith.constant 0 : index
    %37 = vector.load %arg4[%c0_36, %c0_37, %c0_38, %c0_39] : memref<4x2x64x64xbf16, #tpu.memory_space<vmem>>, vector<1x1x64x64xbf16>
    %38 = vector.shape_cast %37 : vector<1x1x64x64xbf16> to vector<64x64xbf16>
    %cst_40 = arith.constant dense<0.000000e+00> : vector<512x64xf32>
    %39 = tpu.matmul %1, %38, %cst_40 {dimension_numbers = #tpu.dot_dimension_numbers<[1], [0], [0], [1], [0, 0, 1, 1], [], []>} : vector<512x64xbf16>, vector<64x64xbf16>, vector<512x64xf32> -> vector<512x64xf32>
    %c0_41 = arith.constant 0 : index
    %c1_42 = arith.constant 1 : index
    %c0_43 = arith.constant 0 : index
    %c0_44 = arith.constant 0 : index
    %40 = vector.load %arg4[%c0_41, %c1_42, %c0_43, %c0_44] : memref<4x2x64x64xbf16, #tpu.memory_space<vmem>>, vector<1x1x64x64xbf16>
    %41 = vector.shape_cast %40 : vector<1x1x64x64xbf16> to vector<64x64xbf16>
    %cst_45 = arith.constant dense<0.000000e+00> : vector<512x64xf32>
    %42 = tpu.matmul %36, %41, %cst_45 {dimension_numbers = #tpu.dot_dimension_numbers<[1], [0], [0], [1], [0, 0, 1, 1], [], []>} : vector<512x64xbf16>, vector<64x64xbf16>, vector<512x64xf32> -> vector<512x64xf32>
    %43 = arith.addf %39, %42 : vector<512x64xf32>
    %44 = vector.extract_strided_slice %2 {offsets = [0, 0], sizes = [1, 64], strides = [1, 1]} : vector<8x128xf32> to vector<1x64xf32>
    %45 = vector.shape_cast %44 : vector<1x64xf32> to vector<64xf32>
    %46 = vector.shape_cast %45 : vector<64xf32> to vector<1x64xf32>
    %47 = vector.broadcast %46 : vector<1x64xf32> to vector<512x64xf32>
    %48 = arith.addf %43, %47 : vector<512x64xf32>
    %cst_46 = arith.constant 0.000000e+00 : f32
    %49 = vector.broadcast %cst_46 : f32 to vector<512x64xf32>
    %50 = arith.maximumf %48, %49 : vector<512x64xf32>
    %51 = arith.truncf %50 : vector<512x64xf32> to vector<512x64xbf16>
    %52 = vector.extract_strided_slice %51 {offsets = [0, 0], sizes = [64, 64], strides = [1, 1]} : vector<512x64xbf16> to vector<64x64xbf16>
    %c0_47 = arith.constant 0 : index
    %c0_48 = arith.constant 0 : index
    %c0_49 = arith.constant 0 : index
    %c0_50 = arith.constant 0 : index
    %53 = vector.load %arg1[%c0_47, %c0_48, %c0_49, %c0_50] : memref<1x8x64x64xbf16, #tpu.memory_space<vmem>>, vector<1x1x64x64xbf16>
    %54 = vector.shape_cast %53 : vector<1x1x64x64xbf16> to vector<64x64xbf16>
    %cst_51 = arith.constant dense<0.000000e+00> : vector<64x64xf32>
    %55 = tpu.matmul %54, %52, %cst_51 {dimension_numbers = #tpu.dot_dimension_numbers<[1], [0], [0], [1], [0, 0, 1, 1], [], []>} : vector<64x64xbf16>, vector<64x64xbf16>, vector<64x64xf32> -> vector<64x64xf32>
    %56 = vector.extract_strided_slice %51 {offsets = [64, 0], sizes = [64, 64], strides = [1, 1]} : vector<512x64xbf16> to vector<64x64xbf16>
    %c0_52 = arith.constant 0 : index
    %c1_53 = arith.constant 1 : index
    %c0_54 = arith.constant 0 : index
    %c0_55 = arith.constant 0 : index
    %57 = vector.load %arg1[%c0_52, %c1_53, %c0_54, %c0_55] : memref<1x8x64x64xbf16, #tpu.memory_space<vmem>>, vector<1x1x64x64xbf16>
    %58 = vector.shape_cast %57 : vector<1x1x64x64xbf16> to vector<64x64xbf16>
    %cst_56 = arith.constant dense<0.000000e+00> : vector<64x64xf32>
    %59 = tpu.matmul %58, %56, %cst_56 {dimension_numbers = #tpu.dot_dimension_numbers<[1], [0], [0], [1], [0, 0, 1, 1], [], []>} : vector<64x64xbf16>, vector<64x64xbf16>, vector<64x64xf32> -> vector<64x64xf32>
    %60 = vector.extract_strided_slice %51 {offsets = [128, 0], sizes = [64, 64], strides = [1, 1]} : vector<512x64xbf16> to vector<64x64xbf16>
    %c0_57 = arith.constant 0 : index
    %c2_58 = arith.constant 2 : index
    %c0_59 = arith.constant 0 : index
    %c0_60 = arith.constant 0 : index
    %61 = vector.load %arg1[%c0_57, %c2_58, %c0_59, %c0_60] : memref<1x8x64x64xbf16, #tpu.memory_space<vmem>>, vector<1x1x64x64xbf16>
    %62 = vector.shape_cast %61 : vector<1x1x64x64xbf16> to vector<64x64xbf16>
    %cst_61 = arith.constant dense<0.000000e+00> : vector<64x64xf32>
    %63 = tpu.matmul %62, %60, %cst_61 {dimension_numbers = #tpu.dot_dimension_numbers<[1], [0], [0], [1], [0, 0, 1, 1], [], []>} : vector<64x64xbf16>, vector<64x64xbf16>, vector<64x64xf32> -> vector<64x64xf32>
    %64 = vector.extract_strided_slice %51 {offsets = [192, 0], sizes = [64, 64], strides = [1, 1]} : vector<512x64xbf16> to vector<64x64xbf16>
    %c0_62 = arith.constant 0 : index
    %c3_63 = arith.constant 3 : index
    %c0_64 = arith.constant 0 : index
    %c0_65 = arith.constant 0 : index
    %65 = vector.load %arg1[%c0_62, %c3_63, %c0_64, %c0_65] : memref<1x8x64x64xbf16, #tpu.memory_space<vmem>>, vector<1x1x64x64xbf16>
    %66 = vector.shape_cast %65 : vector<1x1x64x64xbf16> to vector<64x64xbf16>
    %cst_66 = arith.constant dense<0.000000e+00> : vector<64x64xf32>
    %67 = tpu.matmul %66, %64, %cst_66 {dimension_numbers = #tpu.dot_dimension_numbers<[1], [0], [0], [1], [0, 0, 1, 1], [], []>} : vector<64x64xbf16>, vector<64x64xbf16>, vector<64x64xf32> -> vector<64x64xf32>
    %68 = vector.extract_strided_slice %51 {offsets = [256, 0], sizes = [64, 64], strides = [1, 1]} : vector<512x64xbf16> to vector<64x64xbf16>
    %c0_67 = arith.constant 0 : index
    %c4_68 = arith.constant 4 : index
    %c0_69 = arith.constant 0 : index
    %c0_70 = arith.constant 0 : index
    %69 = vector.load %arg1[%c0_67, %c4_68, %c0_69, %c0_70] : memref<1x8x64x64xbf16, #tpu.memory_space<vmem>>, vector<1x1x64x64xbf16>
    %70 = vector.shape_cast %69 : vector<1x1x64x64xbf16> to vector<64x64xbf16>
    %cst_71 = arith.constant dense<0.000000e+00> : vector<64x64xf32>
    %71 = tpu.matmul %70, %68, %cst_71 {dimension_numbers = #tpu.dot_dimension_numbers<[1], [0], [0], [1], [0, 0, 1, 1], [], []>} : vector<64x64xbf16>, vector<64x64xbf16>, vector<64x64xf32> -> vector<64x64xf32>
    %72 = vector.extract_strided_slice %51 {offsets = [320, 0], sizes = [64, 64], strides = [1, 1]} : vector<512x64xbf16> to vector<64x64xbf16>
    %c0_72 = arith.constant 0 : index
    %c5_73 = arith.constant 5 : index
    %c0_74 = arith.constant 0 : index
    %c0_75 = arith.constant 0 : index
    %73 = vector.load %arg1[%c0_72, %c5_73, %c0_74, %c0_75] : memref<1x8x64x64xbf16, #tpu.memory_space<vmem>>, vector<1x1x64x64xbf16>
    %74 = vector.shape_cast %73 : vector<1x1x64x64xbf16> to vector<64x64xbf16>
    %cst_76 = arith.constant dense<0.000000e+00> : vector<64x64xf32>
    %75 = tpu.matmul %74, %72, %cst_76 {dimension_numbers = #tpu.dot_dimension_numbers<[1], [0], [0], [1], [0, 0, 1, 1], [], []>} : vector<64x64xbf16>, vector<64x64xbf16>, vector<64x64xf32> -> vector<64x64xf32>
    %76 = vector.extract_strided_slice %51 {offsets = [384, 0], sizes = [64, 64], strides = [1, 1]} : vector<512x64xbf16> to vector<64x64xbf16>
    %c0_77 = arith.constant 0 : index
    %c6_78 = arith.constant 6 : index
    %c0_79 = arith.constant 0 : index
    %c0_80 = arith.constant 0 : index
    %77 = vector.load %arg1[%c0_77, %c6_78, %c0_79, %c0_80] : memref<1x8x64x64xbf16, #tpu.memory_space<vmem>>, vector<1x1x64x64xbf16>
    %78 = vector.shape_cast %77 : vector<1x1x64x64xbf16> to vector<64x64xbf16>
    %cst_81 = arith.constant dense<0.000000e+00> : vector<64x64xf32>
    %79 = tpu.matmul %78, %76, %cst_81 {dimension_numbers = #tpu.dot_dimension_numbers<[1], [0], [0], [1], [0, 0, 1, 1], [], []>} : vector<64x64xbf16>, vector<64x64xbf16>, vector<64x64xf32> -> vector<64x64xf32>
    %80 = vector.extract_strided_slice %51 {offsets = [448, 0], sizes = [64, 64], strides = [1, 1]} : vector<512x64xbf16> to vector<64x64xbf16>
    %c0_82 = arith.constant 0 : index
    %c7_83 = arith.constant 7 : index
    %c0_84 = arith.constant 0 : index
    %c0_85 = arith.constant 0 : index
    %81 = vector.load %arg1[%c0_82, %c7_83, %c0_84, %c0_85] : memref<1x8x64x64xbf16, #tpu.memory_space<vmem>>, vector<1x1x64x64xbf16>
    %82 = vector.shape_cast %81 : vector<1x1x64x64xbf16> to vector<64x64xbf16>
    %cst_86 = arith.constant dense<0.000000e+00> : vector<64x64xf32>
    %83 = tpu.matmul %82, %80, %cst_86 {dimension_numbers = #tpu.dot_dimension_numbers<[1], [0], [0], [1], [0, 0, 1, 1], [], []>} : vector<64x64xbf16>, vector<64x64xbf16>, vector<64x64xf32> -> vector<64x64xf32>
    %84 = tpu.concatenate %55, %59, %63, %67, %71, %75, %79, %83 in 0 : vector<64x64xf32>, vector<64x64xf32>, vector<64x64xf32>, vector<64x64xf32>, vector<64x64xf32>, vector<64x64xf32>, vector<64x64xf32>, vector<64x64xf32> -> vector<512x64xf32>
    %85 = arith.truncf %84 : vector<512x64xf32> to vector<512x64xbf16>
    %c1_87 = arith.constant 1 : index
    %c0_88 = arith.constant 0 : index
    %c0_89 = arith.constant 0 : index
    %c0_90 = arith.constant 0 : index
    %86 = vector.load %arg4[%c1_87, %c0_88, %c0_89, %c0_90] : memref<4x2x64x64xbf16, #tpu.memory_space<vmem>>, vector<1x1x64x64xbf16>
    %87 = vector.shape_cast %86 : vector<1x1x64x64xbf16> to vector<64x64xbf16>
    %cst_91 = arith.constant dense<0.000000e+00> : vector<512x64xf32>
    %88 = tpu.matmul %51, %87, %cst_91 {dimension_numbers = #tpu.dot_dimension_numbers<[1], [0], [0], [1], [0, 0, 1, 1], [], []>} : vector<512x64xbf16>, vector<64x64xbf16>, vector<512x64xf32> -> vector<512x64xf32>
    %c1_92 = arith.constant 1 : index
    %c1_93 = arith.constant 1 : index
    %c0_94 = arith.constant 0 : index
    %c0_95 = arith.constant 0 : index
    %89 = vector.load %arg4[%c1_92, %c1_93, %c0_94, %c0_95] : memref<4x2x64x64xbf16, #tpu.memory_space<vmem>>, vector<1x1x64x64xbf16>
    %90 = vector.shape_cast %89 : vector<1x1x64x64xbf16> to vector<64x64xbf16>
    %cst_96 = arith.constant dense<0.000000e+00> : vector<512x64xf32>
    %91 = tpu.matmul %85, %90, %cst_96 {dimension_numbers = #tpu.dot_dimension_numbers<[1], [0], [0], [1], [0, 0, 1, 1], [], []>} : vector<512x64xbf16>, vector<64x64xbf16>, vector<512x64xf32> -> vector<512x64xf32>
    %92 = arith.addf %88, %91 : vector<512x64xf32>
    %93 = vector.extract_strided_slice %2 {offsets = [1, 0], sizes = [1, 64], strides = [1, 1]} : vector<8x128xf32> to vector<1x64xf32>
    %94 = vector.shape_cast %93 : vector<1x64xf32> to vector<64xf32>
    %95 = vector.shape_cast %94 : vector<64xf32> to vector<1x64xf32>
    %96 = vector.broadcast %95 : vector<1x64xf32> to vector<512x64xf32>
    %97 = arith.addf %92, %96 : vector<512x64xf32>
    %cst_97 = arith.constant 0.000000e+00 : f32
    %98 = vector.broadcast %cst_97 : f32 to vector<512x64xf32>
    %99 = arith.maximumf %97, %98 : vector<512x64xf32>
    %100 = arith.truncf %99 : vector<512x64xf32> to vector<512x64xbf16>
    %101 = vector.extract_strided_slice %100 {offsets = [0, 0], sizes = [64, 64], strides = [1, 1]} : vector<512x64xbf16> to vector<64x64xbf16>
    %c0_98 = arith.constant 0 : index
    %c0_99 = arith.constant 0 : index
    %c0_100 = arith.constant 0 : index
    %c0_101 = arith.constant 0 : index
    %102 = vector.load %arg1[%c0_98, %c0_99, %c0_100, %c0_101] : memref<1x8x64x64xbf16, #tpu.memory_space<vmem>>, vector<1x1x64x64xbf16>
    %103 = vector.shape_cast %102 : vector<1x1x64x64xbf16> to vector<64x64xbf16>
    %cst_102 = arith.constant dense<0.000000e+00> : vector<64x64xf32>
    %104 = tpu.matmul %103, %101, %cst_102 {dimension_numbers = #tpu.dot_dimension_numbers<[1], [0], [0], [1], [0, 0, 1, 1], [], []>} : vector<64x64xbf16>, vector<64x64xbf16>, vector<64x64xf32> -> vector<64x64xf32>
    %105 = vector.extract_strided_slice %100 {offsets = [64, 0], sizes = [64, 64], strides = [1, 1]} : vector<512x64xbf16> to vector<64x64xbf16>
    %c0_103 = arith.constant 0 : index
    %c1_104 = arith.constant 1 : index
    %c0_105 = arith.constant 0 : index
    %c0_106 = arith.constant 0 : index
    %106 = vector.load %arg1[%c0_103, %c1_104, %c0_105, %c0_106] : memref<1x8x64x64xbf16, #tpu.memory_space<vmem>>, vector<1x1x64x64xbf16>
    %107 = vector.shape_cast %106 : vector<1x1x64x64xbf16> to vector<64x64xbf16>
    %cst_107 = arith.constant dense<0.000000e+00> : vector<64x64xf32>
    %108 = tpu.matmul %107, %105, %cst_107 {dimension_numbers = #tpu.dot_dimension_numbers<[1], [0], [0], [1], [0, 0, 1, 1], [], []>} : vector<64x64xbf16>, vector<64x64xbf16>, vector<64x64xf32> -> vector<64x64xf32>
    %109 = vector.extract_strided_slice %100 {offsets = [128, 0], sizes = [64, 64], strides = [1, 1]} : vector<512x64xbf16> to vector<64x64xbf16>
    %c0_108 = arith.constant 0 : index
    %c2_109 = arith.constant 2 : index
    %c0_110 = arith.constant 0 : index
    %c0_111 = arith.constant 0 : index
    %110 = vector.load %arg1[%c0_108, %c2_109, %c0_110, %c0_111] : memref<1x8x64x64xbf16, #tpu.memory_space<vmem>>, vector<1x1x64x64xbf16>
    %111 = vector.shape_cast %110 : vector<1x1x64x64xbf16> to vector<64x64xbf16>
    %cst_112 = arith.constant dense<0.000000e+00> : vector<64x64xf32>
    %112 = tpu.matmul %111, %109, %cst_112 {dimension_numbers = #tpu.dot_dimension_numbers<[1], [0], [0], [1], [0, 0, 1, 1], [], []>} : vector<64x64xbf16>, vector<64x64xbf16>, vector<64x64xf32> -> vector<64x64xf32>
    %113 = vector.extract_strided_slice %100 {offsets = [192, 0], sizes = [64, 64], strides = [1, 1]} : vector<512x64xbf16> to vector<64x64xbf16>
    %c0_113 = arith.constant 0 : index
    %c3_114 = arith.constant 3 : index
    %c0_115 = arith.constant 0 : index
    %c0_116 = arith.constant 0 : index
    %114 = vector.load %arg1[%c0_113, %c3_114, %c0_115, %c0_116] : memref<1x8x64x64xbf16, #tpu.memory_space<vmem>>, vector<1x1x64x64xbf16>
    %115 = vector.shape_cast %114 : vector<1x1x64x64xbf16> to vector<64x64xbf16>
    %cst_117 = arith.constant dense<0.000000e+00> : vector<64x64xf32>
    %116 = tpu.matmul %115, %113, %cst_117 {dimension_numbers = #tpu.dot_dimension_numbers<[1], [0], [0], [1], [0, 0, 1, 1], [], []>} : vector<64x64xbf16>, vector<64x64xbf16>, vector<64x64xf32> -> vector<64x64xf32>
    %117 = vector.extract_strided_slice %100 {offsets = [256, 0], sizes = [64, 64], strides = [1, 1]} : vector<512x64xbf16> to vector<64x64xbf16>
    %c0_118 = arith.constant 0 : index
    %c4_119 = arith.constant 4 : index
    %c0_120 = arith.constant 0 : index
    %c0_121 = arith.constant 0 : index
    %118 = vector.load %arg1[%c0_118, %c4_119, %c0_120, %c0_121] : memref<1x8x64x64xbf16, #tpu.memory_space<vmem>>, vector<1x1x64x64xbf16>
    %119 = vector.shape_cast %118 : vector<1x1x64x64xbf16> to vector<64x64xbf16>
    %cst_122 = arith.constant dense<0.000000e+00> : vector<64x64xf32>
    %120 = tpu.matmul %119, %117, %cst_122 {dimension_numbers = #tpu.dot_dimension_numbers<[1], [0], [0], [1], [0, 0, 1, 1], [], []>} : vector<64x64xbf16>, vector<64x64xbf16>, vector<64x64xf32> -> vector<64x64xf32>
    %121 = vector.extract_strided_slice %100 {offsets = [320, 0], sizes = [64, 64], strides = [1, 1]} : vector<512x64xbf16> to vector<64x64xbf16>
    %c0_123 = arith.constant 0 : index
    %c5_124 = arith.constant 5 : index
    %c0_125 = arith.constant 0 : index
    %c0_126 = arith.constant 0 : index
    %122 = vector.load %arg1[%c0_123, %c5_124, %c0_125, %c0_126] : memref<1x8x64x64xbf16, #tpu.memory_space<vmem>>, vector<1x1x64x64xbf16>
    %123 = vector.shape_cast %122 : vector<1x1x64x64xbf16> to vector<64x64xbf16>
    %cst_127 = arith.constant dense<0.000000e+00> : vector<64x64xf32>
    %124 = tpu.matmul %123, %121, %cst_127 {dimension_numbers = #tpu.dot_dimension_numbers<[1], [0], [0], [1], [0, 0, 1, 1], [], []>} : vector<64x64xbf16>, vector<64x64xbf16>, vector<64x64xf32> -> vector<64x64xf32>
    %125 = vector.extract_strided_slice %100 {offsets = [384, 0], sizes = [64, 64], strides = [1, 1]} : vector<512x64xbf16> to vector<64x64xbf16>
    %c0_128 = arith.constant 0 : index
    %c6_129 = arith.constant 6 : index
    %c0_130 = arith.constant 0 : index
    %c0_131 = arith.constant 0 : index
    %126 = vector.load %arg1[%c0_128, %c6_129, %c0_130, %c0_131] : memref<1x8x64x64xbf16, #tpu.memory_space<vmem>>, vector<1x1x64x64xbf16>
    %127 = vector.shape_cast %126 : vector<1x1x64x64xbf16> to vector<64x64xbf16>
    %cst_132 = arith.constant dense<0.000000e+00> : vector<64x64xf32>
    %128 = tpu.matmul %127, %125, %cst_132 {dimension_numbers = #tpu.dot_dimension_numbers<[1], [0], [0], [1], [0, 0, 1, 1], [], []>} : vector<64x64xbf16>, vector<64x64xbf16>, vector<64x64xf32> -> vector<64x64xf32>
    %129 = vector.extract_strided_slice %100 {offsets = [448, 0], sizes = [64, 64], strides = [1, 1]} : vector<512x64xbf16> to vector<64x64xbf16>
    %c0_133 = arith.constant 0 : index
    %c7_134 = arith.constant 7 : index
    %c0_135 = arith.constant 0 : index
    %c0_136 = arith.constant 0 : index
    %130 = vector.load %arg1[%c0_133, %c7_134, %c0_135, %c0_136] : memref<1x8x64x64xbf16, #tpu.memory_space<vmem>>, vector<1x1x64x64xbf16>
    %131 = vector.shape_cast %130 : vector<1x1x64x64xbf16> to vector<64x64xbf16>
    %cst_137 = arith.constant dense<0.000000e+00> : vector<64x64xf32>
    %132 = tpu.matmul %131, %129, %cst_137 {dimension_numbers = #tpu.dot_dimension_numbers<[1], [0], [0], [1], [0, 0, 1, 1], [], []>} : vector<64x64xbf16>, vector<64x64xbf16>, vector<64x64xf32> -> vector<64x64xf32>
    %133 = tpu.concatenate %104, %108, %112, %116, %120, %124, %128, %132 in 0 : vector<64x64xf32>, vector<64x64xf32>, vector<64x64xf32>, vector<64x64xf32>, vector<64x64xf32>, vector<64x64xf32>, vector<64x64xf32>, vector<64x64xf32> -> vector<512x64xf32>
    %134 = arith.truncf %133 : vector<512x64xf32> to vector<512x64xbf16>
    %c2_138 = arith.constant 2 : index
    %c0_139 = arith.constant 0 : index
    %c0_140 = arith.constant 0 : index
    %c0_141 = arith.constant 0 : index
    %135 = vector.load %arg4[%c2_138, %c0_139, %c0_140, %c0_141] : memref<4x2x64x64xbf16, #tpu.memory_space<vmem>>, vector<1x1x64x64xbf16>
    %136 = vector.shape_cast %135 : vector<1x1x64x64xbf16> to vector<64x64xbf16>
    %cst_142 = arith.constant dense<0.000000e+00> : vector<512x64xf32>
    %137 = tpu.matmul %100, %136, %cst_142 {dimension_numbers = #tpu.dot_dimension_numbers<[1], [0], [0], [1], [0, 0, 1, 1], [], []>} : vector<512x64xbf16>, vector<64x64xbf16>, vector<512x64xf32> -> vector<512x64xf32>
    %c2_143 = arith.constant 2 : index
    %c1_144 = arith.constant 1 : index
    %c0_145 = arith.constant 0 : index
    %c0_146 = arith.constant 0 : index
    %138 = vector.load %arg4[%c2_143, %c1_144, %c0_145, %c0_146] : memref<4x2x64x64xbf16, #tpu.memory_space<vmem>>, vector<1x1x64x64xbf16>
    %139 = vector.shape_cast %138 : vector<1x1x64x64xbf16> to vector<64x64xbf16>
    %cst_147 = arith.constant dense<0.000000e+00> : vector<512x64xf32>
    %140 = tpu.matmul %134, %139, %cst_147 {dimension_numbers = #tpu.dot_dimension_numbers<[1], [0], [0], [1], [0, 0, 1, 1], [], []>} : vector<512x64xbf16>, vector<64x64xbf16>, vector<512x64xf32> -> vector<512x64xf32>
    %141 = arith.addf %137, %140 : vector<512x64xf32>
    %142 = vector.extract_strided_slice %2 {offsets = [2, 0], sizes = [1, 64], strides = [1, 1]} : vector<8x128xf32> to vector<1x64xf32>
    %143 = vector.shape_cast %142 : vector<1x64xf32> to vector<64xf32>
    %144 = vector.shape_cast %143 : vector<64xf32> to vector<1x64xf32>
    %145 = vector.broadcast %144 : vector<1x64xf32> to vector<512x64xf32>
    %146 = arith.addf %141, %145 : vector<512x64xf32>
    %cst_148 = arith.constant 0.000000e+00 : f32
    %147 = vector.broadcast %cst_148 : f32 to vector<512x64xf32>
    %148 = arith.maximumf %146, %147 : vector<512x64xf32>
    %149 = arith.truncf %148 : vector<512x64xf32> to vector<512x64xbf16>
    %150 = vector.extract_strided_slice %149 {offsets = [0, 0], sizes = [64, 64], strides = [1, 1]} : vector<512x64xbf16> to vector<64x64xbf16>
    %c0_149 = arith.constant 0 : index
    %c0_150 = arith.constant 0 : index
    %c0_151 = arith.constant 0 : index
    %c0_152 = arith.constant 0 : index
    %151 = vector.load %arg1[%c0_149, %c0_150, %c0_151, %c0_152] : memref<1x8x64x64xbf16, #tpu.memory_space<vmem>>, vector<1x1x64x64xbf16>
    %152 = vector.shape_cast %151 : vector<1x1x64x64xbf16> to vector<64x64xbf16>
    %cst_153 = arith.constant dense<0.000000e+00> : vector<64x64xf32>
    %153 = tpu.matmul %152, %150, %cst_153 {dimension_numbers = #tpu.dot_dimension_numbers<[1], [0], [0], [1], [0, 0, 1, 1], [], []>} : vector<64x64xbf16>, vector<64x64xbf16>, vector<64x64xf32> -> vector<64x64xf32>
    %154 = vector.extract_strided_slice %149 {offsets = [64, 0], sizes = [64, 64], strides = [1, 1]} : vector<512x64xbf16> to vector<64x64xbf16>
    %c0_154 = arith.constant 0 : index
    %c1_155 = arith.constant 1 : index
    %c0_156 = arith.constant 0 : index
    %c0_157 = arith.constant 0 : index
    %155 = vector.load %arg1[%c0_154, %c1_155, %c0_156, %c0_157] : memref<1x8x64x64xbf16, #tpu.memory_space<vmem>>, vector<1x1x64x64xbf16>
    %156 = vector.shape_cast %155 : vector<1x1x64x64xbf16> to vector<64x64xbf16>
    %cst_158 = arith.constant dense<0.000000e+00> : vector<64x64xf32>
    %157 = tpu.matmul %156, %154, %cst_158 {dimension_numbers = #tpu.dot_dimension_numbers<[1], [0], [0], [1], [0, 0, 1, 1], [], []>} : vector<64x64xbf16>, vector<64x64xbf16>, vector<64x64xf32> -> vector<64x64xf32>
    %158 = vector.extract_strided_slice %149 {offsets = [128, 0], sizes = [64, 64], strides = [1, 1]} : vector<512x64xbf16> to vector<64x64xbf16>
    %c0_159 = arith.constant 0 : index
    %c2_160 = arith.constant 2 : index
    %c0_161 = arith.constant 0 : index
    %c0_162 = arith.constant 0 : index
    %159 = vector.load %arg1[%c0_159, %c2_160, %c0_161, %c0_162] : memref<1x8x64x64xbf16, #tpu.memory_space<vmem>>, vector<1x1x64x64xbf16>
    %160 = vector.shape_cast %159 : vector<1x1x64x64xbf16> to vector<64x64xbf16>
    %cst_163 = arith.constant dense<0.000000e+00> : vector<64x64xf32>
    %161 = tpu.matmul %160, %158, %cst_163 {dimension_numbers = #tpu.dot_dimension_numbers<[1], [0], [0], [1], [0, 0, 1, 1], [], []>} : vector<64x64xbf16>, vector<64x64xbf16>, vector<64x64xf32> -> vector<64x64xf32>
    %162 = vector.extract_strided_slice %149 {offsets = [192, 0], sizes = [64, 64], strides = [1, 1]} : vector<512x64xbf16> to vector<64x64xbf16>
    %c0_164 = arith.constant 0 : index
    %c3_165 = arith.constant 3 : index
    %c0_166 = arith.constant 0 : index
    %c0_167 = arith.constant 0 : index
    %163 = vector.load %arg1[%c0_164, %c3_165, %c0_166, %c0_167] : memref<1x8x64x64xbf16, #tpu.memory_space<vmem>>, vector<1x1x64x64xbf16>
    %164 = vector.shape_cast %163 : vector<1x1x64x64xbf16> to vector<64x64xbf16>
    %cst_168 = arith.constant dense<0.000000e+00> : vector<64x64xf32>
    %165 = tpu.matmul %164, %162, %cst_168 {dimension_numbers = #tpu.dot_dimension_numbers<[1], [0], [0], [1], [0, 0, 1, 1], [], []>} : vector<64x64xbf16>, vector<64x64xbf16>, vector<64x64xf32> -> vector<64x64xf32>
    %166 = vector.extract_strided_slice %149 {offsets = [256, 0], sizes = [64, 64], strides = [1, 1]} : vector<512x64xbf16> to vector<64x64xbf16>
    %c0_169 = arith.constant 0 : index
    %c4_170 = arith.constant 4 : index
    %c0_171 = arith.constant 0 : index
    %c0_172 = arith.constant 0 : index
    %167 = vector.load %arg1[%c0_169, %c4_170, %c0_171, %c0_172] : memref<1x8x64x64xbf16, #tpu.memory_space<vmem>>, vector<1x1x64x64xbf16>
    %168 = vector.shape_cast %167 : vector<1x1x64x64xbf16> to vector<64x64xbf16>
    %cst_173 = arith.constant dense<0.000000e+00> : vector<64x64xf32>
    %169 = tpu.matmul %168, %166, %cst_173 {dimension_numbers = #tpu.dot_dimension_numbers<[1], [0], [0], [1], [0, 0, 1, 1], [], []>} : vector<64x64xbf16>, vector<64x64xbf16>, vector<64x64xf32> -> vector<64x64xf32>
    %170 = vector.extract_strided_slice %149 {offsets = [320, 0], sizes = [64, 64], strides = [1, 1]} : vector<512x64xbf16> to vector<64x64xbf16>
    %c0_174 = arith.constant 0 : index
    %c5_175 = arith.constant 5 : index
    %c0_176 = arith.constant 0 : index
    %c0_177 = arith.constant 0 : index
    %171 = vector.load %arg1[%c0_174, %c5_175, %c0_176, %c0_177] : memref<1x8x64x64xbf16, #tpu.memory_space<vmem>>, vector<1x1x64x64xbf16>
    %172 = vector.shape_cast %171 : vector<1x1x64x64xbf16> to vector<64x64xbf16>
    %cst_178 = arith.constant dense<0.000000e+00> : vector<64x64xf32>
    %173 = tpu.matmul %172, %170, %cst_178 {dimension_numbers = #tpu.dot_dimension_numbers<[1], [0], [0], [1], [0, 0, 1, 1], [], []>} : vector<64x64xbf16>, vector<64x64xbf16>, vector<64x64xf32> -> vector<64x64xf32>
    %174 = vector.extract_strided_slice %149 {offsets = [384, 0], sizes = [64, 64], strides = [1, 1]} : vector<512x64xbf16> to vector<64x64xbf16>
    %c0_179 = arith.constant 0 : index
    %c6_180 = arith.constant 6 : index
    %c0_181 = arith.constant 0 : index
    %c0_182 = arith.constant 0 : index
    %175 = vector.load %arg1[%c0_179, %c6_180, %c0_181, %c0_182] : memref<1x8x64x64xbf16, #tpu.memory_space<vmem>>, vector<1x1x64x64xbf16>
    %176 = vector.shape_cast %175 : vector<1x1x64x64xbf16> to vector<64x64xbf16>
    %cst_183 = arith.constant dense<0.000000e+00> : vector<64x64xf32>
    %177 = tpu.matmul %176, %174, %cst_183 {dimension_numbers = #tpu.dot_dimension_numbers<[1], [0], [0], [1], [0, 0, 1, 1], [], []>} : vector<64x64xbf16>, vector<64x64xbf16>, vector<64x64xf32> -> vector<64x64xf32>
    %178 = vector.extract_strided_slice %149 {offsets = [448, 0], sizes = [64, 64], strides = [1, 1]} : vector<512x64xbf16> to vector<64x64xbf16>
    %c0_184 = arith.constant 0 : index
    %c7_185 = arith.constant 7 : index
    %c0_186 = arith.constant 0 : index
    %c0_187 = arith.constant 0 : index
    %179 = vector.load %arg1[%c0_184, %c7_185, %c0_186, %c0_187] : memref<1x8x64x64xbf16, #tpu.memory_space<vmem>>, vector<1x1x64x64xbf16>
    %180 = vector.shape_cast %179 : vector<1x1x64x64xbf16> to vector<64x64xbf16>
    %cst_188 = arith.constant dense<0.000000e+00> : vector<64x64xf32>
    %181 = tpu.matmul %180, %178, %cst_188 {dimension_numbers = #tpu.dot_dimension_numbers<[1], [0], [0], [1], [0, 0, 1, 1], [], []>} : vector<64x64xbf16>, vector<64x64xbf16>, vector<64x64xf32> -> vector<64x64xf32>
    %182 = tpu.concatenate %153, %157, %161, %165, %169, %173, %177, %181 in 0 : vector<64x64xf32>, vector<64x64xf32>, vector<64x64xf32>, vector<64x64xf32>, vector<64x64xf32>, vector<64x64xf32>, vector<64x64xf32>, vector<64x64xf32> -> vector<512x64xf32>
    %183 = arith.truncf %182 : vector<512x64xf32> to vector<512x64xbf16>
    %c3_189 = arith.constant 3 : index
    %c0_190 = arith.constant 0 : index
    %c0_191 = arith.constant 0 : index
    %c0_192 = arith.constant 0 : index
    %184 = vector.load %arg4[%c3_189, %c0_190, %c0_191, %c0_192] : memref<4x2x64x64xbf16, #tpu.memory_space<vmem>>, vector<1x1x64x64xbf16>
    %185 = vector.shape_cast %184 : vector<1x1x64x64xbf16> to vector<64x64xbf16>
    %cst_193 = arith.constant dense<0.000000e+00> : vector<512x64xf32>
    %186 = tpu.matmul %149, %185, %cst_193 {dimension_numbers = #tpu.dot_dimension_numbers<[1], [0], [0], [1], [0, 0, 1, 1], [], []>} : vector<512x64xbf16>, vector<64x64xbf16>, vector<512x64xf32> -> vector<512x64xf32>
    %c3_194 = arith.constant 3 : index
    %c1_195 = arith.constant 1 : index
    %c0_196 = arith.constant 0 : index
    %c0_197 = arith.constant 0 : index
    %187 = vector.load %arg4[%c3_194, %c1_195, %c0_196, %c0_197] : memref<4x2x64x64xbf16, #tpu.memory_space<vmem>>, vector<1x1x64x64xbf16>
    %188 = vector.shape_cast %187 : vector<1x1x64x64xbf16> to vector<64x64xbf16>
    %cst_198 = arith.constant dense<0.000000e+00> : vector<512x64xf32>
    %189 = tpu.matmul %183, %188, %cst_198 {dimension_numbers = #tpu.dot_dimension_numbers<[1], [0], [0], [1], [0, 0, 1, 1], [], []>} : vector<512x64xbf16>, vector<64x64xbf16>, vector<512x64xf32> -> vector<512x64xf32>
    %190 = arith.addf %186, %189 : vector<512x64xf32>
    %191 = vector.extract_strided_slice %2 {offsets = [3, 0], sizes = [1, 64], strides = [1, 1]} : vector<8x128xf32> to vector<1x64xf32>
    %192 = vector.shape_cast %191 : vector<1x64xf32> to vector<64xf32>
    %193 = vector.shape_cast %192 : vector<64xf32> to vector<1x64xf32>
    %194 = vector.broadcast %193 : vector<1x64xf32> to vector<512x64xf32>
    %195 = arith.addf %190, %194 : vector<512x64xf32>
    %cst_199 = arith.constant 0.000000e+00 : f32
    %196 = vector.broadcast %cst_199 : f32 to vector<512x64xf32>
    %197 = arith.maximumf %195, %196 : vector<512x64xf32>
    %c0_200 = arith.constant 0 : index
    %c0_201 = arith.constant 0 : index
    %c0_202 = arith.constant 0 : index
    %198 = vector.load %arg3[%c0_200, %c0_201, %c0_202] : memref<1x8x512xf32, #tpu.memory_space<vmem>>, vector<1x8x512xf32>
    %199 = vector.shape_cast %198 : vector<1x8x512xf32> to vector<8x512xf32>
    %cst_203 = arith.constant dense<0.000000e+00> : vector<8x64xf32>
    %200 = tpu.matmul %199, %197, %cst_203 {dimension_numbers = #tpu.dot_dimension_numbers<[1], [0], [0], [1], [0, 0, 1, 1], [], []>} : vector<8x512xf32>, vector<512x64xf32>, vector<8x64xf32> -> vector<8x64xf32>
    %c0_204 = arith.constant 0 : index
    %c0_205 = arith.constant 0 : index
    %201 = vector.load %arg5[%c0_204, %c0_205] : memref<192x128xf32, #tpu.memory_space<vmem>>, vector<64x128xf32>
    %cst_206 = arith.constant dense<0.000000e+00> : vector<8x128xf32>
    %202 = tpu.matmul %200, %201, %cst_206 {dimension_numbers = #tpu.dot_dimension_numbers<[1], [0], [0], [1], [0, 0, 1, 1], [], []>} : vector<8x64xf32>, vector<64x128xf32>, vector<8x128xf32> -> vector<8x128xf32>
    %203 = vector.extract_strided_slice %2 {offsets = [4, 0], sizes = [1, 128], strides = [1, 1]} : vector<8x128xf32> to vector<1x128xf32>
    %204 = vector.shape_cast %203 : vector<1x128xf32> to vector<128xf32>
    %205 = vector.shape_cast %204 : vector<128xf32> to vector<1x128xf32>
    %206 = vector.broadcast %205 : vector<1x128xf32> to vector<8x128xf32>
    %207 = arith.addf %202, %206 : vector<8x128xf32>
    %cst_207 = arith.constant 0.000000e+00 : f32
    %208 = vector.broadcast %cst_207 : f32 to vector<8x128xf32>
    %209 = arith.maximumf %207, %208 : vector<8x128xf32>
    %c64 = arith.constant 64 : index
    %c0_208 = arith.constant 0 : index
    %210 = vector.load %arg5[%c64, %c0_208] : memref<192x128xf32, #tpu.memory_space<vmem>>, vector<128x128xf32>
    %cst_209 = arith.constant dense<0.000000e+00> : vector<8x128xf32>
    %211 = tpu.matmul %209, %210, %cst_209 {dimension_numbers = #tpu.dot_dimension_numbers<[1], [0], [0], [1], [0, 0, 1, 1], [], []>} : vector<8x128xf32>, vector<128x128xf32>, vector<8x128xf32> -> vector<8x128xf32>
    %212 = vector.extract_strided_slice %2 {offsets = [5, 0], sizes = [1, 128], strides = [1, 1]} : vector<8x128xf32> to vector<1x128xf32>
    %213 = vector.shape_cast %212 : vector<1x128xf32> to vector<128xf32>
    %214 = vector.shape_cast %213 : vector<128xf32> to vector<1x128xf32>
    %215 = vector.broadcast %214 : vector<1x128xf32> to vector<8x128xf32>
    %216 = arith.addf %211, %215 : vector<8x128xf32>
    %c0_210 = arith.constant 0 : index
    %c0_211 = arith.constant 0 : index
    %c0_212 = arith.constant 0 : index
    %217 = vector.load %arg7[%c0_210, %c0_211, %c0_212] : memref<1x8x128xf32, #tpu.memory_space<vmem>>, vector<1x8x128xf32>
    %218 = vector.shape_cast %217 : vector<1x8x128xf32> to vector<8x128xf32>
    %219 = vector.shape_cast %216 : vector<8x128xf32> to vector<1x8x128xf32>
    tpu.vector_store %arg7[%c0_210, %c0_211, %c0_212], %219 {strides = array<i32>} : memref<1x8x128xf32, #tpu.memory_space<vmem>>, vector<1x8x128xf32>,
    return
  }
  func.func @transform_0(%arg0: i32) -> (i32, i32, i32, i32) {
    %c0_i32 = arith.constant 0 : i32
    %c0_i32_0 = arith.constant 0 : i32
    %c0_i32_1 = arith.constant 0 : i32
    %c0_i32_2 = arith.constant 0 : i32
    return %arg0, %c0_i32, %c0_i32_0, %c0_i32_1 : i32, i32, i32, i32
  }
  func.func @transform_1(%arg0: i32) -> (i32, i32, i32) {
    %c0_i32 = arith.constant 0 : i32
    %c0_i32_0 = arith.constant 0 : i32
    %c0_i32_1 = arith.constant 0 : i32
    return %arg0, %c0_i32, %c0_i32_0 : i32, i32, i32
  }
  func.func @transform_2(%arg0: i32) -> (i32, i32, i32) {
    %c0_i32 = arith.constant 0 : i32
    %c0_i32_0 = arith.constant 0 : i32
    %c0_i32_1 = arith.constant 0 : i32
    return %arg0, %c0_i32, %c0_i32_0 : i32, i32, i32
  }
  func.func @transform_3(%arg0: i32) -> (i32, i32, i32, i32) {
    %c0_i32 = arith.constant 0 : i32
    %c0_i32_0 = arith.constant 0 : i32
    %c0_i32_1 = arith.constant 0 : i32
    %c0_i32_2 = arith.constant 0 : i32
    %c0_i32_3 = arith.constant 0 : i32
    return %c0_i32, %c0_i32_0, %c0_i32_1, %c0_i32_2 : i32, i32, i32, i32
  }
  func.func @transform_4(%arg0: i32) -> (i32, i32) {
    %c0_i32 = arith.constant 0 : i32
    %c0_i32_0 = arith.constant 0 : i32
    %c0_i32_1 = arith.constant 0 : i32
    return %c0_i32, %c0_i32_0 : i32, i32
  }
  func.func @transform_5(%arg0: i32) -> (i32, i32) {
    %c0_i32 = arith.constant 0 : i32
    %c0_i32_0 = arith.constant 0 : i32
    %c0_i32_1 = arith.constant 0 : i32
    return %c0_i32, %c0_i32_0 : i32, i32
  }
  func.func @transform_6(%arg0: i32) -> (i32, i32, i32) {
    %c0_i32 = arith.constant 0 : i32
    %c0_i32_0 = arith.constant 0 : i32
    %c0_i32_1 = arith.constant 0 : i32
    return %arg0, %c0_i32, %c0_i32_0 : i32, i32, i32
  }
}

</mosaic_0001>

<bundles_post_ra>
// kernel: tpu_custom_call.1
= control target key start
LH: loop header
LB: loop body
LE: loop exit
PB: predicated region body
PF: predicated region fallthrough
CT: control target
= control target key end

     0   :  { %11 = vsyncpa [#allocation3], 0  ;;  %s12383_s0 = inlined_call_operand.vmem [shape: bf16[1,8,64,64], index: 0, kind: input, shape index: {}]   ;;  %s12384_s1 = inlined_call_operand.vmem [shape: bf16[1,512,64], index: 1, kind: input, shape index: {}]   ;;  %s12385_s2 = inlined_call_operand.vmem [shape: f32[1,8,512], index: 2, kind: input, shape index: {}]   ;;  %s12386_s3 = inlined_call_operand.hbm [shape: bf16[4,2,64,64], index: 3, kind: input, shape index: {}]   ;;  %s12387_s4 = inlined_call_operand.hbm [shape: f32[192,128], index: 4, kind: input, shape index: {}]   ;;  %s12388_s5 = inlined_call_operand.vmem [shape: f32[8,128], index: 5, kind: input, shape index: {}]   ;;  %s12389_s6 = inlined_call_operand.hbm [shape: f32[1,8,128], index: 6, kind: output, shape index: {}]  }
   0x1   :  { %12 = vsyncpa [#allocation6], 0 }
   0x2   :  { %13 = vsyncpa [#allocation4], 0  ;;  %s9738_s21 = smov [#allocation2]  }
   0x3   :  { %s25_s22 = sshll.u32 %s9738_s21, 4  ;;  %s26_s22 = int_to_ptr.vmem [resolvable:$true] %s25_s22 }
   0x4   :  { %s9680_s23 = scalar_lea.vmem %s26_s22, 4096  ;;  %p9685_p1 = scmp.lt.s32.totalorder %s26_s22, %s26_s22 }
   0x5   :  { %p9681_p0 = scmp.ne.s32.totalorder %s26_s22, %s9680_s23  ;;  %p9686_p2 = scmp.lt.s32.totalorder %s9680_s23, %s9680_s23 }
   0x7   :  { %p9687_p3 = por %p9686_p2, %p9685_p1 }
   0x9   :  { %p9688_p4 = pnand %p9687_p3, %p9681_p0 }
   0xb   :  { %9691 = shalt.err (!%p9688_p4)
}
   0xc   :  { %s9739_s24 = smov 64   ;;  %s9740_s25 = smov 4  }
   0xd   :  { %31 = dma.hbm_to_vmem [thread:$0]  %s12386_s3, 4096, %s26_s22, [#allocation3], %s9739_s24, %s9739_s24, %s9740_s25  }
   0xe   :  { %s9741_s28 = smov [#allocation5]  }
   0xf   :  { %s37_s29 = sshll.u32 %s9741_s28, 4  ;;  %s38_s29 = int_to_ptr.vmem [resolvable:$true] %s37_s29 }
  0x10   :  { %s9700_s30 = scalar_lea.vmem %s38_s29, 3072  ;;  %p9705_p6 = scmp.lt.s32.totalorder %s38_s29, %s38_s29 }
  0x11   :  { %p9701_p5 = scmp.ne.s32.totalorder %s38_s29, %s9700_s30  ;;  %p9706_p7 = scmp.lt.s32.totalorder %s9700_s30, %s9700_s30 }
  0x13   :  { %p9707_p8 = por %p9706_p7, %p9705_p6 }
  0x15   :  { %p9708_p9 = pnand %p9707_p8, %p9701_p5 }
  0x17   :  { %9711 = shalt.err (!%p9708_p9)
}
  0x18   :  { %s9742_s7 = smov 128   ;;  %s9743_s8 = smov 8  }
  0x19   :  { %43 = dma.hbm_to_vmem [thread:$0]  %s12387_s4, 3072, %s38_s29, [#allocation6], %s9742_s7, %s9742_s7, %s9743_s8  }
  0x1a   :  { %9732 = dma.done.wait [#allocation3], 4096  }
  0x1b   :  { %9733 = vsyncadd [#allocation3], 4294963200 }
  0x1c   :  { %9734 = dma.done.wait [#allocation6], 3072  }
  0x1d   :  { %9735 = vsyncadd [#allocation6], 4294964224  ;;  %v9791_v0 = vld [vmem:[%s12384_s1 + $0x18] sm:$0xff]   ;;  %v9796_v1 = vld [vmem:[%s12384_s1 + $0x10] sm:$0xff]   ;;  %vm170_vm0 = vcmask 523264   ;;  %vm9745_vm1 = vmmov 0  }
  0x1e   :  { %8327 = vmatprep.subr.bf16.mxu0 %v9791_v0  ;;  %v9803_v2 = vld [vmem:[%s12384_s1 + $0x38] sm:$0xff]   ;;  %v9809_v3 = vld [vmem:[%s12384_s1 + $0x8] sm:$0xff]   ;;  %v9815_v4 = vld [vmem:[%s12384_s1 + $0x30] sm:$0xff]  }
  0x1f   :  { %8328 = vmatpush3.bf16.msra.mxu0 %v9791_v0  ;;  %8343 = vmatprep.subr.bf16.mxu1 %v9803_v2  ;;  %v9484_v5 = vld [vmem:[%s12383_s0] sm:$0xff]   ;;  %v9833_v7 = vld [vmem:[%s12384_s1 + $0x28] sm:$0xff]   ;;  %v9858_v11 = vld [vmem:[%s12384_s1 + $0x58] sm:$0xff]  }
  0x20   :  { %8329 = vmatprep.subr.bf16.mxu0 %v9796_v1  ;;  %8344 = vmatpush3.bf16.msra.mxu1 %v9803_v2  ;;  %v9825_v6 = vld [vmem:[%s12384_s1] sm:$0xff]   ;;  %v9485_v10 = vld [vmem:[%s12383_s0 + $0x8] sm:$0xff]   ;;  %v9488_v12 = vld [vmem:[%s12383_s0 + $0x10] sm:$0xff]  }
  0x21   :  { %8345 = vmatprep.subr.bf16.mxu1 %v9815_v4  ;;  %8335 = vmatprep.mubr.msk.bf16.mxu0 %vm170_vm0, %v9484_v5  ;;  %v9841_v8 = vld [vmem:[%s12384_s1 + $0x20] sm:$0xff]   ;;  %v9491_v13 = vld [vmem:[%s12383_s0 + $0x28] sm:$0xff]   ;;  %v9872_v14 = vld [vmem:[%s12384_s1 + $0x50] sm:$0xff]  }
  0x22   :  { %v9847_v9 = vld [vmem:[%s12383_s0 + $0x20] sm:$0xff]   ;;  %v9493_v15 = vld [vmem:[%s12383_s0 + $0x30] sm:$0xff]   ;;  %v9489_v16 = vld [vmem:[%s12383_s0 + $0x18] sm:$0xff]  }
  0x23   :  { %8330 = vmatpush3.bf16.msra.mxu0 %v9796_v1  ;;  %8351 = vmatprep.mubr.msk.bf16.mxu1 %vm170_vm0, %v9847_v9  ;;  %v9888_v17 = vld [vmem:[%s12384_s1 + $0x48] sm:$0xff]   ;;  %v9498_v18 = vld [vmem:[%s12383_s0 + $0x40] sm:$0xff]   ;;  %v9898_v19 = vld [vmem:[%s12384_s1 + $0x78] sm:$0xff]  }
  0x24   :  { %8331 = vmatprep.subr.bf16.mxu0 %v9809_v3  ;;  %8346 = vmatpush3.bf16.msra.mxu1 %v9815_v4  ;;  %v9904_v20 = vld [vmem:[%s12384_s1 + $0x70] sm:$0xff]   ;;  %v9910_v21 = vld [vmem:[%s12384_s1 + $0x40] sm:$0xff]   ;;  %v9494_v22 = vld [vmem:[%s12383_s0 + $0x38] sm:$0xff]  }
  0x25   :  { %8347 = vmatprep.subr.bf16.mxu1 %v9833_v7  ;;  %v9924_v23 = vld [vmem:[%s12384_s1 + $0x68] sm:$0xff]   ;;  %v9506_v25 = vld [vmem:[%s12383_s0 + $0x60] sm:$0xff]   ;;  %v9502_v26 = vld [vmem:[%s12383_s0 + $0x50] sm:$0xff]  }
  0x26   :  { %v9499_v24 = vld [vmem:[%s12383_s0 + $0x48] sm:$0xff]   ;;  %v9942_v27 = vld [vmem:[%s12384_s1 + $0x98] sm:$0xff]   ;;  %v9949_v28 = vld [vmem:[%s12384_s1 + $0x60] sm:$0xff]  }
  0x27   :  { %8332 = vmatpush3.bf16.msra.mxu0 %v9809_v3  ;;  %v9955_v29 = vld [vmem:[%s12384_s1 + $0x90] sm:$0xff]   ;;  %v9507_v30 = vld [vmem:[%s12383_s0 + $0x68] sm:$0xff]   ;;  %v9503_v31 = vld [vmem:[%s12383_s0 + $0x58] sm:$0xff]  }
  0x28   :  { %8333 = vmatprep.subr.bf16.mxu0 %v9825_v6  ;;  %8348 = vmatpush3.bf16.msra.mxu1 %v9833_v7  ;;  %v9510_v32 = vld [vmem:[%s12383_s0 + $0x70] sm:$0xff]   ;;  %v9975_v33 = vld [vmem:[%s12384_s1 + $0x88] sm:$0xff]   ;;  %v9981_v34 = vld [vmem:[%s12384_s1 + $0xb8] sm:$0xff]  }
  0x29   :  { %8349 = vmatprep.subr.bf16.mxu1 %v9841_v8  ;;  %v9514_v35 = vld [vmem:[%s12383_s0 + $0x80] sm:$0xff]   ;;  %v9991_v36 = vld [vmem:[%s12384_s1 + $0xb0] sm:$0xff]   ;;  %v9511_v38 = vld [vmem:[%s12383_s0 + $0x78] sm:$0xff]  }
  0x2a   :  { %v9998_v37 = vld [vmem:[%s12384_s1 + $0x80] sm:$0xff]   ;;  %v10012_v39 = vld [vmem:[%s12384_s1 + $0xa8] sm:$0xff]   ;;  %v10024_v42 = vld [vmem:[%s12384_s1 + $0xd8] sm:$0xff]  }
  0x2b   :  { %8334 = vmatpush3.bf16.msra.mxu0 %v9825_v6  ;;  %v9515_v40 = vld [vmem:[%s12383_s0 + $0x88] sm:$0xff]   ;;  %v9522_v41 = vld [vmem:[%s12383_s0 + $0xa0] sm:$0xff]   ;;  %v9518_v43 = vld [vmem:[%s12383_s0 + $0x90] sm:$0xff]  }
  0x2c   :  { %8359 = vmatprep.subr.bf16.mxu0 %v9858_v11  ;;  %8350 = vmatpush3.bf16.msra.mxu1 %v9841_v8  ;;  %v10035_v44 = vld [vmem:[%s12384_s1 + $0xa0] sm:$0xff]   ;;  %v10043_v45 = vld [vmem:[%s12384_s1 + $0xd0] sm:$0xff]   ;;  %v9523_v46 = vld [vmem:[%s12383_s0 + $0xa8] sm:$0xff]  }
  0x2d   :  { %8375 = vmatprep.subr.bf16.mxu1 %v9898_v19  ;;  %v9519_v47 = vld [vmem:[%s12383_s0 + $0x98] sm:$0xff]   ;;  %v10059_v48 = vld [vmem:[%s12384_s1 + $0xc8] sm:$0xff]   ;;  %v9526_v50 = vld [vmem:[%s12383_s0 + $0xb0] sm:$0xff]  }
  0x2e   :  { %8336 = vmatmul.mubr.msk.bf16.vlgmr.msra.gmra.mxu0 %vm170_vm0, %v9485_v10  ;;  %v10065_v49 = vld [vmem:[%s12384_s1 + $0xf8] sm:$0xff]   ;;  %v9530_v51 = vld [vmem:[%s12383_s0 + $0xc0] sm:$0xff]   ;;  %v10079_v52 = vld [vmem:[%s12384_s1 + $0xf0] sm:$0xff]  }
  0x2f   :  { %8339 = vmatprep.mubr.msk.bf16.mxu0 %vm170_vm0, %v9488_v12  ;;  %8360 = vmatpush3.bf16.msra.mxu0 %v9858_v11  ;;  %v10086_v53 = vld [vmem:[%s12384_s1 + $0xc0] sm:$0xff]   ;;  %v9527_v54 = vld [vmem:[%s12383_s0 + $0xb8] sm:$0xff]   ;;  %v10100_v55 = vld [vmem:[%s12384_s1 + $0xe8] sm:$0xff]  }
  0x30   :  { %8361 = vmatprep.subr.bf16.mxu0 %v9872_v14  ;;  %8352 = vmatmul.mubr.msk.bf16.vlgmr.msra.gmra.mxu1 %vm170_vm0, %v9491_v13  ;;  %v9531_v56 = vld [vmem:[%s12383_s0 + $0xc8] sm:$0xff]   ;;  %v9538_v57 = vld [vmem:[%s12383_s0 + $0xe0] sm:$0xff]   ;;  %v9534_v58 = vld [vmem:[%s12383_s0 + $0xd0] sm:$0xff]  }
  0x31   :  { %8355 = vmatprep.mubr.msk.bf16.mxu1 %vm170_vm0, %v9493_v15  ;;  %8376 = vmatpush3.bf16.msra.mxu1 %v9898_v19  ;;  %v10118_v59 = vld [vmem:[%s12384_s1 + $0xe0] sm:$0xff]   ;;  %v9544_v60 = vld [vmem:[#allocation2 + $0x38] sm:$0xff]   ;;  %v9546_v62 = vld [vmem:[#allocation2 + $0x30] sm:$0xff]  }
  0x32   :  { %8377 = vmatprep.subr.bf16.mxu1 %v9904_v20  ;;  %v9542_v61 = vld [vmem:[#allocation2 + $0x18] sm:$0xff]   ;;  %v9539_v63 = vld [vmem:[%s12383_s0 + $0xe8] sm:$0xff]   ;;  %v9540_v10 = vld [vmem:[%s12383_s0 + $0xf0] sm:$0xff]  }
  0x33   :  { %8362 = vmatpush3.bf16.msra.mxu0 %v9872_v14  ;;  %v9535_v5 = vld [vmem:[%s12383_s0 + $0xd8] sm:$0xff]   ;;  %v9543_v12 = vld [vmem:[#allocation2 + $0x10] sm:$0xff]   ;;  %v9545_v13 = vld [vmem:[#allocation2 + $0x8] sm:$0xff]  }
  0x34   :  { %8363 = vmatprep.subr.bf16.mxu0 %v9888_v17  ;;  %v9541_v15 = vld [vmem:[%s12383_s0 + $0xf8] sm:$0xff]  }
  0x35   :  { %8378 = vmatpush3.bf16.msra.mxu1 %v9904_v20 }
  0x36   :  { %8340 = vmatmul.mubr.msk.bf16.gmra.mxu0 %vm170_vm0, %v9489_v16  ;;  %8379 = vmatprep.subr.bf16.mxu1 %v9924_v23  ;;  %v9547_v16 = vld [vmem:[#allocation2] sm:$0xff]  }
  0x37   :  { %8364 = vmatpush3.bf16.msra.mxu0 %v9888_v17  ;;  %8367 = vmatprep.mubr.msk.bf16.mxu0 %vm170_vm0, %v9498_v18  ;;  %v9548_v18 = vld [vmem:[#allocation2 + $0x28] sm:$0xff]  }
  0x38   :  { %8365 = vmatprep.subr.bf16.mxu0 %v9910_v21  ;;  %8356 = vmatmul.mubr.msk.bf16.gmra.mxu1 %vm170_vm0, %v9494_v22  ;;  %v9549_v22 = vld [vmem:[#allocation2 + $0x20] sm:$0xff]  }
  0x39   :  { %8383 = vmatprep.mubr.msk.bf16.mxu1 %vm170_vm0, %v9506_v25  ;;  %8380 = vmatpush3.bf16.msra.mxu1 %v9924_v23 }
  0x3a   :  { %8381 = vmatprep.subr.bf16.mxu1 %v9949_v28 }
  0x3b   :  { %8366 = vmatpush3.bf16.msra.mxu0 %v9910_v21 }
  0x3c   :  { %8391 = vmatprep.subr.bf16.mxu0 %v9942_v27 }
  0x3d   :  { %8382 = vmatpush3.bf16.msra.mxu1 %v9949_v28 }
  0x3e   :  { %8368 = vmatmul.mubr.msk.bf16.vlgmr.msra.gmra.mxu0 %vm170_vm0, %v9499_v24  ;;  %8407 = vmatprep.subr.bf16.mxu1 %v9981_v34 }
  0x3f   :  { %8371 = vmatprep.mubr.msk.bf16.mxu0 %vm170_vm0, %v9502_v26  ;;  %8392 = vmatpush3.bf16.msra.mxu0 %v9942_v27 }
  0x40   :  { %8393 = vmatprep.subr.bf16.mxu0 %v9955_v29  ;;  %8384 = vmatmul.mubr.msk.bf16.vlgmr.msra.gmra.mxu1 %vm170_vm0, %v9507_v30 }
  0x41   :  { %8387 = vmatprep.mubr.msk.bf16.mxu1 %vm170_vm0, %v9510_v32  ;;  %8408 = vmatpush3.bf16.msra.mxu1 %v9981_v34 }
  0x42   :  { %8409 = vmatprep.subr.bf16.mxu1 %v9991_v36 }
  0x43   :  { %8394 = vmatpush3.bf16.msra.mxu0 %v9955_v29 }
  0x44   :  { %8395 = vmatprep.subr.bf16.mxu0 %v9975_v33 }
  0x45   :  { %8410 = vmatpush3.bf16.msra.mxu1 %v9991_v36 }
  0x46   :  { %8372 = vmatmul.mubr.msk.bf16.gmra.mxu0 %vm170_vm0, %v9503_v31  ;;  %8411 = vmatprep.subr.bf16.mxu1 %v10012_v39 }
  0x47   :  { %8399 = vmatprep.mubr.msk.bf16.mxu0 %vm170_vm0, %v9514_v35  ;;  %8396 = vmatpush3.bf16.msra.mxu0 %v9975_v33 }
  0x48   :  { %8397 = vmatprep.subr.bf16.mxu0 %v9998_v37  ;;  %8388 = vmatmul.mubr.msk.bf16.gmra.mxu1 %vm170_vm0, %v9511_v38 }
  0x49   :  { %8415 = vmatprep.mubr.msk.bf16.mxu1 %vm170_vm0, %v9522_v41  ;;  %8412 = vmatpush3.bf16.msra.mxu1 %v10012_v39 }
  0x4a   :  { %8413 = vmatprep.subr.bf16.mxu1 %v10035_v44 }
  0x4b   :  { %8398 = vmatpush3.bf16.msra.mxu0 %v9998_v37 }
  0x4c   :  { %8423 = vmatprep.subr.bf16.mxu0 %v10024_v42 }
  0x4d   :  { %8414 = vmatpush3.bf16.msra.mxu1 %v10035_v44 }
  0x4e   :  { %8400 = vmatmul.mubr.msk.bf16.vlgmr.msra.gmra.mxu0 %vm170_vm0, %v9515_v40  ;;  %8439 = vmatprep.subr.bf16.mxu1 %v10065_v49 }
  0x4f   :  { %8403 = vmatprep.mubr.msk.bf16.mxu0 %vm170_vm0, %v9518_v43  ;;  %8424 = vmatpush3.bf16.msra.mxu0 %v10024_v42 }
  0x50   :  { %8425 = vmatprep.subr.bf16.mxu0 %v10043_v45  ;;  %8416 = vmatmul.mubr.msk.bf16.vlgmr.msra.gmra.mxu1 %vm170_vm0, %v9523_v46 }
  0x51   :  { %8419 = vmatprep.mubr.msk.bf16.mxu1 %vm170_vm0, %v9526_v50  ;;  %8440 = vmatpush3.bf16.msra.mxu1 %v10065_v49 }
  0x52   :  { %8441 = vmatprep.subr.bf16.mxu1 %v10079_v52 }
  0x53   :  { %8426 = vmatpush3.bf16.msra.mxu0 %v10043_v45 }
  0x54   :  { %8427 = vmatprep.subr.bf16.mxu0 %v10059_v48 }
  0x55   :  { %8442 = vmatpush3.bf16.msra.mxu1 %v10079_v52 }
  0x56   :  { %8404 = vmatmul.mubr.msk.bf16.gmra.mxu0 %vm170_vm0, %v9519_v47  ;;  %8443 = vmatprep.subr.bf16.mxu1 %v10100_v55 }
  0x57   :  { %8431 = vmatprep.mubr.msk.bf16.mxu0 %vm170_vm0, %v9530_v51  ;;  %8428 = vmatpush3.bf16.msra.mxu0 %v10059_v48 }
  0x58   :  { %8429 = vmatprep.subr.bf16.mxu0 %v10086_v53  ;;  %8420 = vmatmul.mubr.msk.bf16.gmra.mxu1 %vm170_vm0, %v9527_v54 }
  0x59   :  { %8447 = vmatprep.mubr.msk.bf16.mxu1 %vm170_vm0, %v9538_v57  ;;  %8444 = vmatpush3.bf16.msra.mxu1 %v10100_v55 }
  0x5a   :  { %8445 = vmatprep.subr.bf16.mxu1 %v10118_v59 }
  0x5b   :  { %8430 = vmatpush3.bf16.msra.mxu0 %v10086_v53 }
  0x5c   :  { %8455 = vmatprep.subr.bf16.mxu0 %v9544_v60 }
  0x5d   :  { %8446 = vmatpush3.bf16.msra.mxu1 %v10118_v59 }
  0x5e   :  { %8432 = vmatmul.mubr.msk.bf16.vlgmr.msra.gmra.mxu0 %vm170_vm0, %v9531_v56  ;;  %8527 = vmatprep.subr.bf16.mxu1 %v9542_v61 }
  0x5f   :  { %8435 = vmatprep.mubr.msk.bf16.mxu0 %vm170_vm0, %v9534_v58  ;;  %8456 = vmatpush3.bf16.msra.mxu0 %v9544_v60 }
  0x60   :  { %8457 = vmatprep.subr.bf16.mxu0 %v9546_v62  ;;  %8448 = vmatmul.mubr.msk.bf16.vlgmr.msra.gmra.mxu1 %vm170_vm0, %v9539_v63 }
  0x61   :  { %8451 = vmatprep.mubr.msk.bf16.mxu1 %vm170_vm0, %v9540_v10  ;;  %8528 = vmatpush3.bf16.msra.mxu1 %v9542_v61 }
  0x62   :  { %8529 = vmatprep.subr.bf16.mxu1 %v9543_v12 }
  0x63   :  { %8458 = vmatpush3.bf16.msra.mxu0 %v9546_v62 }
  0x64   :  { %8459 = vmatprep.subr.bf16.mxu0 %v9548_v18 }
  0x65   :  { %8530 = vmatpush3.bf16.msra.mxu1 %v9543_v12 }
  0x66   :  { %8436 = vmatmul.mubr.msk.bf16.gmra.mxu0 %vm170_vm0, %v9535_v5  ;;  %8531 = vmatprep.subr.bf16.mxu1 %v9545_v13 }
  0x67   :  { %8460 = vmatpush3.bf16.msra.mxu0 %v9548_v18 }
  0x68   :  { %8452 = vmatmul.mubr.msk.bf16.gmra.mxu1 %vm170_vm0, %v9541_v15  ;;  %8461 = vmatprep.subr.bf16.mxu0 %v9549_v22 }
  0x69   :  { %8535 = vmatprep.mubr.msk.bf16.mxu1 %vm170_vm0, %v9825_v6  ;;  %8532 = vmatpush3.bf16.msra.mxu1 %v9545_v13 }
  0x6a   :  { %8533 = vmatprep.subr.bf16.mxu1 %v9547_v16 }
  0x6b   :  { %8462 = vmatpush3.bf16.msra.mxu0 %v9549_v22 }
  0x6d   :  { %8534 = vmatpush3.bf16.msra.mxu1 %v9547_v16 }
  0x70   :  { %8536 = vmatmul.mubr.msk.bf16.vlgmr.msra.gmra.mxu1 %vm170_vm0, %v9809_v3 }
  0x71   :  { %8539 = vmatprep.mubr.msk.bf16.mxu1 %vm170_vm0, %v9796_v1 }
  0x78   :  { %8540 = vmatmul.mubr.msk.bf16.gmra.mxu1 %vm170_vm0, %v9791_v0 }
  0x79   :  { %8543 = vmatprep.mubr.msk.bf16.mxu1 %vm170_vm0, %v9841_v8 }
  0x80   :  { %8544 = vmatmul.mubr.msk.bf16.gmra.mxu1 %vm170_vm0, %v9833_v7 }
  0x81   :  { %8547 = vmatprep.mubr.msk.bf16.mxu1 %vm170_vm0, %v9815_v4 }
  0x88   :  { %8548 = vmatmul.mubr.msk.bf16.gmra.mxu1 %vm170_vm0, %v9803_v2 }
  0x89   :  { %8551 = vmatprep.mubr.msk.bf16.mxu1 %vm170_vm0, %v9910_v21 }
  0x90   :  { %8552 = vmatmul.mubr.msk.bf16.gmra.mxu1 %vm170_vm0, %v9888_v17 }
  0x91   :  { %8555 = vmatprep.mubr.msk.bf16.mxu1 %vm170_vm0, %v9872_v14 }
  0x98   :  { %8556 = vmatmul.mubr.msk.bf16.gmra.mxu1 %vm170_vm0, %v9858_v11 }
  0x99   :  { %8559 = vmatprep.mubr.msk.bf16.mxu1 %vm170_vm0, %v9949_v28 }
  0xa0   :  { %8560 = vmatmul.mubr.msk.bf16.gmra.mxu1 %vm170_vm0, %v9924_v23 }
  0xa1   :  { %8563 = vmatprep.mubr.msk.bf16.mxu1 %vm170_vm0, %v9904_v20 }
  0xa8   :  { %8564 = vmatmul.mubr.msk.bf16.gmra.mxu1 %vm170_vm0, %v9898_v19 }
  0xa9   :  { %8567 = vmatprep.mubr.msk.bf16.mxu1 %vm170_vm0, %v9998_v37 }
  0xb0   :  { %8568 = vmatmul.mubr.msk.bf16.gmra.mxu1 %vm170_vm0, %v9975_v33 }
  0xb1   :  { %8571 = vmatprep.mubr.msk.bf16.mxu1 %vm170_vm0, %v9955_v29 }
  0xb8   :  { %8572 = vmatmul.mubr.msk.bf16.gmra.mxu1 %vm170_vm0, %v9942_v27 }
  0xb9   :  { %8575 = vmatprep.mubr.msk.bf16.mxu1 %vm170_vm0, %v10035_v44 }
  0xc0   :  { %8576 = vmatmul.mubr.msk.bf16.gmra.mxu1 %vm170_vm0, %v10012_v39 }
  0xc1   :  { %8579 = vmatprep.mubr.msk.bf16.mxu1 %vm170_vm0, %v9991_v36 }
  0xc8   :  { %8580 = vmatmul.mubr.msk.bf16.gmra.mxu1 %vm170_vm0, %v9981_v34 }
  0xc9   :  { %8583 = vmatprep.mubr.msk.bf16.mxu1 %vm170_vm0, %v10086_v53 }
  0xd0   :  { %8584 = vmatmul.mubr.msk.bf16.gmra.mxu1 %vm170_vm0, %v10059_v48 }
  0xd1   :  { %8587 = vmatprep.mubr.msk.bf16.mxu1 %vm170_vm0, %v10043_v45 }
  0xd8   :  { %8588 = vmatmul.mubr.msk.bf16.gmra.mxu1 %vm170_vm0, %v10024_v42 }
  0xd9   :  { %8591 = vmatprep.mubr.msk.bf16.mxu1 %vm170_vm0, %v10118_v59 }
  0xe0   :  { %8592 = vmatmul.mubr.msk.bf16.gmra.mxu1 %vm170_vm0, %v10100_v55 }
  0xe1   :  { %8595 = vmatprep.mubr.msk.bf16.mxu1 %vm170_vm0, %v10079_v52 }
  0xe8   :  { %8596 = vmatmul.mubr.msk.bf16.gmra.mxu1 %vm170_vm0, %v10065_v49 }
  0xe9   :  { %8623 = vmatprep.mubr.msk.bf16.mxu1 %vm170_vm0, %v9847_v9 }
  0xee   :  { %v8337_v0 = vpop.f32.mrf.mxu0 }
  0xf0   :  { %v217_v1 = vpop.f32.mrf.mxu0  ;;  %v8353_v2 = vpop.f32.mrf.mxu1 }
  0xf2   :  { %v8338_v3 = vpop.f32.mrf.mxu0  ;;  %v347_v4 = vpop.f32.mrf.mxu1 }
  0xf3   :  { %v1159_v11 = vpack.c.bf16 %v8338_v3, %v8337_v0 }
  0xf4   :  { %v220_v6 = vpop.f32.mrf.mxu0  ;;  %v8354_v8 = vpop.f32.mrf.mxu1 }
  0xf5   :  { %v1158_v7 = vpack.c.bf16 %v220_v6, %v217_v1  ;;  %v1163_v35 = vpack.c.bf16 %v8354_v8, %v8353_v2 }
  0xf6   :  { %v8341_v14 = vpop.f32.mrf.mxu0  ;;  %v350_v17 = vpop.f32.mrf.mxu1 }
  0xf7   :  { %8463 = vmatprep.mubr.msk.bf16.mxu0 %vm170_vm0, %v1158_v7  ;;  %v1162_v26 = vpack.c.bf16 %v350_v17, %v347_v4 }
  0xf8   :  { %v233_v19 = vpop.f32.mrf.mxu0  ;;  %8464 = vmatmul.mubr.msk.bf16.vlgmr.msra.gmra.mxu0 %vm170_vm0, %v1159_v11  ;;  %v8357_v20 = vpop.f32.mrf.mxu1 }
  0xfa   :  { %v8342_v21 = vpop.f32.mrf.mxu0  ;;  %v363_v23 = vpop.f32.mrf.mxu1 }
  0xfb   :  { %v1161_v9 = vpack.c.bf16 %v8342_v21, %v8341_v14 }
  0xfc   :  { %v236_v24 = vpop.f32.mrf.mxu0  ;;  %v8358_v27 = vpop.f32.mrf.mxu1 }
  0xfd   :  { %v1160_v25 = vpack.c.bf16 %v236_v24, %v233_v19  ;;  %v1165_v43 = vpack.c.bf16 %v8358_v27, %v8357_v20 }
  0xfe   :  { %v8369_v28 = vpop.f32.mrf.mxu0  ;;  %v366_v30 = vpop.f32.mrf.mxu1 }
  0xff   :  { %8467 = vmatprep.mubr.msk.bf16.mxu0 %vm170_vm0, %v1160_v25  ;;  %v1164_v33 = vpack.c.bf16 %v366_v30, %v363_v23 }
 0x100   :  { %8468 = vmatmul.mubr.msk.bf16.gmra.mxu0 %vm170_vm0, %v1161_v9  ;;  %v477_v29 = vpop.f32.mrf.mxu0  ;;  %v8385_v34 = vpop.f32.mrf.mxu1 }
 0x101   :  { %8471 = vmatprep.mubr.msk.bf16.mxu0 %vm170_vm0, %v1162_v26 }
 0x102   :  { %v8370_v31 = vpop.f32.mrf.mxu0  ;;  %v607_v37 = vpop.f32.mrf.mxu1 }
 0x103   :  { %v1167_v50 = vpack.c.bf16 %v8370_v31, %v8369_v28 }
 0x104   :  { %v480_v32 = vpop.f32.mrf.mxu0  ;;  %v8386_v38 = vpop.f32.mrf.mxu1 }
 0x105   :  { %v1166_v41 = vpack.c.bf16 %v480_v32, %v477_v29  ;;  %v1171_v12 = vpack.c.bf16 %v8386_v38, %v8385_v34 }
 0x106   :  { %v8373_v36 = vpop.f32.mrf.mxu0  ;;  %v610_v40 = vpop.f32.mrf.mxu1 }
 0x107   :  { %v1170_v57 = vpack.c.bf16 %v610_v40, %v607_v37 }
 0x108   :  { %8472 = vmatmul.mubr.msk.bf16.gmra.mxu0 %vm170_vm0, %v1163_v35  ;;  %v493_v39 = vpop.f32.mrf.mxu0  ;;  %v8389_v42 = vpop.f32.mrf.mxu1 }
 0x109   :  { %8475 = vmatprep.mubr.msk.bf16.mxu0 %vm170_vm0, %v1164_v33 }
 0x10a   :  { %v8374_v44 = vpop.f32.mrf.mxu0  ;;  %v623_v45 = vpop.f32.mrf.mxu1 }
 0x10b   :  { %v1169_v58 = vpack.c.bf16 %v8374_v44, %v8373_v36 }
 0x10c   :  { %v8390_v46 = vpop.f32.mrf.mxu1  ;;  %v496_v47 = vpop.f32.mrf.mxu0 }
 0x10d   :  { %v1168_v49 = vpack.c.bf16 %v496_v47, %v493_v39  ;;  %v1173_v2 = vpack.c.bf16 %v8390_v46, %v8389_v42 }
 0x10e   :  { %v626_v48 = vpop.f32.mrf.mxu1  ;;  %v8401_v51 = vpop.f32.mrf.mxu0 }
 0x10f   :  { %v1172_v5 = vpack.c.bf16 %v626_v48, %v623_v45 }
 0x110   :  { %8476 = vmatmul.mubr.msk.bf16.gmra.mxu0 %vm170_vm0, %v1165_v43  ;;  %v8417_v52 = vpop.f32.mrf.mxu1  ;;  %v737_v54 = vpop.f32.mrf.mxu0 }
 0x111   :  { %8479 = vmatprep.mubr.msk.bf16.mxu0 %vm170_vm0, %v1166_v41 }
 0x112   :  { %v867_v53 = vpop.f32.mrf.mxu1  ;;  %v8402_v59 = vpop.f32.mrf.mxu0 }
 0x113   :  { %v1175_v14 = vpack.c.bf16 %v8402_v59, %v8401_v51 }
 0x114   :  { %v8418_v55 = vpop.f32.mrf.mxu1  ;;  %v740_v62 = vpop.f32.mrf.mxu0 }
 0x115   :  { %v1174_v0 = vpack.c.bf16 %v740_v62, %v737_v54  ;;  %v1179_v29 = vpack.c.bf16 %v8418_v55, %v8417_v52  ;;  %v9574_v54 = vld [vmem:[%s12383_s0] sm:$0xff]  }
 0x116   :  { %v870_v56 = vpop.f32.mrf.mxu1  ;;  %v8405_v13 = vpop.f32.mrf.mxu0 }
 0x117   :  { %v1178_v23 = vpack.c.bf16 %v870_v56, %v867_v53 }
 0x118   :  { %8480 = vmatmul.mubr.msk.bf16.gmra.mxu0 %vm170_vm0, %v1167_v50  ;;  %v8421_v60 = vpop.f32.mrf.mxu1  ;;  %v753_v18 = vpop.f32.mrf.mxu0 }
 0x119   :  { %8483 = vmatprep.mubr.msk.bf16.mxu0 %vm170_vm0, %v1168_v49 }
 0x11a   :  { %v883_v61 = vpop.f32.mrf.mxu1  ;;  %v8406_v3 = vpop.f32.mrf.mxu0 }
 0x11b   :  { %v1177_v24 = vpack.c.bf16 %v8406_v3, %v8405_v13 }
 0x11c   :  { %v8422_v63 = vpop.f32.mrf.mxu1  ;;  %v756_v7 = vpop.f32.mrf.mxu0 }
 0x11d   :  { %v1176_v11 = vpack.c.bf16 %v756_v7, %v753_v18  ;;  %v1181_v35 = vpack.c.bf16 %v8422_v63, %v8421_v60 }
 0x11e   :  { %v886_v10 = vpop.f32.mrf.mxu1  ;;  %v8433_v17 = vpop.f32.mrf.mxu0 }
 0x11f   :  { %v1180_v28 = vpack.c.bf16 %v886_v10, %v883_v61 }
 0x120   :  { %8484 = vmatmul.mubr.msk.bf16.gmra.mxu0 %vm170_vm0, %v1169_v58  ;;  %v10222_v15 = vpop.f32.mrf.mxu1  ;;  %v997_v20 = vpop.f32.mrf.mxu0 }
 0x121   :  { %8487 = vmatprep.mubr.msk.bf16.mxu0 %vm170_vm0, %v1170_v57 }
 0x122   :  { %v1127_v16 = vpop.f32.mrf.mxu1  ;;  %v8434_v25 = vpop.f32.mrf.mxu0 }
 0x123   :  { %v1183_v41 = vpack.c.bf16 %v8434_v25, %v8433_v17  ;;  %v117_v17 = vld [vmem:[%s12388_s5] sm:$0xff] }
 0x124   :  { %v8450_v22 = vpop.f32.mrf.mxu1  ;;  %v1000_v9 = vpop.f32.mrf.mxu0 }
 0x125   :  { %v1182_v34 = vpack.c.bf16 %v1000_v9, %v997_v20  ;;  %v1187_v49 = vpack.c.bf16 %v8450_v22, %v10222_v15 }
 0x126   :  { %v1130_v1 = vpop.f32.mrf.mxu1  ;;  %v8437_v30 = vpop.f32.mrf.mxu0 }
 0x127   :  { %v1186_v44 = vpack.c.bf16 %v1130_v1, %v1127_v16  ;;  %v2025_v1 = vlaneseq }
 0x128   :  { %8488 = vmatmul.mubr.msk.bf16.gmra.mxu0 %vm170_vm0, %v1171_v12  ;;  %v8453_v4 = vpop.f32.mrf.mxu1  ;;  %v1013_v32 = vpop.f32.mrf.mxu0 }
 0x129   :  { %8491 = vmatprep.mubr.msk.bf16.mxu0 %vm170_vm0, %v1172_v5 }
 0x12a   :  { %v1143_v6 = vpop.f32.mrf.mxu1  ;;  %v8438_v36 = vpop.f32.mrf.mxu0 }
 0x12b   :  { %v1185_v45 = vpack.c.bf16 %v8438_v36, %v8437_v30 }
 0x12c   :  { %v8454_v8 = vpop.f32.mrf.mxu1  ;;  %v1016_v38 = vpop.f32.mrf.mxu0 }
 0x12d   :  { %v1184_v40 = vpack.c.bf16 %v1016_v38, %v1013_v32  ;;  %v1189_v52 = vpack.c.bf16 %v8454_v8, %v8453_v4 }
 0x12e   :  { %v1146_v19 = vpop.f32.mrf.mxu1 }
 0x12f   :  { %v1188_v48 = vpack.c.bf16 %v1146_v19, %v1143_v6  ;;  %v10308_v6 = vshrl.u32 %v2025_v1, 7 }
 0x130   :  { %8492 = vmatmul.mubr.msk.bf16.gmra.mxu0 %vm170_vm0, %v1173_v2  ;;  %v10230_v21 = vpop.f32.mrf.mxu1 }
 0x131   :  { %8495 = vmatprep.mubr.msk.bf16.mxu0 %vm170_vm0, %v1174_v0  ;;  %12394 = vst [vmem:[#allocation11_spill] sm:$0xff] %v10308_v6 }
 0x132   :  { %v10232_v26 = vpop.f32.mrf.mxu1 }
 0x134   :  { %v10236_v27 = vpop.f32.mrf.mxu1 }
 0x136   :  { %v10238_v31 = vpop.f32.mrf.mxu1 }
 0x138   :  { %8496 = vmatmul.mubr.msk.bf16.gmra.mxu0 %vm170_vm0, %v1175_v14  ;;  %v8541_v33 = vpop.f32.mrf.mxu1  ;;  %v2027_v14 = vsub.s32 0, %v10308_v6 }
 0x139   :  { %8499 = vmatprep.mubr.msk.bf16.mxu0 %vm170_vm0, %v1176_v11 }
 0x13a   :  { %v1786_v37 = vpop.f32.mrf.mxu1  ;;  %v10318_v25 = vrot.slane %v117_v17, %v2027_v14 }
 0x13c   :  { %v8542_v39 = vpop.f32.mrf.mxu1 }
 0x13e   :  { %v10244_v42 = vpop.f32.mrf.mxu1 }
 0x140   :  { %8500 = vmatmul.mubr.msk.bf16.gmra.mxu0 %vm170_vm0, %v1177_v24  ;;  %v10248_v43 = vpop.f32.mrf.mxu1 }
 0x141   :  { %8503 = vmatprep.mubr.msk.bf16.mxu0 %vm170_vm0, %v1178_v23 }
 0x142   :  { %v10250_v46 = vpop.f32.mrf.mxu1 }
 0x144   :  { %v10254_v47 = vpop.f32.mrf.mxu1 }
 0x146   :  { %v10257_v50 = vpop.f32.mrf.mxu1 }
 0x148   :  { %8504 = vmatmul.mubr.msk.bf16.gmra.mxu0 %vm170_vm0, %v1179_v29  ;;  %v10261_v51 = vpop.f32.mrf.mxu1 }
 0x149   :  { %8507 = vmatprep.mubr.msk.bf16.mxu0 %vm170_vm0, %v1180_v28 }
 0x14a   :  { %v10263_v53 = vpop.f32.mrf.mxu1 }
 0x14c   :  { %v10270_v55 = vpop.f32.mrf.mxu1 }
 0x14e   :  { %v10272_v56 = vpop.f32.mrf.mxu1 }
 0x150   :  { %8508 = vmatmul.mubr.msk.bf16.gmra.mxu0 %vm170_vm0, %v1181_v35  ;;  %v10274_v57 = vpop.f32.mrf.mxu1 }
 0x151   :  { %8511 = vmatprep.mubr.msk.bf16.mxu0 %vm170_vm0, %v1182_v34 }
 0x152   :  { %v10276_v58 = vpop.f32.mrf.mxu1 }
 0x154   :  { %v10278_v59 = vpop.f32.mrf.mxu1 }
 0x156   :  { %v10280_v60 = vpop.f32.mrf.mxu1 }
 0x158   :  { %8512 = vmatmul.mubr.msk.bf16.gmra.mxu0 %vm170_vm0, %v1183_v41  ;;  %v10282_v61 = vpop.f32.mrf.mxu1 }
 0x159   :  { %8515 = vmatprep.mubr.msk.bf16.mxu0 %vm170_vm0, %v1184_v40 }
 0x15a   :  { %v10284_v62 = vpop.f32.mrf.mxu1 }
 0x15c   :  { %v10286_v63 = vpop.f32.mrf.mxu1 }
 0x15e   :  { %v10288_v5 = vpop.f32.mrf.mxu1 }
 0x160   :  { %8516 = vmatmul.mubr.msk.bf16.gmra.mxu0 %vm170_vm0, %v1185_v45  ;;  %v10290_v10 = vpop.f32.mrf.mxu1 }
 0x161   :  { %8519 = vmatprep.mubr.msk.bf16.mxu0 %vm170_vm0, %v1186_v44 }
 0x162   :  { %v10292_v12 = vpop.f32.mrf.mxu1 }
 0x164   :  { %v10294_v13 = vpop.f32.mrf.mxu1 }
 0x166   :  { %v10296_v15 = vpop.f32.mrf.mxu1 }
 0x168   :  { %8520 = vmatmul.mubr.msk.bf16.gmra.mxu0 %vm170_vm0, %v1187_v49  ;;  %v10298_v16 = vpop.f32.mrf.mxu1 }
 0x169   :  { %8523 = vmatprep.mubr.msk.bf16.mxu0 %vm170_vm0, %v1188_v48 }
 0x16a   :  { %v10300_v18 = vpop.f32.mrf.mxu1 }
 0x16c   :  { %v10302_v22 = vpop.f32.mrf.mxu1 }
 0x16e   :  { %v10304_v0 = vpop.f32.mrf.mxu1 }
 0x170   :  { %8524 = vmatmul.mubr.msk.bf16.gmra.mxu0 %vm170_vm0, %v1189_v52  ;;  %v10306_v4 = vpop.f32.mrf.mxu1 }
 0x171   :  { %8607 = vmatprep.mubr.msk.bf16.mxu0 %vm170_vm0, %v9574_v54 }
 0x172   :  { %v10310_v11 = vpop.f32.mrf.mxu1 }
 0x174   :  { %v10316_v24 = vpop.f32.mrf.mxu1 }
 0x176   :  { %v10323_v36 = vpop.f32.mrf.mxu1 }
 0x178   :  { %v10332_v49 = vpop.f32.mrf.mxu1 }
 0x17a   :  { %v10342_v17 = vpop.f32.mrf.mxu1 }
 0x1b8   :  { %v8465_v2 = vpop.f32.mrf.mxu0 }
 0x1b9   :  { %v1779_v34 = vadd.f32 %v10230_v21, %v8465_v2 }
 0x1ba   :  { %v1361_v3 = vpop.f32.mrf.mxu0 }
 0x1bb   :  { %v2031_v21 = vadd.f32 %v10318_v25, %v1779_v34  ;;  %v1771_v52 = vadd.f32 %v10232_v26, %v1361_v3 }
 0x1bc   :  { %v8466_v7 = vpop.f32.mrf.mxu0 }
 0x1bd   :  { %v1782_v28 = vadd.f32 %v10236_v27, %v8466_v7  ;;  %v2029_v26 = vadd.f32 %v10318_v25, %v1771_v52 }
 0x1be   :  { %v1364_v8 = vpop.f32.mrf.mxu0 }
 0x1bf   :  { %v2032_v41 = vadd.f32 %v10318_v25, %v1782_v28  ;;  %v1774_v27 = vadd.f32 %v10238_v31, %v1364_v8 }
 0x1c0   :  { %v8469_v19 = vpop.f32.mrf.mxu0 }
 0x1c1   :  { %v1795_v20 = vadd.f32 %v8541_v33, %v8469_v19  ;;  %v2096_v7 = vmax.f32 %v2032_v41, 0.0  ;;  %v2030_v14 = vadd.f32 %v10318_v25, %v1774_v27  ;;  %v2095_v19 = vmax.f32 %v2031_v21, 0.0 }
 0x1c2   :  { %v1377_v23 = vpop.f32.mrf.mxu0 }
 0x1c3   :  { %v1787_v9 = vadd.f32 %v1786_v37, %v1377_v23  ;;  %v2035_v30 = vadd.f32 %v10318_v25, %v1795_v20  ;;  %v2094_v20 = vmax.f32 %v2030_v14, 0.0 }
 0x1c4   :  { %v8470_v29 = vpop.f32.mrf.mxu0 }
 0x1c5   :  { %v1798_v32 = vadd.f32 %v8542_v39, %v8470_v29  ;;  %v2033_v38 = vadd.f32 %v10318_v25, %v1787_v9  ;;  %v2099_v44 = vmax.f32 %v2035_v30, 0.0  ;;  %v10347_v9 = vpack.c.bf16 %v2096_v7, %v2095_v19  ;;  %v10350_v29 = vpop.f32.mrf.mxu1 }
 0x1c6   :  { %v1380_v35 = vpop.f32.mrf.mxu0  ;;  %v2093_v30 = vmax.f32 %v2029_v26, 0.0 }
 0x1c7   :  { %v2036_v33 = vadd.f32 %v10318_v25, %v1798_v32  ;;  %v1790_v40 = vadd.f32 %v10244_v42, %v1380_v35  ;;  %v2097_v54 = vmax.f32 %v2033_v38, 0.0  ;;  %v10361_v27 = vpop.f32.mrf.mxu1 }
 0x1c8   :  { %v8473_v37 = vpop.f32.mrf.mxu0 }
 0x1c9   :  { %v2100_v45 = vmax.f32 %v2036_v33, 0.0  ;;  %v2034_v39 = vadd.f32 %v10318_v25, %v1790_v40  ;;  %v1811_v40 = vadd.f32 %v10248_v43, %v8473_v37 }
 0x1ca   :  { %v1393_v48 = vpop.f32.mrf.mxu0 }
 0x1cb   :  { %v2098_v1 = vmax.f32 %v2034_v39, 0.0  ;;  %v10335_v2 = vpack.c.bf16 %v2100_v45, %v2099_v44  ;;  %v2039_v52 = vadd.f32 %v10318_v25, %v1811_v40 }
 0x1cc   :  { %v8474_v42 = vpop.f32.mrf.mxu0 }
 0x1cd   :  { %8599 = vmatprep.subr.bf16.mxu0 %v10335_v2  ;;  %v10339_v31 = vpack.c.bf16 %v2098_v1, %v2097_v54  ;;  %v1814_v34 = vadd.f32 %v10254_v47, %v8474_v42  ;;  %v10372_v1 = vpop.f32.mrf.mxu1 }
 0x1ce   :  { %v1396_v8 = vpop.f32.mrf.mxu0  ;;  %8600 = vmatpush3.bf16.msra.mxu0 %v10335_v2 }
 0x1cf   :  { %8601 = vmatprep.subr.bf16.mxu0 %v10339_v31  ;;  %v2040_v45 = vadd.f32 %v10318_v25, %v1814_v34  ;;  %v1806_v39 = vadd.f32 %v10257_v50, %v1396_v8  ;;  %v9575_v8 = vld [vmem:[%s12383_s0 + $0x8] sm:$0xff]  }
 0x1d0   :  { %v8477_v3 = vpop.f32.mrf.mxu0 }
 0x1d1   :  { %v1827_v23 = vadd.f32 %v10261_v51, %v8477_v3  ;;  %v10357_v51 = vpack.c.bf16 %v2094_v20, %v2093_v30  ;;  %v2104_v26 = vmax.f32 %v2040_v45, 0.0  ;;  %v2038_v50 = vadd.f32 %v10318_v25, %v1806_v39 }
 0x1d2   :  { %v1409_v28 = vpop.f32.mrf.mxu0  ;;  %8602 = vmatpush3.bf16.msra.mxu0 %v10339_v31 }
 0x1d3   :  { %v1819_v32 = vadd.f32 %v10263_v53, %v1409_v28  ;;  %8603 = vmatprep.subr.bf16.mxu0 %v10347_v9  ;;  %v2043_v38 = vadd.f32 %v10318_v25, %v1827_v23  ;;  %v2103_v23 = vmax.f32 %v2039_v52, 0.0 }
 0x1d4   :  { %v8478_v35 = vpop.f32.mrf.mxu0 }
 0x1d5   :  { %v1830_v33 = vadd.f32 %v10270_v55, %v8478_v35  ;;  %v2041_v53 = vadd.f32 %v10318_v25, %v1819_v32  ;;  %v2107_v21 = vmax.f32 %v2043_v38, 0.0  ;;  %v2102_v32 = vmax.f32 %v2038_v50, 0.0 }
 0x1d6   :  { %v1412_v41 = vpop.f32.mrf.mxu0  ;;  %8604 = vmatpush3.bf16.msra.mxu0 %v10347_v9  ;;  %v10395_v35 = vpack.c.bf16 %v2104_v26, %v2103_v23 }
 0x1d7   :  { %v2044_v44 = vadd.f32 %v10318_v25, %v1830_v33  ;;  %v1822_v47 = vadd.f32 %v10272_v56, %v1412_v41  ;;  %8605 = vmatprep.subr.bf16.mxu0 %v10357_v51  ;;  %v1803_v56 = vadd.f32 %v10250_v46, %v1393_v48  ;;  %v2105_v42 = vmax.f32 %v2041_v53, 0.0  ;;  %v9576_v46 = vld [vmem:[%s12383_s0 + $0x10] sm:$0xff]   ;;  %v10390_v48 = vpop.f32.mrf.mxu1 }
 0x1d8   :  { %v8481_v55 = vpop.f32.mrf.mxu0 }
 0x1d9   :  { %v2108_v43 = vmax.f32 %v2044_v44, 0.0  ;;  %v2042_v37 = vadd.f32 %v10318_v25, %v1822_v47  ;;  %v2037_v28 = vadd.f32 %v10318_v25, %v1803_v56  ;;  %v10398_v33 = vpop.f32.mrf.mxu1 }
 0x1da   :  { %v1425_v54 = vpop.f32.mrf.mxu0  ;;  %8606 = vmatpush3.bf16.msra.mxu0 %v10357_v51 }
 0x1db   :  { %v2106_v7 = vmax.f32 %v2042_v37, 0.0  ;;  %v10375_v14 = vpack.c.bf16 %v2108_v43, %v2107_v21  ;;  %v2101_v40 = vmax.f32 %v2037_v28, 0.0  ;;  %v1843_v21 = vadd.f32 %v10274_v57, %v8481_v55 }
 0x1dc   :  { %v8482_v19 = vpop.f32.mrf.mxu0 }
 0x1dd   :  { %8608 = vmatmul.mubr.msk.bf16.vlgmr.msra.gmra.mxu0 %vm170_vm0, %v9575_v8  ;;  %8615 = vmatprep.subr.bf16.mxu1 %v10375_v14  ;;  %v10383_v3 = vpack.c.bf16 %v2106_v7, %v2105_v42  ;;  %v1846_v53 = vadd.f32 %v10278_v59, %v8482_v19  ;;  %v10409_v39 = vpack.c.bf16 %v2102_v32, %v2101_v40  ;;  %v9578_v59 = vld [vmem:[%s12383_s0 + $0x40] sm:$0xff]  }
 0x1de   :  { %v1428_v20 = vpop.f32.mrf.mxu0  ;;  %8616 = vmatpush3.bf16.msra.mxu1 %v10375_v14  ;;  %8611 = vmatprep.mubr.msk.bf16.mxu0 %vm170_vm0, %v9576_v46  ;;  %v2047_v26 = vadd.f32 %v10318_v25, %v1843_v21 }
 0x1df   :  { %8617 = vmatprep.subr.bf16.mxu1 %v10383_v3  ;;  %v2048_v57 = vadd.f32 %v10318_v25, %v1846_v53  ;;  %v1838_v56 = vadd.f32 %v10280_v60, %v1428_v20  ;;  %v9579_v20 = vld [vmem:[%s12383_s0 + $0x28] sm:$0xff]  }
 0x1e0   :  { %v8485_v30 = vpop.f32.mrf.mxu0  ;;  %v2111_v40 = vmax.f32 %v2047_v26, 0.0 }
 0x1e1   :  { %v1859_v34 = vadd.f32 %v10282_v61, %v8485_v30  ;;  %v9577_v61 = vld [vmem:[%s12383_s0 + $0x18] sm:$0xff]   ;;  %v2112_v32 = vmax.f32 %v2048_v57, 0.0  ;;  %v2046_v60 = vadd.f32 %v10318_v25, %v1838_v56 }
 0x1e2   :  { %v1441_v38 = vpop.f32.mrf.mxu0  ;;  %8618 = vmatpush3.bf16.msra.mxu1 %v10383_v3 }
 0x1e3   :  { %v1851_v41 = vadd.f32 %v10284_v62, %v1441_v38  ;;  %8619 = vmatprep.subr.bf16.mxu1 %v10395_v35  ;;  %v2051_v47 = vadd.f32 %v10318_v25, %v1859_v34 }
 0x1e4   :  { %v8486_v44 = vpop.f32.mrf.mxu0 }
 0x1e5   :  { %v1862_v45 = vadd.f32 %v10286_v63, %v8486_v44  ;;  %8612 = vmatmul.mubr.msk.bf16.gmra.mxu0 %vm170_vm0, %v9577_v61  ;;  %v10417_v63 = vpop.f32.mrf.mxu1  ;;  %v2049_v43 = vadd.f32 %v10318_v25, %v1851_v41  ;;  %v2115_v42 = vmax.f32 %v2051_v47, 0.0  ;;  %v2110_v44 = vmax.f32 %v2046_v60, 0.0 }
 0x1e6   :  { %v1444_v62 = vpop.f32.mrf.mxu0  ;;  %8620 = vmatpush3.bf16.msra.mxu1 %v10395_v35  ;;  %8639 = vmatprep.mubr.msk.bf16.mxu0 %vm170_vm0, %v9578_v59 }
 0x1e7   :  { %v2052_v37 = vadd.f32 %v10318_v25, %v1862_v45  ;;  %v1854_v52 = vadd.f32 %v10288_v5, %v1444_v62  ;;  %8621 = vmatprep.subr.bf16.mxu1 %v10409_v39  ;;  %v10428_v8 = vpop.f32.mrf.mxu1  ;;  %v1835_v5 = vadd.f32 %v10276_v58, %v1425_v54  ;;  %v2113_v46 = vmax.f32 %v2049_v43, 0.0  ;;  %v9580_v58 = vld [vmem:[%s12383_s0 + $0x30] sm:$0xff]  }
 0x1e8   :  { %v8489_v55 = vpop.f32.mrf.mxu0  ;;  %v10451_v45 = vpack.c.bf16 %v2112_v32, %v2111_v40 }
 0x1e9   :  { %v2116_v7 = vmax.f32 %v2052_v37, 0.0  ;;  %v2050_v19 = vadd.f32 %v10318_v25, %v1854_v52  ;;  %v10446_v54 = vpop.f32.mrf.mxu1  ;;  %v2045_v41 = vadd.f32 %v10318_v25, %v1835_v5 }
 0x1ea   :  { %v1457_v50 = vpop.f32.mrf.mxu0  ;;  %8622 = vmatpush3.bf16.msra.mxu1 %v10409_v39 }
 0x1eb   :  { %v2114_v23 = vmax.f32 %v2050_v19, 0.0  ;;  %v10431_v28 = vpack.c.bf16 %v2116_v7, %v2115_v42  ;;  %v10454_v21 = vpop.f32.mrf.mxu1  ;;  %v2109_v62 = vmax.f32 %v2045_v41, 0.0  ;;  %v1875_v42 = vadd.f32 %v10290_v10, %v8489_v55 }
 0x1ec   :  { %v8490_v30 = vpop.f32.mrf.mxu0 }
 0x1ed   :  { %8624 = vmatmul.mubr.msk.bf16.vlgmr.msra.gmra.mxu1 %vm170_vm0, %v9579_v20  ;;  %8631 = vmatprep.subr.bf16.mxu0 %v10431_v28  ;;  %v10439_v34 = vpack.c.bf16 %v2114_v23, %v2113_v46  ;;  %v1878_v43 = vadd.f32 %v10294_v13, %v8490_v30  ;;  %v10465_v56 = vpack.c.bf16 %v2110_v44, %v2109_v62  ;;  %v9582_v13 = vld [vmem:[%s12383_s0 + $0x60] sm:$0xff]  }
 0x1ee   :  { %v1460_v38 = vpop.f32.mrf.mxu0  ;;  %8632 = vmatpush3.bf16.msra.mxu0 %v10431_v28  ;;  %8627 = vmatprep.mubr.msk.bf16.mxu1 %vm170_vm0, %v9580_v58  ;;  %v2055_v32 = vadd.f32 %v10318_v25, %v1875_v42 }
 0x1ef   :  { %8633 = vmatprep.subr.bf16.mxu0 %v10439_v34  ;;  %v2056_v10 = vadd.f32 %v10318_v25, %v1878_v43  ;;  %v1870_v5 = vadd.f32 %v10296_v15, %v1460_v38  ;;  %v9583_v38 = vld [vmem:[%s12383_s0 + $0x48] sm:$0xff]  }
 0x1f0   :  { %v8493_v53 = vpop.f32.mrf.mxu0  ;;  %v2119_v62 = vmax.f32 %v2055_v32, 0.0 }
 0x1f1   :  { %v1891_v47 = vadd.f32 %v10298_v16, %v8493_v53  ;;  %v9581_v16 = vld [vmem:[%s12383_s0 + $0x38] sm:$0xff]   ;;  %v2120_v44 = vmax.f32 %v2056_v10, 0.0  ;;  %v2054_v15 = vadd.f32 %v10318_v25, %v1870_v5 }
 0x1f2   :  { %v1473_v61 = vpop.f32.mrf.mxu0  ;;  %8634 = vmatpush3.bf16.msra.mxu0 %v10439_v34 }
 0x1f3   :  { %v1883_v59 = vadd.f32 %v10300_v18, %v1473_v61  ;;  %8635 = vmatprep.subr.bf16.mxu0 %v10451_v45  ;;  %v2059_v52 = vadd.f32 %v10318_v25, %v1891_v47 }
 0x1f4   :  { %v8494_v37 = vpop.f32.mrf.mxu0 }
 0x1f5   :  { %v1894_v57 = vadd.f32 %v10302_v22, %v8494_v37  ;;  %8628 = vmatmul.mubr.msk.bf16.gmra.mxu1 %vm170_vm0, %v9581_v16  ;;  %v10473_v22 = vpop.f32.mrf.mxu1  ;;  %v2057_v7 = vadd.f32 %v10318_v25, %v1883_v59  ;;  %v2123_v46 = vmax.f32 %v2059_v52, 0.0  ;;  %v2118_v37 = vmax.f32 %v2054_v15, 0.0 }
 0x1f6   :  { %v1476_v18 = vpop.f32.mrf.mxu0  ;;  %8636 = vmatpush3.bf16.msra.mxu0 %v10451_v45  ;;  %8655 = vmatprep.mubr.msk.bf16.mxu1 %vm170_vm0, %v9582_v13 }
 0x1f7   :  { %v2060_v19 = vadd.f32 %v10318_v25, %v1894_v57  ;;  %v1886_v26 = vadd.f32 %v10304_v0, %v1476_v18  ;;  %8637 = vmatprep.subr.bf16.mxu0 %v10465_v56  ;;  %v10484_v20 = vpop.f32.mrf.mxu1  ;;  %v1867_v0 = vadd.f32 %v10292_v12, %v1457_v50  ;;  %v2121_v58 = vmax.f32 %v2057_v7, 0.0  ;;  %v9584_v12 = vld [vmem:[%s12383_s0 + $0x50] sm:$0xff]  }
 0x1f8   :  { %v8497_v55 = vpop.f32.mrf.mxu0  ;;  %v10507_v57 = vpack.c.bf16 %v2120_v44, %v2119_v62 }
 0x1f9   :  { %v2124_v23 = vmax.f32 %v2060_v19, 0.0  ;;  %v2058_v30 = vadd.f32 %v10318_v25, %v1886_v26  ;;  %v10502_v50 = vpop.f32.mrf.mxu1  ;;  %v2053_v59 = vadd.f32 %v10318_v25, %v1867_v0 }
 0x1fa   :  { %v1489_v60 = vpop.f32.mrf.mxu0  ;;  %8638 = vmatpush3.bf16.msra.mxu0 %v10465_v56 }
 0x1fb   :  { %v2122_v40 = vmax.f32 %v2058_v30, 0.0  ;;  %v10487_v41 = vpack.c.bf16 %v2124_v23, %v2123_v46  ;;  %v10510_v42 = vpop.f32.mrf.mxu1  ;;  %v2117_v18 = vmax.f32 %v2053_v59, 0.0  ;;  %v1907_v46 = vadd.f32 %v10306_v4, %v8497_v55 }
 0x1fc   :  { %v8498_v53 = vpop.f32.mrf.mxu0 }
 0x1fd   :  { %8640 = vmatmul.mubr.msk.bf16.vlgmr.msra.gmra.mxu0 %vm170_vm0, %v9583_v38  ;;  %8647 = vmatprep.subr.bf16.mxu1 %v10487_v41  ;;  %v10495_v47 = vpack.c.bf16 %v2122_v40, %v2121_v58  ;;  %v1910_v7 = vadd.f32 %v10316_v24, %v8498_v53  ;;  %v10521_v5 = vpack.c.bf16 %v2118_v37, %v2117_v18  ;;  %v9586_v24 = vld [vmem:[%s12383_s0 + $0x80] sm:$0xff]  }
 0x1fe   :  { %v1492_v61 = vpop.f32.mrf.mxu0  ;;  %8648 = vmatpush3.bf16.msra.mxu1 %v10487_v41  ;;  %8643 = vmatprep.mubr.msk.bf16.mxu0 %vm170_vm0, %v9584_v12  ;;  %v2063_v44 = vadd.f32 %v10318_v25, %v1907_v46 }
 0x1ff   :  { %8649 = vmatprep.subr.bf16.mxu1 %v10495_v47  ;;  %v2064_v4 = vadd.f32 %v10318_v25, %v1910_v7  ;;  %v1902_v0 = vadd.f32 %v10323_v36, %v1492_v61  ;;  %v9587_v61 = vld [vmem:[%s12383_s0 + $0x68] sm:$0xff]  }
 0x200   :  { %v8501_v43 = vpop.f32.mrf.mxu0  ;;  %v2127_v18 = vmax.f32 %v2063_v44, 0.0 }
 0x201   :  { %v1923_v52 = vadd.f32 %v10332_v49, %v8501_v43  ;;  %v9585_v49 = vld [vmem:[%s12383_s0 + $0x58] sm:$0xff]   ;;  %v2128_v37 = vmax.f32 %v2064_v4, 0.0  ;;  %v2062_v36 = vadd.f32 %v10318_v25, %v1902_v0 }
 0x202   :  { %v1505_v16 = vpop.f32.mrf.mxu0  ;;  %8650 = vmatpush3.bf16.msra.mxu1 %v10495_v47 }
 0x203   :  { %v1915_v13 = vadd.f32 %v10342_v17, %v1505_v16  ;;  %8651 = vmatprep.subr.bf16.mxu1 %v10507_v57  ;;  %v2067_v26 = vadd.f32 %v10318_v25, %v1923_v52 }
 0x204   :  { %v8502_v19 = vpop.f32.mrf.mxu0 }
 0x205   :  { %v1926_v10 = vadd.f32 %v10350_v29, %v8502_v19  ;;  %8644 = vmatmul.mubr.msk.bf16.gmra.mxu0 %vm170_vm0, %v9585_v49  ;;  %v10529_v29 = vpop.f32.mrf.mxu1  ;;  %v2065_v23 = vadd.f32 %v10318_v25, %v1915_v13  ;;  %v2131_v58 = vmax.f32 %v2067_v26, 0.0  ;;  %v2126_v19 = vmax.f32 %v2062_v36, 0.0 }
 0x206   :  { %v1508_v17 = vpop.f32.mrf.mxu0  ;;  %8652 = vmatpush3.bf16.msra.mxu1 %v10507_v57  ;;  %8671 = vmatprep.mubr.msk.bf16.mxu0 %vm170_vm0, %v9586_v24 }
 0x207   :  { %v2068_v30 = vadd.f32 %v10318_v25, %v1926_v10  ;;  %v1918_v32 = vadd.f32 %v10361_v27, %v1508_v17  ;;  %8653 = vmatprep.subr.bf16.mxu1 %v10521_v5  ;;  %v10540_v38 = vpop.f32.mrf.mxu1  ;;  %v1899_v27 = vadd.f32 %v10310_v11, %v1489_v60  ;;  %v2129_v12 = vmax.f32 %v2065_v23, 0.0  ;;  %v9588_v11 = vld [vmem:[%s12383_s0 + $0x70] sm:$0xff]  }
 0x208   :  { %v8505_v55 = vpop.f32.mrf.mxu0  ;;  %v10563_v10 = vpack.c.bf16 %v2128_v37, %v2127_v18 }
 0x209   :  { %v2132_v40 = vmax.f32 %v2068_v30, 0.0  ;;  %v2066_v53 = vadd.f32 %v10318_v25, %v1918_v32  ;;  %v10558_v60 = vpop.f32.mrf.mxu1  ;;  %v2061_v13 = vadd.f32 %v10318_v25, %v1899_v27 }
 0x20a   :  { %v1521_v15 = vpop.f32.mrf.mxu0  ;;  %8654 = vmatpush3.bf16.msra.mxu1 %v10521_v5 }
 0x20b   :  { %v2130_v62 = vmax.f32 %v2066_v53, 0.0  ;;  %v10543_v59 = vpack.c.bf16 %v2132_v40, %v2131_v58  ;;  %v10566_v46 = vpop.f32.mrf.mxu1  ;;  %v2125_v17 = vmax.f32 %v2061_v13, 0.0  ;;  %v1939_v58 = vadd.f32 %v10372_v1, %v8505_v55 }
 0x20c   :  { %v8506_v43 = vpop.f32.mrf.mxu0 }
 0x20d   :  { %8656 = vmatmul.mubr.msk.bf16.vlgmr.msra.gmra.mxu1 %vm170_vm0, %v9587_v61  ;;  %8663 = vmatprep.subr.bf16.mxu0 %v10543_v59  ;;  %v10551_v52 = vpack.c.bf16 %v2130_v62, %v2129_v12  ;;  %v1942_v23 = vadd.f32 %v10398_v33, %v8506_v43  ;;  %v10577_v0 = vpack.c.bf16 %v2126_v19, %v2125_v17  ;;  %v1981_v40 = vpop.f32.mrf.mxu1  ;;  %v9590_v33 = vld [vmem:[%s12383_s0 + $0xa0] sm:$0xff]  }
 0x20e   :  { %v1524_v16 = vpop.f32.mrf.mxu0  ;;  %8664 = vmatpush3.bf16.msra.mxu0 %v10543_v59  ;;  %8659 = vmatprep.mubr.msk.bf16.mxu1 %vm170_vm0, %v9588_v11  ;;  %v2071_v37 = vadd.f32 %v10318_v25, %v1939_v58 }
 0x20f   :  { %8665 = vmatprep.subr.bf16.mxu0 %v10551_v52  ;;  %v2072_v1 = vadd.f32 %v10318_v25, %v1942_v23  ;;  %v1934_v27 = vadd.f32 %v10417_v63, %v1524_v16  ;;  %v10594_v61 = vpop.f32.mrf.mxu1  ;;  %v9591_v16 = vld [vmem:[%s12383_s0 + $0x88] sm:$0xff]  }
 0x210   :  { %v8509_v7 = vpop.f32.mrf.mxu0  ;;  %v2135_v17 = vmax.f32 %v2071_v37, 0.0 }
 0x211   :  { %v1955_v26 = vadd.f32 %v10428_v8, %v8509_v7  ;;  %v9589_v8 = vld [vmem:[%s12383_s0 + $0x78] sm:$0xff]   ;;  %v2136_v19 = vmax.f32 %v2072_v1, 0.0  ;;  %v2070_v63 = vadd.f32 %v10318_v25, %v1934_v27 }
 0x212   :  { %v1537_v49 = vpop.f32.mrf.mxu0  ;;  %8666 = vmatpush3.bf16.msra.mxu0 %v10551_v52 }
 0x213   :  { %v1947_v24 = vadd.f32 %v10446_v54, %v1537_v49  ;;  %8667 = vmatprep.subr.bf16.mxu0 %v10563_v10  ;;  %v2075_v32 = vadd.f32 %v10318_v25, %v1955_v26 }
 0x214   :  { %v8510_v30 = vpop.f32.mrf.mxu0 }
 0x215   :  { %v1958_v4 = vadd.f32 %v10454_v21, %v8510_v30  ;;  %8660 = vmatmul.mubr.msk.bf16.gmra.mxu1 %vm170_vm0, %v9589_v8  ;;  %v2073_v21 = vadd.f32 %v10318_v25, %v1947_v24  ;;  %v2139_v12 = vmax.f32 %v2075_v32, 0.0  ;;  %v2134_v30 = vmax.f32 %v2070_v63, 0.0 }
 0x216   :  { %v1540_v54 = vpop.f32.mrf.mxu0  ;;  %8668 = vmatpush3.bf16.msra.mxu0 %v10563_v10  ;;  %8687 = vmatprep.mubr.msk.bf16.mxu1 %vm170_vm0, %v9590_v33 }
 0x217   :  { %v2076_v53 = vadd.f32 %v10318_v25, %v1958_v4  ;;  %v1950_v44 = vadd.f32 %v10473_v22, %v1540_v54  ;;  %8669 = vmatprep.subr.bf16.mxu0 %v10577_v0  ;;  %v1931_v22 = vadd.f32 %v10390_v48, %v1521_v15  ;;  %v2137_v11 = vmax.f32 %v2073_v21, 0.0  ;;  %v9592_v48 = vld [vmem:[%s12383_s0 + $0x90] sm:$0xff]   ;;  %v10612_v15 = vpop.f32.mrf.mxu1 }
 0x218   :  { %v8513_v55 = vpop.f32.mrf.mxu0  ;;  %v10617_v4 = vpack.c.bf16 %v2136_v19, %v2135_v17 }
 0x219   :  { %v2140_v62 = vmax.f32 %v2076_v53, 0.0  ;;  %v2074_v43 = vadd.f32 %v10318_v25, %v1950_v44  ;;  %v2069_v24 = vadd.f32 %v10318_v25, %v1931_v22  ;;  %v8594_v58 = vpop.f32.mrf.mxu1 }
 0x21a   :  { %v1553_v36 = vpop.f32.mrf.mxu0  ;;  %8670 = vmatpush3.bf16.msra.mxu0 %v10577_v0 }
 0x21b   :  { %v2138_v18 = vmax.f32 %v2074_v43, 0.0  ;;  %v10597_v13 = vpack.c.bf16 %v2140_v62, %v2139_v12  ;;  %v2133_v54 = vmax.f32 %v2069_v24, 0.0  ;;  %v1971_v12 = vadd.f32 %v10484_v20, %v8513_v55  ;;  %v10633_v62 = vpop.f32.mrf.mxu1 }
 0x21c   :  { %v8514_v7 = vpop.f32.mrf.mxu0 }
 0x21d   :  { %8672 = vmatmul.mubr.msk.bf16.vlgmr.msra.gmra.mxu0 %vm170_vm0, %v9591_v16  ;;  %8679 = vmatprep.subr.bf16.mxu1 %v10597_v13  ;;  %v10605_v26 = vpack.c.bf16 %v2138_v18, %v2137_v11  ;;  %v1974_v21 = vadd.f32 %v10510_v42, %v8514_v7  ;;  %v10629_v27 = vpack.c.bf16 %v2134_v30, %v2133_v54  ;;  %v9594_v42 = vld [vmem:[%s12383_s0 + $0xc0] sm:$0xff]   ;;  %v8597_v16 = vpop.f32.mrf.mxu1 }
 0x21e   :  { %v1556_v49 = vpop.f32.mrf.mxu0  ;;  %8680 = vmatpush3.bf16.msra.mxu1 %v10597_v13  ;;  %8675 = vmatprep.mubr.msk.bf16.mxu0 %vm170_vm0, %v9592_v48  ;;  %v2079_v19 = vadd.f32 %v10318_v25, %v1971_v12  ;;  %v1963_v48 = vadd.f32 %v10502_v50, %v1553_v36  ;;  %v9596_v36 = vld [vmem:[%s12383_s0 + $0xb0] sm:$0xff]  }
 0x21f   :  { %8681 = vmatprep.subr.bf16.mxu1 %v10605_v26  ;;  %v2080_v20 = vadd.f32 %v10318_v25, %v1974_v21  ;;  %v1966_v22 = vadd.f32 %v10529_v29, %v1556_v49  ;;  %v9595_v49 = vld [vmem:[%s12383_s0 + $0xa8] sm:$0xff]   ;;  %v2010_v50 = vpop.f32.mrf.mxu1 }
 0x220   :  { %v8517_v23 = vpop.f32.mrf.mxu0  ;;  %v2143_v54 = vmax.f32 %v2079_v19, 0.0 }
 0x221   :  { %v1987_v32 = vadd.f32 %v10540_v38, %v8517_v23  ;;  %v9593_v38 = vld [vmem:[%s12383_s0 + $0x98] sm:$0xff]   ;;  %v2144_v30 = vmax.f32 %v2080_v20, 0.0  ;;  %v2078_v29 = vadd.f32 %v10318_v25, %v1966_v22  ;;  %v8598_v12 = vpop.f32.mrf.mxu1 }
 0x222   :  { %v1569_v8 = vpop.f32.mrf.mxu0  ;;  %8682 = vmatpush3.bf16.msra.mxu1 %v10605_v26  ;;  %v9597_v22 = vld [vmem:[%s12383_s0 + $0xb8] sm:$0xff]  }
 0x223   :  { %v1979_v33 = vadd.f32 %v10558_v60, %v1569_v8  ;;  %8683 = vmatprep.subr.bf16.mxu1 %v10617_v4  ;;  %v2083_v44 = vadd.f32 %v10318_v25, %v1987_v32  ;;  %v2013_v19 = vpop.f32.mrf.mxu1 }
 0x224   :  { %v8518_v53 = vpop.f32.mrf.mxu0 }
 0x225   :  { %v1990_v1 = vadd.f32 %v10566_v46, %v8518_v53  ;;  %8676 = vmatmul.mubr.msk.bf16.gmra.mxu0 %vm170_vm0, %v9593_v38  ;;  %v2081_v46 = vadd.f32 %v10318_v25, %v1979_v33  ;;  %v2147_v11 = vmax.f32 %v2083_v44, 0.0  ;;  %v2077_v33 = vadd.f32 %v10318_v25, %v1963_v48 }
 0x226   :  { %v1572_v60 = vpop.f32.mrf.mxu0  ;;  %8684 = vmatpush3.bf16.msra.mxu1 %v10617_v4  ;;  %8703 = vmatprep.mubr.msk.bf16.mxu0 %vm170_vm0, %v9594_v42  ;;  %v2142_v53 = vmax.f32 %v2078_v29, 0.0 }
 0x227   :  { %v2084_v43 = vadd.f32 %v10318_v25, %v1990_v1  ;;  %v1982_v37 = vadd.f32 %v1981_v40, %v1572_v60  ;;  %8685 = vmatprep.subr.bf16.mxu1 %v10629_v27  ;;  %v2145_v40 = vmax.f32 %v2081_v46, 0.0  ;;  %v10665_v1 = vpack.c.bf16 %v2144_v30, %v2143_v54 }
 0x228   :  { %v8521_v55 = vpop.f32.mrf.mxu0  ;;  %v2141_v60 = vmax.f32 %v2077_v33, 0.0 }
 0x229   :  { %v2148_v18 = vmax.f32 %v2084_v43, 0.0  ;;  %v2082_v7 = vadd.f32 %v10318_v25, %v1982_v37 }
 0x22a   :  { %v1585_v63 = vpop.f32.mrf.mxu0  ;;  %8686 = vmatpush3.bf16.msra.mxu1 %v10629_v27 }
 0x22b   :  { %v2146_v17 = vmax.f32 %v2082_v7, 0.0  ;;  %v10648_v24 = vpack.c.bf16 %v2148_v18, %v2147_v11  ;;  %v10674_v11 = vpack.c.bf16 %v2142_v53, %v2141_v60  ;;  %v2003_v18 = vadd.f32 %v10594_v61, %v8521_v55 }
 0x22c   :  { %v8522_v23 = vpop.f32.mrf.mxu0 }
 0x22d   :  { %8688 = vmatmul.mubr.msk.bf16.vlgmr.msra.gmra.mxu1 %vm170_vm0, %v9595_v49  ;;  %8695 = vmatprep.subr.bf16.mxu0 %v10648_v24  ;;  %v10656_v32 = vpack.c.bf16 %v2146_v17, %v2145_v40  ;;  %v2006_v46 = vadd.f32 %v8594_v58, %v8522_v23  ;;  %v9598_v58 = vld [vmem:[%s12383_s0 + $0xe0] sm:$0xff]   ;;  %v9554_v17 = vld [vmem:[#allocation2 + $0x78] sm:$0xff]   ;;  %v2087_v49 = vadd.f32 %v10318_v25, %v2003_v18  ;;  %v9602_v18 = vld [vmem:[%s12383_s0 + $0xe8] sm:$0xff]  }
 0x22e   :  { %v1588_v8 = vpop.f32.mrf.mxu0  ;;  %8696 = vmatpush3.bf16.msra.mxu0 %v10648_v24  ;;  %8691 = vmatprep.mubr.msk.bf16.mxu1 %vm170_vm0, %v9596_v36 }
 0x22f   :  { %8697 = vmatprep.subr.bf16.mxu0 %v10656_v32  ;;  %v2088_v61 = vadd.f32 %v10318_v25, %v2006_v46  ;;  %v1998_v55 = vadd.f32 %v10633_v62, %v1588_v8  ;;  %v9599_v62 = vld [vmem:[%s12383_s0 + $0xc8] sm:$0xff]  }
 0x230   :  { %v8525_v21 = vpop.f32.mrf.mxu0 }
 0x231   :  { %v2019_v44 = vadd.f32 %v8597_v16, %v8525_v21  ;;  %v9555_v21 = vld [vmem:[#allocation2 + $0x70] sm:$0xff]   ;;  %v2152_v53 = vmax.f32 %v2088_v61, 0.0 }
 0x232   :  { %v1601_v38 = vpop.f32.mrf.mxu0  ;;  %8698 = vmatpush3.bf16.msra.mxu0 %v10656_v32 }
 0x233   :  { %v2011_v42 = vadd.f32 %v2010_v50, %v1601_v38  ;;  %8699 = vmatprep.subr.bf16.mxu0 %v10665_v1  ;;  %v2091_v37 = vadd.f32 %v10318_v25, %v2019_v44  ;;  %v1995_v50 = vadd.f32 %v10612_v15, %v1585_v63  ;;  %v2086_v44 = vadd.f32 %v10318_v25, %v1998_v55  ;;  %v9600_v15 = vld [vmem:[%s12383_s0 + $0xd0] sm:$0xff]  }
 0x234   :  { %v8526_v43 = vpop.f32.mrf.mxu0  ;;  %v2151_v63 = vmax.f32 %v2087_v49, 0.0 }
 0x235   :  { %v2022_v20 = vadd.f32 %v8598_v12, %v8526_v43  ;;  %8692 = vmatmul.mubr.msk.bf16.gmra.mxu1 %vm170_vm0, %v9597_v22  ;;  %v2089_v16 = vadd.f32 %v10318_v25, %v2011_v42  ;;  %v2155_v23 = vmax.f32 %v2091_v37, 0.0  ;;  %v2085_v38 = vadd.f32 %v10318_v25, %v1995_v50  ;;  %v9556_v12 = vld [vmem:[#allocation2 + $0x68] sm:$0xff]   ;;  %v9557_v43 = vld [vmem:[#allocation2 + $0x60] sm:$0xff]   ;;  %v9551_v22 = vld [vmem:[#allocation2 + $0x50] sm:$0xff]  }
 0x236   :  { %8700 = vmatpush3.bf16.msra.mxu0 %v10665_v1  ;;  %v1604_v7 = vpop.f32.mrf.mxu0  ;;  %8719 = vmatprep.mubr.msk.bf16.mxu1 %vm170_vm0, %v9598_v58  ;;  %v2150_v60 = vmax.f32 %v2086_v44, 0.0  ;;  %v10708_v42 = vpack.c.bf16 %v2152_v53, %v2151_v63  ;;  %v9553_v58 = vld [vmem:[#allocation2 + $0x40] sm:$0xff]  }
 0x237   :  { %v2092_v48 = vadd.f32 %v10318_v25, %v2022_v20  ;;  %8701 = vmatprep.subr.bf16.mxu0 %v10674_v11  ;;  %v2014_v40 = vadd.f32 %v2013_v19, %v1604_v7  ;;  %v2153_v36 = vmax.f32 %v2089_v16, 0.0  ;;  %v2149_v46 = vmax.f32 %v2085_v38, 0.0  ;;  %v9550_v20 = vld [vmem:[#allocation2 + $0x58] sm:$0xff]   ;;  %v9603_v7 = vld [vmem:[%s12383_s0 + $0xf0] sm:$0xff]   ;;  %v9552_v19 = vld [vmem:[#allocation2 + $0x48] sm:$0xff]  }
 0x238   :  { %v9604_v16 = vld [vmem:[%s12383_s0 + $0xf8] sm:$0xff]  }
 0x239   :  { %v2156_v30 = vmax.f32 %v2092_v48, 0.0  ;;  %v2090_v29 = vadd.f32 %v10318_v25, %v2014_v40  ;;  %v9601_v25 = vld [vmem:[%s12383_s0 + $0xd8] sm:$0xff]   ;;  %v10716_v37 = vpack.c.bf16 %v2150_v60, %v2149_v46 }
 0x23a   :  { %8702 = vmatpush3.bf16.msra.mxu0 %v10674_v11 }
 0x23b   :  { %v2154_v54 = vmax.f32 %v2090_v29, 0.0  ;;  %v10691_v33 = vpack.c.bf16 %v2156_v30, %v2155_v23  ;;  %8727 = vmatprep.subr.bf16.mxu0 %v9554_v17 }
 0x23d   :  { %8704 = vmatmul.mubr.msk.bf16.vlgmr.msra.gmra.mxu0 %vm170_vm0, %v9599_v62  ;;  %8711 = vmatprep.subr.bf16.mxu1 %v10691_v33  ;;  %v10699_v8 = vpack.c.bf16 %v2154_v54, %v2153_v36  ;;  %v9605_v62 = vld [vmem:[%s12383_s0 + $0x20] sm:$0xff]  }
 0x23e   :  { %8712 = vmatpush3.bf16.msra.mxu1 %v10691_v33  ;;  %8707 = vmatprep.mubr.msk.bf16.mxu0 %vm170_vm0, %v9600_v15 }
 0x23f   :  { %8713 = vmatprep.subr.bf16.mxu1 %v10699_v8  ;;  %8728 = vmatpush3.bf16.msra.mxu0 %v9554_v17 }
 0x240   :  { %8729 = vmatprep.subr.bf16.mxu0 %v9555_v21 }
 0x242   :  { %8714 = vmatpush3.bf16.msra.mxu1 %v10699_v8 }
 0x243   :  { %8715 = vmatprep.subr.bf16.mxu1 %v10708_v42  ;;  %8730 = vmatpush3.bf16.msra.mxu0 %v9555_v21 }
 0x244   :  { %8731 = vmatprep.subr.bf16.mxu0 %v9556_v12 }
 0x245   :  { %8708 = vmatmul.mubr.msk.bf16.gmra.mxu0 %vm170_vm0, %v9601_v25 }
 0x246   :  { %8716 = vmatpush3.bf16.msra.mxu1 %v10708_v42 }
 0x247   :  { %8717 = vmatprep.subr.bf16.mxu1 %v10716_v37  ;;  %8732 = vmatpush3.bf16.msra.mxu0 %v9556_v12 }
 0x248   :  { %8733 = vmatprep.subr.bf16.mxu0 %v9557_v43 }
 0x24a   :  { %8718 = vmatpush3.bf16.msra.mxu1 %v10716_v37 }
 0x24b   :  { %8799 = vmatprep.subr.bf16.mxu1 %v9550_v20  ;;  %8734 = vmatpush3.bf16.msra.mxu0 %v9557_v43 }
 0x24d   :  { %8720 = vmatmul.mubr.msk.bf16.vlgmr.msra.gmra.mxu1 %vm170_vm0, %v9602_v18 }
 0x24e   :  { %8800 = vmatpush3.bf16.msra.mxu1 %v9550_v20  ;;  %8723 = vmatprep.mubr.msk.bf16.mxu1 %vm170_vm0, %v9603_v7 }
 0x24f   :  { %8801 = vmatprep.subr.bf16.mxu1 %v9551_v22 }
 0x252   :  { %8802 = vmatpush3.bf16.msra.mxu1 %v9551_v22 }
 0x253   :  { %8803 = vmatprep.subr.bf16.mxu1 %v9552_v19 }
 0x255   :  { %8724 = vmatmul.mubr.msk.bf16.gmra.mxu1 %vm170_vm0, %v9604_v16 }
 0x256   :  { %8804 = vmatpush3.bf16.msra.mxu1 %v9552_v19  ;;  %8807 = vmatprep.mubr.msk.bf16.mxu1 %vm170_vm0, %v10357_v51 }
 0x257   :  { %8805 = vmatprep.subr.bf16.mxu1 %v9553_v58 }
 0x25a   :  { %8806 = vmatpush3.bf16.msra.mxu1 %v9553_v58 }
 0x25d   :  { %8808 = vmatmul.mubr.msk.bf16.vlgmr.msra.gmra.mxu1 %vm170_vm0, %v10347_v9 }
 0x25e   :  { %8811 = vmatprep.mubr.msk.bf16.mxu1 %vm170_vm0, %v10339_v31 }
 0x265   :  { %8812 = vmatmul.mubr.msk.bf16.gmra.mxu1 %vm170_vm0, %v10335_v2 }
 0x266   :  { %8815 = vmatprep.mubr.msk.bf16.mxu1 %vm170_vm0, %v10409_v39 }
 0x26d   :  { %8816 = vmatmul.mubr.msk.bf16.gmra.mxu1 %vm170_vm0, %v10395_v35 }
 0x26e   :  { %8819 = vmatprep.mubr.msk.bf16.mxu1 %vm170_vm0, %v10383_v3 }
 0x275   :  { %8820 = vmatmul.mubr.msk.bf16.gmra.mxu1 %vm170_vm0, %v10375_v14 }
 0x276   :  { %8823 = vmatprep.mubr.msk.bf16.mxu1 %vm170_vm0, %v10465_v56 }
 0x27d   :  { %8824 = vmatmul.mubr.msk.bf16.gmra.mxu1 %vm170_vm0, %v10451_v45 }
 0x27e   :  { %8827 = vmatprep.mubr.msk.bf16.mxu1 %vm170_vm0, %v10439_v34 }
 0x285   :  { %8828 = vmatmul.mubr.msk.bf16.gmra.mxu1 %vm170_vm0, %v10431_v28 }
 0x286   :  { %8831 = vmatprep.mubr.msk.bf16.mxu1 %vm170_vm0, %v10521_v5 }
 0x28d   :  { %8832 = vmatmul.mubr.msk.bf16.gmra.mxu1 %vm170_vm0, %v10507_v57 }
 0x28e   :  { %8835 = vmatprep.mubr.msk.bf16.mxu1 %vm170_vm0, %v10495_v47 }
 0x295   :  { %8836 = vmatmul.mubr.msk.bf16.gmra.mxu1 %vm170_vm0, %v10487_v41 }
 0x296   :  { %8839 = vmatprep.mubr.msk.bf16.mxu1 %vm170_vm0, %v10577_v0 }
 0x29d   :  { %v8609_v2 = vpop.f32.mrf.mxu0  ;;  %8840 = vmatmul.mubr.msk.bf16.gmra.mxu1 %vm170_vm0, %v10563_v10 }
 0x29e   :  { %8843 = vmatprep.mubr.msk.bf16.mxu1 %vm170_vm0, %v10551_v52 }
 0x29f   :  { %v2223_v31 = vpop.f32.mrf.mxu0 }
 0x2a1   :  { %v8610_v9 = vpop.f32.mrf.mxu0 }
 0x2a2   :  { %v2710_v3 = vpack.c.bf16 %v8610_v9, %v8609_v2 }
 0x2a3   :  { %v2226_v51 = vpop.f32.mrf.mxu0 }
 0x2a4   :  { %v2709_v14 = vpack.c.bf16 %v2226_v51, %v2223_v31 }
 0x2a5   :  { %v8613_v35 = vpop.f32.mrf.mxu0  ;;  %8844 = vmatmul.mubr.msk.bf16.gmra.mxu1 %vm170_vm0, %v10543_v59 }
 0x2a6   :  { %8735 = vmatprep.mubr.msk.bf16.mxu0 %vm170_vm0, %v2709_v14  ;;  %8847 = vmatprep.mubr.msk.bf16.mxu1 %vm170_vm0, %v10629_v27 }
 0x2a7   :  { %v2239_v39 = vpop.f32.mrf.mxu0  ;;  %8736 = vmatmul.mubr.msk.bf16.vlgmr.msra.gmra.mxu0 %vm170_vm0, %v2710_v3 }
 0x2a9   :  { %v8614_v28 = vpop.f32.mrf.mxu0 }
 0x2aa   :  { %v2712_v56 = vpack.c.bf16 %v8614_v28, %v8613_v35 }
 0x2ab   :  { %v2242_v34 = vpop.f32.mrf.mxu0 }
 0x2ac   :  { %v2711_v45 = vpack.c.bf16 %v2242_v34, %v2239_v39 }
 0x2ad   :  { %v8625_v41 = vpop.f32.mrf.mxu1  ;;  %8848 = vmatmul.mubr.msk.bf16.gmra.mxu1 %vm170_vm0, %v10617_v4 }
 0x2ae   :  { %8739 = vmatprep.mubr.msk.bf16.mxu0 %vm170_vm0, %v2711_v45  ;;  %8851 = vmatprep.mubr.msk.bf16.mxu1 %vm170_vm0, %v10605_v26 }
 0x2af   :  { %v2288_v47 = vpop.f32.mrf.mxu1  ;;  %8740 = vmatmul.mubr.msk.bf16.gmra.mxu0 %vm170_vm0, %v2712_v56 }
 0x2b1   :  { %v8626_v57 = vpop.f32.mrf.mxu1 }
 0x2b2   :  { %v2714_v52 = vpack.c.bf16 %v8626_v57, %v8625_v41 }
 0x2b3   :  { %v2291_v5 = vpop.f32.mrf.mxu1 }
 0x2b4   :  { %v2713_v59 = vpack.c.bf16 %v2291_v5, %v2288_v47 }
 0x2b5   :  { %v8629_v10 = vpop.f32.mrf.mxu1  ;;  %8852 = vmatmul.mubr.msk.bf16.gmra.mxu1 %vm170_vm0, %v10597_v13 }
 0x2b6   :  { %8743 = vmatprep.mubr.msk.bf16.mxu0 %vm170_vm0, %v2713_v59  ;;  %8855 = vmatprep.mubr.msk.bf16.mxu1 %vm170_vm0, %v10674_v11 }
 0x2b7   :  { %v2304_v0 = vpop.f32.mrf.mxu1  ;;  %8744 = vmatmul.mubr.msk.bf16.gmra.mxu0 %vm170_vm0, %v2714_v52 }
 0x2b9   :  { %v8630_v26 = vpop.f32.mrf.mxu1 }
 0x2ba   :  { %v2716_v48 = vpack.c.bf16 %v8630_v26, %v8629_v10 }
 0x2bb   :  { %v2307_v4 = vpop.f32.mrf.mxu1 }
 0x2bc   :  { %v2715_v27 = vpack.c.bf16 %v2307_v4, %v2304_v0 }
 0x2bd   :  { %v8641_v40 = vpop.f32.mrf.mxu0  ;;  %8856 = vmatmul.mubr.msk.bf16.gmra.mxu1 %vm170_vm0, %v10665_v1 }
 0x2be   :  { %8747 = vmatprep.mubr.msk.bf16.mxu0 %vm170_vm0, %v2715_v27  ;;  %8859 = vmatprep.mubr.msk.bf16.mxu1 %vm170_vm0, %v10656_v32 }
 0x2bf   :  { %v2353_v13 = vpop.f32.mrf.mxu0  ;;  %8748 = vmatmul.mubr.msk.bf16.gmra.mxu0 %vm170_vm0, %v2716_v48 }
 0x2c1   :  { %v8642_v11 = vpop.f32.mrf.mxu0 }
 0x2c2   :  { %v2718_v55 = vpack.c.bf16 %v8642_v11, %v8641_v40 }
 0x2c3   :  { %v2356_v17 = vpop.f32.mrf.mxu0 }
 0x2c4   :  { %v2717_v61 = vpack.c.bf16 %v2356_v17, %v2353_v13 }
 0x2c5   :  { %v8645_v23 = vpop.f32.mrf.mxu0  ;;  %8860 = vmatmul.mubr.msk.bf16.gmra.mxu1 %vm170_vm0, %v10648_v24 }
 0x2c6   :  { %8751 = vmatprep.mubr.msk.bf16.mxu0 %vm170_vm0, %v2717_v61  ;;  %8863 = vmatprep.mubr.msk.bf16.mxu1 %vm170_vm0, %v10716_v37 }
 0x2c7   :  { %v2369_v1 = vpop.f32.mrf.mxu0  ;;  %8752 = vmatmul.mubr.msk.bf16.gmra.mxu0 %vm170_vm0, %v2718_v55 }
 0x2c9   :  { %v8646_v32 = vpop.f32.mrf.mxu0 }
 0x2ca   :  { %v2720_v49 = vpack.c.bf16 %v8646_v32, %v8645_v23 }
 0x2cb   :  { %v2372_v30 = vpop.f32.mrf.mxu0 }
 0x2cc   :  { %v2719_v29 = vpack.c.bf16 %v2372_v30, %v2369_v1 }
 0x2cd   :  { %v8657_v50 = vpop.f32.mrf.mxu1  ;;  %8864 = vmatmul.mubr.msk.bf16.gmra.mxu1 %vm170_vm0, %v10708_v42 }
 0x2ce   :  { %8755 = vmatprep.mubr.msk.bf16.mxu0 %vm170_vm0, %v2719_v29  ;;  %8867 = vmatprep.mubr.msk.bf16.mxu1 %vm170_vm0, %v10699_v8 }
 0x2cf   :  { %v2418_v24 = vpop.f32.mrf.mxu1  ;;  %8756 = vmatmul.mubr.msk.bf16.gmra.mxu0 %vm170_vm0, %v2720_v49 }
 0x2d1   :  { %v8658_v36 = vpop.f32.mrf.mxu1 }
 0x2d2   :  { %v2722_v53 = vpack.c.bf16 %v8658_v36, %v8657_v50  ;;  %v9606_v50 = vld [vmem:[%s12383_s0] sm:$0xff]  }
 0x2d3   :  { %v2421_v54 = vpop.f32.mrf.mxu1 }
 0x2d4   :  { %v2721_v21 = vpack.c.bf16 %v2421_v54, %v2418_v24 }
 0x2d5   :  { %v8661_v44 = vpop.f32.mrf.mxu1  ;;  %8868 = vmatmul.mubr.msk.bf16.gmra.mxu1 %vm170_vm0, %v10691_v33 }
 0x2d6   :  { %8759 = vmatprep.mubr.msk.bf16.mxu0 %vm170_vm0, %v2721_v21  ;;  %8895 = vmatprep.mubr.msk.bf16.mxu1 %vm170_vm0, %v9605_v62 }
 0x2d7   :  { %v2434_v8 = vpop.f32.mrf.mxu1  ;;  %8760 = vmatmul.mubr.msk.bf16.gmra.mxu0 %vm170_vm0, %v2722_v53 }
 0x2d9   :  { %v8662_v15 = vpop.f32.mrf.mxu1 }
 0x2da   :  { %v2724_v12 = vpack.c.bf16 %v8662_v15, %v8661_v44 }
 0x2db   :  { %v2437_v63 = vpop.f32.mrf.mxu1 }
 0x2dc   :  { %v2723_v38 = vpack.c.bf16 %v2437_v63, %v2434_v8 }
 0x2dd   :  { %v8673_v60 = vpop.f32.mrf.mxu0 }
 0x2de   :  { %8763 = vmatprep.mubr.msk.bf16.mxu0 %vm170_vm0, %v2723_v38 }
 0x2df   :  { %v2483_v42 = vpop.f32.mrf.mxu0  ;;  %8764 = vmatmul.mubr.msk.bf16.gmra.mxu0 %vm170_vm0, %v2724_v12 }
 0x2e1   :  { %v8674_v33 = vpop.f32.mrf.mxu0 }
 0x2e2   :  { %v2726_v25 = vpack.c.bf16 %v8674_v33, %v8673_v60 }
 0x2e3   :  { %v2486_v46 = vpop.f32.mrf.mxu0 }
 0x2e4   :  { %v2725_v43 = vpack.c.bf16 %v2486_v46, %v2483_v42 }
 0x2e5   :  { %v8677_v37 = vpop.f32.mrf.mxu0 }
 0x2e6   :  { %8767 = vmatprep.mubr.msk.bf16.mxu0 %vm170_vm0, %v2725_v43 }
 0x2e7   :  { %v2499_v20 = vpop.f32.mrf.mxu0  ;;  %8768 = vmatmul.mubr.msk.bf16.gmra.mxu0 %vm170_vm0, %v2726_v25 }
 0x2e9   :  { %v8678_v22 = vpop.f32.mrf.mxu0 }
 0x2ea   :  { %v2728_v19 = vpack.c.bf16 %v8678_v22, %v8677_v37 }
 0x2eb   :  { %v2502_v18 = vpop.f32.mrf.mxu0 }
 0x2ec   :  { %v2727_v7 = vpack.c.bf16 %v2502_v18, %v2499_v20 }
 0x2ed   :  { %v8689_v58 = vpop.f32.mrf.mxu1 }
 0x2ee   :  { %8771 = vmatprep.mubr.msk.bf16.mxu0 %vm170_vm0, %v2727_v7 }
 0x2ef   :  { %v2548_v16 = vpop.f32.mrf.mxu1  ;;  %8772 = vmatmul.mubr.msk.bf16.gmra.mxu0 %vm170_vm0, %v2728_v19 }
 0x2f1   :  { %v8690_v2 = vpop.f32.mrf.mxu1 }
 0x2f2   :  { %v2730_v51 = vpack.c.bf16 %v8690_v2, %v8689_v58 }
 0x2f3   :  { %v2551_v31 = vpop.f32.mrf.mxu1 }
 0x2f4   :  { %v2729_v9 = vpack.c.bf16 %v2551_v31, %v2548_v16 }
 0x2f5   :  { %v8693_v14 = vpop.f32.mrf.mxu1 }
 0x2f6   :  { %8775 = vmatprep.mubr.msk.bf16.mxu0 %vm170_vm0, %v2729_v9 }
 0x2f7   :  { %v2564_v3 = vpop.f32.mrf.mxu1  ;;  %8776 = vmatmul.mubr.msk.bf16.gmra.mxu0 %vm170_vm0, %v2730_v51 }
 0x2f9   :  { %v8694_v35 = vpop.f32.mrf.mxu1 }
 0x2fa   :  { %v2732_v34 = vpack.c.bf16 %v8694_v35, %v8693_v14 }
 0x2fb   :  { %v2567_v39 = vpop.f32.mrf.mxu1 }
 0x2fc   :  { %v2731_v28 = vpack.c.bf16 %v2567_v39, %v2564_v3 }
 0x2fd   :  { %v8705_v45 = vpop.f32.mrf.mxu0 }
 0x2fe   :  { %8779 = vmatprep.mubr.msk.bf16.mxu0 %vm170_vm0, %v2731_v28 }
 0x2ff   :  { %v2613_v56 = vpop.f32.mrf.mxu0  ;;  %8780 = vmatmul.mubr.msk.bf16.gmra.mxu0 %vm170_vm0, %v2732_v34 }
 0x301   :  { %v8706_v41 = vpop.f32.mrf.mxu0 }
 0x302   :  { %v2734_v5 = vpack.c.bf16 %v8706_v41, %v8705_v45  ;;  %v3579_v45 = vsub.s32 1, %v10308_v6 }
 0x303   :  { %v2616_v47 = vpop.f32.mrf.mxu0 }
 0x304   :  { %v2733_v57 = vpack.c.bf16 %v2616_v47, %v2613_v56 }
 0x305   :  { %v8709_v59 = vpop.f32.mrf.mxu0 }
 0x306   :  { %8783 = vmatprep.mubr.msk.bf16.mxu0 %vm170_vm0, %v2733_v57 }
 0x307   :  { %v2629_v52 = vpop.f32.mrf.mxu0  ;;  %8784 = vmatmul.mubr.msk.bf16.gmra.mxu0 %vm170_vm0, %v2734_v5  ;;  %v9607_v5 = vld [vmem:[%s12388_s5] sm:$0xff] }
 0x309   :  { %v8710_v10 = vpop.f32.mrf.mxu0 }
 0x30a   :  { %v2736_v4 = vpack.c.bf16 %v8710_v10, %v8709_v59  ;;  %v10897_v59 = vrot.slane %v9607_v5, %v3579_v45 }
 0x30b   :  { %v2632_v0 = vpop.f32.mrf.mxu0 }
 0x30c   :  { %v2735_v26 = vpack.c.bf16 %v2632_v0, %v2629_v52 }
 0x30d   :  { %v8721_v27 = vpop.f32.mrf.mxu1 }
 0x30e   :  { %8787 = vmatprep.mubr.msk.bf16.mxu0 %vm170_vm0, %v2735_v26 }
 0x30f   :  { %v2678_v48 = vpop.f32.mrf.mxu1  ;;  %8788 = vmatmul.mubr.msk.bf16.gmra.mxu0 %vm170_vm0, %v2736_v4 }
 0x311   :  { %v8722_v40 = vpop.f32.mrf.mxu1 }
 0x312   :  { %v2738_v17 = vpack.c.bf16 %v8722_v40, %v8721_v27 }
 0x313   :  { %v2681_v13 = vpop.f32.mrf.mxu1 }
 0x314   :  { %v2737_v11 = vpack.c.bf16 %v2681_v13, %v2678_v48 }
 0x315   :  { %v8725_v61 = vpop.f32.mrf.mxu1 }
 0x316   :  { %8791 = vmatprep.mubr.msk.bf16.mxu0 %vm170_vm0, %v2737_v11 }
 0x317   :  { %v2694_v55 = vpop.f32.mrf.mxu1  ;;  %8792 = vmatmul.mubr.msk.bf16.gmra.mxu0 %vm170_vm0, %v2738_v17 }
 0x319   :  { %v8726_v23 = vpop.f32.mrf.mxu1 }
 0x31a   :  { %v2740_v30 = vpack.c.bf16 %v8726_v23, %v8725_v61 }
 0x31b   :  { %v2697_v1 = vpop.f32.mrf.mxu1 }
 0x31c   :  { %v2739_v32 = vpack.c.bf16 %v2697_v1, %v2694_v55 }
 0x31d   :  { %v8809_v29 = vpop.f32.mrf.mxu1 }
 0x31e   :  { %8795 = vmatprep.mubr.msk.bf16.mxu0 %vm170_vm0, %v2739_v32 }
 0x31f   :  { %8796 = vmatmul.mubr.msk.bf16.gmra.mxu0 %vm170_vm0, %v2740_v30  ;;  %v10833_v49 = vpop.f32.mrf.mxu1 }
 0x320   :  { %8879 = vmatprep.mubr.msk.bf16.mxu0 %vm170_vm0, %v9606_v50 }
 0x321   :  { %v8810_v24 = vpop.f32.mrf.mxu1 }
 0x323   :  { %v3325_v36 = vpop.f32.mrf.mxu1 }
 0x325   :  { %v8813_v54 = vpop.f32.mrf.mxu1 }
 0x327   :  { %v3338_v21 = vpop.f32.mrf.mxu1 }
 0x329   :  { %v8814_v53 = vpop.f32.mrf.mxu1 }
 0x32b   :  { %v3341_v44 = vpop.f32.mrf.mxu1 }
 0x32d   :  { %v10839_v62 = vpop.f32.mrf.mxu1 }
 0x32f   :  { %v10841_v8 = vpop.f32.mrf.mxu1 }
 0x331   :  { %v10843_v15 = vpop.f32.mrf.mxu1 }
 0x333   :  { %v10845_v63 = vpop.f32.mrf.mxu1 }
 0x335   :  { %v10847_v38 = vpop.f32.mrf.mxu1 }
 0x337   :  { %v10849_v12 = vpop.f32.mrf.mxu1 }
 0x339   :  { %v10851_v60 = vpop.f32.mrf.mxu1 }
 0x33b   :  { %v10853_v42 = vpop.f32.mrf.mxu1 }
 0x33d   :  { %v10855_v33 = vpop.f32.mrf.mxu1 }
 0x33f   :  { %v10857_v46 = vpop.f32.mrf.mxu1 }
 0x341   :  { %v10859_v43 = vpop.f32.mrf.mxu1 }
 0x343   :  { %v10861_v25 = vpop.f32.mrf.mxu1 }
 0x345   :  { %v10863_v37 = vpop.f32.mrf.mxu1 }
 0x347   :  { %v10865_v20 = vpop.f32.mrf.mxu1 }
 0x349   :  { %v10867_v22 = vpop.f32.mrf.mxu1 }
 0x34b   :  { %v10869_v18 = vpop.f32.mrf.mxu1 }
 0x34d   :  { %v10871_v7 = vpop.f32.mrf.mxu1 }
 0x34f   :  { %v10873_v19 = vpop.f32.mrf.mxu1 }
 0x351   :  { %v10875_v58 = vpop.f32.mrf.mxu1 }
 0x353   :  { %v10877_v16 = vpop.f32.mrf.mxu1 }
 0x355   :  { %v10879_v2 = vpop.f32.mrf.mxu1 }
 0x357   :  { %v10881_v31 = vpop.f32.mrf.mxu1 }
 0x359   :  { %v10883_v9 = vpop.f32.mrf.mxu1 }
 0x35b   :  { %v10885_v51 = vpop.f32.mrf.mxu1 }
 0x35d   :  { %v10887_v3 = vpop.f32.mrf.mxu1 }
 0x35f   :  { %v10889_v28 = vpop.f32.mrf.mxu1 }
 0x361   :  { %v10892_v47 = vpop.f32.mrf.mxu1 }
 0x363   :  { %v10900_v27 = vpop.f32.mrf.mxu1 }
 0x365   :  { %v10906_v50 = vpop.f32.mrf.mxu1 }
 0x367   :  { %v8737_v14 = vpop.f32.mrf.mxu0 }
 0x368   :  { %v3331_v48 = vadd.f32 %v8809_v29, %v8737_v14 }
 0x369   :  { %v2913_v35 = vpop.f32.mrf.mxu0 }
 0x36a   :  { %v3323_v29 = vadd.f32 %v10833_v49, %v2913_v35 }
 0x36b   :  { %v8738_v39 = vpop.f32.mrf.mxu0 }
 0x36c   :  { %v3334_v10 = vadd.f32 %v8810_v24, %v8738_v39  ;;  %v3583_v24 = vadd.f32 %v10897_v59, %v3331_v48  ;;  %v3581_v49 = vadd.f32 %v10897_v59, %v3323_v29 }
 0x36d   :  { %v2916_v34 = vpop.f32.mrf.mxu0 }
 0x36e   :  { %v3584_v61 = vadd.f32 %v10897_v59, %v3334_v10  ;;  %v3326_v23 = vadd.f32 %v3325_v36, %v2916_v34  ;;  %v10916_v34 = vpop.f32.mrf.mxu1 }
 0x36f   :  { %v8741_v56 = vpop.f32.mrf.mxu0 }
 0x370   :  { %v3347_v41 = vadd.f32 %v8813_v54, %v8741_v56  ;;  %v3648_v39 = vmax.f32 %v3584_v61, 0.0  ;;  %v3582_v45 = vadd.f32 %v10897_v59, %v3326_v23  ;;  %v10924_v10 = vpop.f32.mrf.mxu1 }
 0x371   :  { %v2929_v57 = vpop.f32.mrf.mxu0 }
 0x372   :  { %v3339_v52 = vadd.f32 %v3338_v21, %v2929_v57  ;;  %v3587_v26 = vadd.f32 %v10897_v59, %v3347_v41  ;;  %v3647_v41 = vmax.f32 %v3583_v24, 0.0  ;;  %v3646_v57 = vmax.f32 %v3582_v45, 0.0 }
 0x373   :  { %v8742_v0 = vpop.f32.mrf.mxu0 }
 0x374   :  { %v3350_v4 = vadd.f32 %v8814_v53, %v8742_v0  ;;  %v3585_v13 = vadd.f32 %v10897_v59, %v3339_v52  ;;  %v3651_v1 = vmax.f32 %v3587_v26, 0.0  ;;  %v10922_v52 = vpack.c.bf16 %v3648_v39, %v3647_v41 }
 0x375   :  { %v2932_v40 = vpop.f32.mrf.mxu0  ;;  %v3645_v26 = vmax.f32 %v3581_v49, 0.0 }
 0x376   :  { %v3588_v11 = vadd.f32 %v10897_v59, %v3350_v4  ;;  %v3342_v17 = vadd.f32 %v3341_v44, %v2932_v40  ;;  %v3649_v21 = vmax.f32 %v3585_v13, 0.0 }
 0x377   :  { %v8745_v55 = vpop.f32.mrf.mxu0 }
 0x378   :  { %v3652_v32 = vmax.f32 %v3588_v11, 0.0  ;;  %v3586_v30 = vadd.f32 %v10897_v59, %v3342_v17  ;;  %v10934_v17 = vpop.f32.mrf.mxu1  ;;  %v3363_v61 = vadd.f32 %v10839_v62, %v8745_v55 }
 0x379   :  { %v2945_v54 = vpop.f32.mrf.mxu0 }
 0x37a   :  { %v3650_v53 = vmax.f32 %v3586_v30, 0.0  ;;  %v10910_v14 = vpack.c.bf16 %v3652_v32, %v3651_v1  ;;  %v10945_v55 = vpop.f32.mrf.mxu1 }
 0x37b   :  { %v8746_v44 = vpop.f32.mrf.mxu0 }
 0x37c   :  { %8871 = vmatprep.subr.bf16.mxu0 %v10910_v14  ;;  %v10914_v36 = vpack.c.bf16 %v3650_v53, %v3649_v21  ;;  %v3366_v48 = vadd.f32 %v10843_v15, %v8746_v44  ;;  %v3591_v21 = vadd.f32 %v10897_v59, %v3363_v61 }
 0x37d   :  { %v2948_v56 = vpop.f32.mrf.mxu0  ;;  %8872 = vmatpush3.bf16.msra.mxu0 %v10910_v14 }
 0x37e   :  { %8873 = vmatprep.subr.bf16.mxu0 %v10914_v36  ;;  %v3592_v32 = vadd.f32 %v10897_v59, %v3366_v48  ;;  %v3358_v30 = vadd.f32 %v10845_v63, %v2948_v56  ;;  %v9608_v56 = vld [vmem:[%s12383_s0 + $0x8] sm:$0xff]  }
 0x37f   :  { %v8749_v35 = vpop.f32.mrf.mxu0 }
 0x380   :  { %v3379_v5 = vadd.f32 %v10847_v38, %v8749_v35  ;;  %v10932_v38 = vpack.c.bf16 %v3646_v57, %v3645_v26  ;;  %v3656_v49 = vmax.f32 %v3592_v32, 0.0  ;;  %v3590_v63 = vadd.f32 %v10897_v59, %v3358_v30  ;;  %v10960_v57 = vpop.f32.mrf.mxu1 }
 0x381   :  { %v2961_v0 = vpop.f32.mrf.mxu0  ;;  %8874 = vmatpush3.bf16.msra.mxu0 %v10914_v36 }
 0x382   :  { %v3371_v4 = vadd.f32 %v10849_v12, %v2961_v0  ;;  %8875 = vmatprep.subr.bf16.mxu0 %v10922_v52  ;;  %v3595_v13 = vadd.f32 %v10897_v59, %v3379_v5  ;;  %v3655_v5 = vmax.f32 %v3591_v21, 0.0 }
 0x383   :  { %v8750_v40 = vpop.f32.mrf.mxu0 }
 0x384   :  { %v3382_v11 = vadd.f32 %v10851_v60, %v8750_v40  ;;  %v3593_v12 = vadd.f32 %v10897_v59, %v3371_v4  ;;  %v3659_v24 = vmax.f32 %v3595_v13, 0.0  ;;  %v3654_v4 = vmax.f32 %v3590_v63, 0.0  ;;  %v10972_v13 = vpop.f32.mrf.mxu1 }
 0x385   :  { %v2964_v23 = vpop.f32.mrf.mxu0  ;;  %8876 = vmatpush3.bf16.msra.mxu0 %v10922_v52  ;;  %v10970_v40 = vpack.c.bf16 %v3656_v49, %v3655_v5 }
 0x386   :  { %v3596_v1 = vadd.f32 %v10897_v59, %v3382_v11  ;;  %v3374_v15 = vadd.f32 %v10853_v42, %v2964_v23  ;;  %8877 = vmatprep.subr.bf16.mxu0 %v10932_v38  ;;  %v3355_v42 = vadd.f32 %v10841_v8, %v2945_v54  ;;  %v3657_v44 = vmax.f32 %v3593_v12, 0.0  ;;  %v9609_v54 = vld [vmem:[%s12383_s0 + $0x10] sm:$0xff]  }
 0x387   :  { %v8753_v60 = vpop.f32.mrf.mxu0 }
 0x388   :  { %v3660_v29 = vmax.f32 %v3596_v1, 0.0  ;;  %v3594_v62 = vadd.f32 %v10897_v59, %v3374_v15  ;;  %v3589_v0 = vadd.f32 %v10897_v59, %v3355_v42 }
 0x389   :  { %v2977_v53 = vpop.f32.mrf.mxu0  ;;  %8878 = vmatpush3.bf16.msra.mxu0 %v10932_v38 }
 0x38a   :  { %v3658_v39 = vmax.f32 %v3594_v62, 0.0  ;;  %v10950_v45 = vpack.c.bf16 %v3660_v29, %v3659_v24  ;;  %v3653_v61 = vmax.f32 %v3589_v0, 0.0  ;;  %v10986_v24 = vpop.f32.mrf.mxu1 }
 0x38b   :  { %v8754_v41 = vpop.f32.mrf.mxu0 }
 0x38c   :  { %8880 = vmatmul.mubr.msk.bf16.vlgmr.msra.gmra.mxu0 %vm170_vm0, %v9608_v56  ;;  %8887 = vmatprep.subr.bf16.mxu1 %v10950_v45  ;;  %v10958_v35 = vpack.c.bf16 %v3658_v39, %v3657_v44  ;;  %v3398_v12 = vadd.f32 %v10859_v43, %v8754_v41  ;;  %v10984_v30 = vpack.c.bf16 %v3654_v4, %v3653_v61  ;;  %v9611_v43 = vld [vmem:[%s12383_s0 + $0x40] sm:$0xff]   ;;  %v11001_v49 = vpop.f32.mrf.mxu1 }
 0x38d   :  { %v2980_v8 = vpop.f32.mrf.mxu0  ;;  %8888 = vmatpush3.bf16.msra.mxu1 %v10950_v45  ;;  %8883 = vmatprep.mubr.msk.bf16.mxu0 %vm170_vm0, %v9609_v54 }
 0x38e   :  { %8889 = vmatprep.subr.bf16.mxu1 %v10958_v35  ;;  %v3600_v42 = vadd.f32 %v10897_v59, %v3398_v12 }
 0x38f   :  { %v8757_v26 = vpop.f32.mrf.mxu0 }
 0x390   :  { %v3411_v48 = vadd.f32 %v10863_v37, %v8757_v26  ;;  %v9610_v37 = vld [vmem:[%s12383_s0 + $0x18] sm:$0xff]   ;;  %v3664_v4 = vmax.f32 %v3600_v42, 0.0 }
 0x391   :  { %v2993_v11 = vpop.f32.mrf.mxu0  ;;  %8890 = vmatpush3.bf16.msra.mxu1 %v10958_v35 }
 0x392   :  { %v3403_v23 = vadd.f32 %v10865_v20, %v2993_v11  ;;  %8891 = vmatprep.subr.bf16.mxu1 %v10970_v40  ;;  %v3603_v15 = vadd.f32 %v10897_v59, %v3411_v48  ;;  %v3395_v20 = vadd.f32 %v10855_v33, %v8753_v60  ;;  %v3390_v60 = vadd.f32 %v10861_v25, %v2980_v8  ;;  %v9612_v8 = vld [vmem:[%s12383_s0 + $0x28] sm:$0xff]   ;;  %v11016_v11 = vpop.f32.mrf.mxu1 }
 0x393   :  { %v8758_v1 = vpop.f32.mrf.mxu0 }
 0x394   :  { %v3414_v32 = vadd.f32 %v10867_v22, %v8758_v1  ;;  %8884 = vmatmul.mubr.msk.bf16.gmra.mxu0 %vm170_vm0, %v9610_v37  ;;  %v3601_v22 = vadd.f32 %v10897_v59, %v3403_v23  ;;  %v3667_v44 = vmax.f32 %v3603_v15, 0.0  ;;  %v3599_v63 = vadd.f32 %v10897_v59, %v3395_v20  ;;  %v11028_v37 = vpop.f32.mrf.mxu1 }
 0x395   :  { %v2996_v29 = vpop.f32.mrf.mxu0  ;;  %8892 = vmatpush3.bf16.msra.mxu1 %v10970_v40  ;;  %8911 = vmatprep.mubr.msk.bf16.mxu0 %vm170_vm0, %v9611_v43  ;;  %v3598_v25 = vadd.f32 %v10897_v59, %v3390_v60 }
 0x396   :  { %v3604_v62 = vadd.f32 %v10897_v59, %v3414_v32  ;;  %v3406_v21 = vadd.f32 %v10869_v18, %v2996_v29  ;;  %8893 = vmatprep.subr.bf16.mxu1 %v10984_v30  ;;  %v3387_v18 = vadd.f32 %v10857_v46, %v2977_v53  ;;  %v3665_v54 = vmax.f32 %v3601_v22, 0.0  ;;  %v9613_v53 = vld [vmem:[%s12383_s0 + $0x30] sm:$0xff]  }
 0x397   :  { %v8761_v33 = vpop.f32.mrf.mxu0  ;;  %v3663_v61 = vmax.f32 %v3599_v63, 0.0  ;;  %v3662_v1 = vmax.f32 %v3598_v25, 0.0 }
 0x398   :  { %v3668_v39 = vmax.f32 %v3604_v62, 0.0  ;;  %v3602_v41 = vadd.f32 %v10897_v59, %v3406_v21  ;;  %v3597_v23 = vadd.f32 %v10897_v59, %v3387_v18 }
 0x399   :  { %v3009_v56 = vpop.f32.mrf.mxu0  ;;  %8894 = vmatpush3.bf16.msra.mxu1 %v10984_v30  ;;  %v11026_v32 = vpack.c.bf16 %v3664_v4, %v3663_v61 }
 0x39a   :  { %v3666_v5 = vmax.f32 %v3602_v41, 0.0  ;;  %v11006_v0 = vpack.c.bf16 %v3668_v39, %v3667_v44  ;;  %v3661_v29 = vmax.f32 %v3597_v23, 0.0  ;;  %v11042_v44 = vpop.f32.mrf.mxu1 }
 0x39b   :  { %v8762_v26 = vpop.f32.mrf.mxu0 }
 0x39c   :  { %8896 = vmatmul.mubr.msk.bf16.vlgmr.msra.gmra.mxu1 %vm170_vm0, %v9612_v8  ;;  %8903 = vmatprep.subr.bf16.mxu0 %v11006_v0  ;;  %v11014_v48 = vpack.c.bf16 %v3666_v5, %v3665_v54  ;;  %v3430_v22 = vadd.f32 %v10875_v58, %v8762_v26  ;;  %v11040_v60 = vpack.c.bf16 %v3662_v1, %v3661_v29  ;;  %v9615_v58 = vld [vmem:[%s12383_s0 + $0x60] sm:$0xff]   ;;  %v11057_v4 = vpop.f32.mrf.mxu1 }
 0x39d   :  { %v3012_v46 = vpop.f32.mrf.mxu0  ;;  %8904 = vmatpush3.bf16.msra.mxu0 %v11006_v0  ;;  %8899 = vmatprep.mubr.msk.bf16.mxu1 %vm170_vm0, %v9613_v53 }
 0x39e   :  { %8905 = vmatprep.subr.bf16.mxu0 %v11014_v48  ;;  %v3608_v18 = vadd.f32 %v10897_v59, %v3430_v22 }
 0x39f   :  { %v8765_v12 = vpop.f32.mrf.mxu0 }
 0x3a0   :  { %v3443_v15 = vadd.f32 %v10879_v2, %v8765_v12  ;;  %v9614_v2 = vld [vmem:[%s12383_s0 + $0x38] sm:$0xff]   ;;  %v3672_v1 = vmax.f32 %v3608_v18, 0.0 }
 0x3a1   :  { %v3025_v20 = vpop.f32.mrf.mxu0  ;;  %8906 = vmatpush3.bf16.msra.mxu0 %v11014_v48 }
 0x3a2   :  { %v3435_v43 = vadd.f32 %v10881_v31, %v3025_v20  ;;  %8907 = vmatprep.subr.bf16.mxu0 %v11026_v32  ;;  %v3611_v21 = vadd.f32 %v10897_v59, %v3443_v15  ;;  %v3427_v31 = vadd.f32 %v10871_v7, %v8761_v33  ;;  %v3422_v33 = vadd.f32 %v10877_v16, %v3012_v46  ;;  %v9616_v46 = vld [vmem:[%s12383_s0 + $0x48] sm:$0xff]   ;;  %v11072_v20 = vpop.f32.mrf.mxu1 }
 0x3a3   :  { %v8766_v62 = vpop.f32.mrf.mxu0 }
 0x3a4   :  { %v3446_v42 = vadd.f32 %v10883_v9, %v8766_v62  ;;  %8900 = vmatmul.mubr.msk.bf16.gmra.mxu1 %vm170_vm0, %v9614_v2  ;;  %v3609_v9 = vadd.f32 %v10897_v59, %v3435_v43  ;;  %v3675_v54 = vmax.f32 %v3611_v21, 0.0  ;;  %v3607_v25 = vadd.f32 %v10897_v59, %v3427_v31  ;;  %v11084_v2 = vpop.f32.mrf.mxu1 }
 0x3a5   :  { %v3028_v39 = vpop.f32.mrf.mxu0  ;;  %8908 = vmatpush3.bf16.msra.mxu0 %v11026_v32  ;;  %8927 = vmatprep.mubr.msk.bf16.mxu1 %vm170_vm0, %v9615_v58  ;;  %v3606_v16 = vadd.f32 %v10897_v59, %v3422_v33 }
 0x3a6   :  { %v3612_v41 = vadd.f32 %v10897_v59, %v3446_v42  ;;  %v3438_v63 = vadd.f32 %v10885_v51, %v3028_v39  ;;  %8909 = vmatprep.subr.bf16.mxu0 %v11040_v60  ;;  %v3419_v51 = vadd.f32 %v10873_v19, %v3009_v56  ;;  %v3673_v53 = vmax.f32 %v3609_v9, 0.0  ;;  %v9617_v56 = vld [vmem:[%s12383_s0 + $0x50] sm:$0xff]  }
 0x3a7   :  { %v8769_v7 = vpop.f32.mrf.mxu0  ;;  %v3671_v29 = vmax.f32 %v3607_v25, 0.0  ;;  %v3670_v62 = vmax.f32 %v3606_v16, 0.0 }
 0x3a8   :  { %v3676_v5 = vmax.f32 %v3612_v41, 0.0  ;;  %v3610_v26 = vadd.f32 %v10897_v59, %v3438_v63  ;;  %v3605_v43 = vadd.f32 %v10897_v59, %v3419_v51 }
 0x3a9   :  { %v3041_v8 = vpop.f32.mrf.mxu0  ;;  %8910 = vmatpush3.bf16.msra.mxu0 %v11040_v60  ;;  %v11082_v42 = vpack.c.bf16 %v3672_v1, %v3671_v29 }
 0x3aa   :  { %v3674_v61 = vmax.f32 %v3610_v26, 0.0  ;;  %v11062_v23 = vpack.c.bf16 %v3676_v5, %v3675_v54  ;;  %v3669_v39 = vmax.f32 %v3605_v43, 0.0  ;;  %v11098_v54 = vpop.f32.mrf.mxu1 }
 0x3ab   :  { %v8770_v12 = vpop.f32.mrf.mxu0 }
 0x3ac   :  { %8912 = vmatmul.mubr.msk.bf16.vlgmr.msra.gmra.mxu0 %vm170_vm0, %v9616_v46  ;;  %8919 = vmatprep.subr.bf16.mxu1 %v11062_v23  ;;  %v11070_v15 = vpack.c.bf16 %v3674_v61, %v3673_v53  ;;  %v3462_v9 = vadd.f32 %v10892_v47, %v8770_v12  ;;  %v11096_v33 = vpack.c.bf16 %v3670_v62, %v3669_v39  ;;  %v9619_v47 = vld [vmem:[%s12383_s0 + $0x80] sm:$0xff]   ;;  %v11113_v1 = vpop.f32.mrf.mxu1 }
 0x3ad   :  { %v3044_v19 = vpop.f32.mrf.mxu0  ;;  %8920 = vmatpush3.bf16.msra.mxu1 %v11062_v23  ;;  %8915 = vmatprep.mubr.msk.bf16.mxu0 %vm170_vm0, %v9617_v56 }
 0x3ae   :  { %8921 = vmatprep.subr.bf16.mxu1 %v11070_v15  ;;  %v3616_v51 = vadd.f32 %v10897_v59, %v3462_v9 }
 0x3af   :  { %v8773_v22 = vpop.f32.mrf.mxu0 }
 0x3b0   :  { %v3475_v21 = vadd.f32 %v10906_v50, %v8773_v22  ;;  %v9618_v50 = vld [vmem:[%s12383_s0 + $0x58] sm:$0xff]   ;;  %v3680_v62 = vmax.f32 %v3616_v51, 0.0 }
 0x3b1   :  { %v3057_v31 = vpop.f32.mrf.mxu0  ;;  %8922 = vmatpush3.bf16.msra.mxu1 %v11070_v15 }
 0x3b2   :  { %v3467_v58 = vadd.f32 %v10916_v34, %v3057_v31  ;;  %8923 = vmatprep.subr.bf16.mxu1 %v11082_v42  ;;  %v3619_v63 = vadd.f32 %v10897_v59, %v3475_v21  ;;  %v3459_v34 = vadd.f32 %v10887_v3, %v8769_v7  ;;  %v3454_v7 = vadd.f32 %v10900_v27, %v3044_v19  ;;  %v9620_v19 = vld [vmem:[%s12383_s0 + $0x68] sm:$0xff]   ;;  %v11128_v31 = vpop.f32.mrf.mxu1 }
 0x3b3   :  { %v8774_v41 = vpop.f32.mrf.mxu0 }
 0x3b4   :  { %v3478_v18 = vadd.f32 %v10924_v10, %v8774_v41  ;;  %8916 = vmatmul.mubr.msk.bf16.gmra.mxu0 %vm170_vm0, %v9618_v50  ;;  %v3617_v10 = vadd.f32 %v10897_v59, %v3467_v58  ;;  %v3683_v53 = vmax.f32 %v3619_v63, 0.0  ;;  %v3615_v16 = vadd.f32 %v10897_v59, %v3459_v34  ;;  %v11140_v50 = vpop.f32.mrf.mxu1 }
 0x3b5   :  { %v3060_v5 = vpop.f32.mrf.mxu0  ;;  %8924 = vmatpush3.bf16.msra.mxu1 %v11082_v42  ;;  %8943 = vmatprep.mubr.msk.bf16.mxu0 %vm170_vm0, %v9619_v47  ;;  %v3614_v27 = vadd.f32 %v10897_v59, %v3454_v7 }
 0x3b6   :  { %v3620_v26 = vadd.f32 %v10897_v59, %v3478_v18  ;;  %v3470_v25 = vadd.f32 %v10934_v17, %v3060_v5  ;;  %8925 = vmatprep.subr.bf16.mxu1 %v11096_v33  ;;  %v3451_v17 = vadd.f32 %v10889_v28, %v3041_v8  ;;  %v3681_v56 = vmax.f32 %v3617_v10, 0.0  ;;  %v9621_v8 = vld [vmem:[%s12383_s0 + $0x70] sm:$0xff]  }
 0x3b7   :  { %v8777_v3 = vpop.f32.mrf.mxu0  ;;  %v3679_v39 = vmax.f32 %v3615_v16, 0.0  ;;  %v3678_v41 = vmax.f32 %v3614_v27, 0.0 }
 0x3b8   :  { %v3684_v61 = vmax.f32 %v3620_v26, 0.0  ;;  %v3618_v12 = vadd.f32 %v10897_v59, %v3470_v25  ;;  %v3613_v58 = vadd.f32 %v10897_v59, %v3451_v17 }
 0x3b9   :  { %v3073_v46 = vpop.f32.mrf.mxu0  ;;  %8926 = vmatpush3.bf16.msra.mxu1 %v11096_v33  ;;  %v11138_v18 = vpack.c.bf16 %v3680_v62, %v3679_v39 }
 0x3ba   :  { %v3682_v29 = vmax.f32 %v3618_v12, 0.0  ;;  %v11118_v43 = vpack.c.bf16 %v3684_v61, %v3683_v53  ;;  %v3677_v5 = vmax.f32 %v3613_v58, 0.0  ;;  %v11154_v53 = vpop.f32.mrf.mxu1 }
 0x3bb   :  { %v8778_v22 = vpop.f32.mrf.mxu0 }
 0x3bc   :  { %8928 = vmatmul.mubr.msk.bf16.vlgmr.msra.gmra.mxu1 %vm170_vm0, %v9620_v19  ;;  %8935 = vmatprep.subr.bf16.mxu0 %v11118_v43  ;;  %v11126_v21 = vpack.c.bf16 %v3682_v29, %v3681_v56  ;;  %v3494_v10 = vadd.f32 %v10972_v13, %v8778_v22  ;;  %v11152_v7 = vpack.c.bf16 %v3678_v41, %v3677_v5  ;;  %v9623_v13 = vld [vmem:[%s12383_s0 + $0xa0] sm:$0xff]   ;;  %v11169_v62 = vpop.f32.mrf.mxu1 }
 0x3bd   :  { %v3076_v28 = vpop.f32.mrf.mxu0  ;;  %8936 = vmatpush3.bf16.msra.mxu0 %v11118_v43  ;;  %8931 = vmatprep.mubr.msk.bf16.mxu1 %vm170_vm0, %v9621_v8 }
 0x3be   :  { %8937 = vmatprep.subr.bf16.mxu0 %v11126_v21  ;;  %v3624_v17 = vadd.f32 %v10897_v59, %v3494_v10 }
 0x3bf   :  { %v8781_v9 = vpop.f32.mrf.mxu0 }
 0x3c0   :  { %v3507_v63 = vadd.f32 %v11001_v49, %v8781_v9  ;;  %v9622_v49 = vld [vmem:[%s12383_s0 + $0x78] sm:$0xff]   ;;  %v3688_v41 = vmax.f32 %v3624_v17, 0.0 }
 0x3c1   :  { %v3089_v34 = vpop.f32.mrf.mxu0  ;;  %8938 = vmatpush3.bf16.msra.mxu0 %v11126_v21 }
 0x3c2   :  { %v3499_v47 = vadd.f32 %v11016_v11, %v3089_v34  ;;  %8939 = vmatprep.subr.bf16.mxu0 %v11138_v18  ;;  %v3627_v25 = vadd.f32 %v10897_v59, %v3507_v63  ;;  %v3491_v11 = vadd.f32 %v10945_v55, %v8777_v3  ;;  %v3486_v3 = vadd.f32 %v10986_v24, %v3076_v28  ;;  %v9624_v28 = vld [vmem:[%s12383_s0 + $0x88] sm:$0xff]   ;;  %v11184_v34 = vpop.f32.mrf.mxu1 }
 0x3c3   :  { %v8782_v26 = vpop.f32.mrf.mxu0 }
 0x3c4   :  { %v3510_v51 = vadd.f32 %v11028_v37, %v8782_v26  ;;  %8932 = vmatmul.mubr.msk.bf16.gmra.mxu1 %vm170_vm0, %v9622_v49  ;;  %v3625_v37 = vadd.f32 %v10897_v59, %v3499_v47  ;;  %v3691_v56 = vmax.f32 %v3627_v25, 0.0  ;;  %v3623_v27 = vadd.f32 %v10897_v59, %v3491_v11  ;;  %v8866_v49 = vpop.f32.mrf.mxu1 }
 0x3c5   :  { %v3092_v61 = vpop.f32.mrf.mxu0  ;;  %8940 = vmatpush3.bf16.msra.mxu0 %v11138_v18  ;;  %8959 = vmatprep.mubr.msk.bf16.mxu1 %vm170_vm0, %v9623_v13  ;;  %v3622_v24 = vadd.f32 %v10897_v59, %v3486_v3 }
 0x3c6   :  { %v3628_v12 = vadd.f32 %v10897_v59, %v3510_v51  ;;  %v3502_v16 = vadd.f32 %v11042_v44, %v3092_v61  ;;  %8941 = vmatprep.subr.bf16.mxu0 %v11152_v7  ;;  %v3483_v44 = vadd.f32 %v10960_v57, %v3073_v46  ;;  %v3689_v8 = vmax.f32 %v3625_v37, 0.0  ;;  %v9625_v46 = vld [vmem:[%s12383_s0 + $0x90] sm:$0xff]  }
 0x3c7   :  { %v8785_v55 = vpop.f32.mrf.mxu0  ;;  %v3687_v5 = vmax.f32 %v3623_v27, 0.0  ;;  %v3686_v26 = vmax.f32 %v3622_v24, 0.0 }
 0x3c8   :  { %v3692_v29 = vmax.f32 %v3628_v12, 0.0  ;;  %v3626_v22 = vadd.f32 %v10897_v59, %v3502_v16  ;;  %v3621_v47 = vadd.f32 %v10897_v59, %v3483_v44 }
 0x3c9   :  { %v3105_v19 = vpop.f32.mrf.mxu0  ;;  %8942 = vmatpush3.bf16.msra.mxu0 %v11152_v7  ;;  %v11194_v51 = vpack.c.bf16 %v3688_v41, %v3687_v5 }
 0x3ca   :  { %v3690_v39 = vmax.f32 %v3626_v22, 0.0  ;;  %v11174_v58 = vpack.c.bf16 %v3692_v29, %v3691_v56  ;;  %v3685_v61 = vmax.f32 %v3621_v47, 0.0  ;;  %v11208_v56 = vpop.f32.mrf.mxu1 }
 0x3cb   :  { %v8786_v9 = vpop.f32.mrf.mxu0 }
 0x3cc   :  { %8944 = vmatmul.mubr.msk.bf16.vlgmr.msra.gmra.mxu0 %vm170_vm0, %v9624_v28  ;;  %8951 = vmatprep.subr.bf16.mxu1 %v11174_v58  ;;  %v11182_v63 = vpack.c.bf16 %v3690_v39, %v3689_v8  ;;  %v3526_v37 = vadd.f32 %v11084_v2, %v8786_v9  ;;  %v11206_v3 = vpack.c.bf16 %v3686_v26, %v3685_v61  ;;  %v9627_v2 = vld [vmem:[%s12383_s0 + $0xc0] sm:$0xff]   ;;  %v8869_v41 = vpop.f32.mrf.mxu1 }
 0x3cd   :  { %v3108_v57 = vpop.f32.mrf.mxu0  ;;  %8952 = vmatpush3.bf16.msra.mxu1 %v11174_v58  ;;  %8947 = vmatprep.mubr.msk.bf16.mxu0 %vm170_vm0, %v9625_v46  ;;  %v3515_v46 = vadd.f32 %v11072_v20, %v3105_v19  ;;  %v9629_v19 = vld [vmem:[%s12383_s0 + $0xb0] sm:$0xff]  }
 0x3ce   :  { %8953 = vmatprep.subr.bf16.mxu1 %v11182_v63  ;;  %v3632_v44 = vadd.f32 %v10897_v59, %v3526_v37 }
 0x3cf   :  { %v8789_v10 = vpop.f32.mrf.mxu0 }
 0x3d0   :  { %v3539_v25 = vadd.f32 %v11113_v1, %v8789_v10  ;;  %v9626_v1 = vld [vmem:[%s12383_s0 + $0x98] sm:$0xff]   ;;  %v3696_v26 = vmax.f32 %v3632_v44, 0.0 }
 0x3d1   :  { %v3121_v11 = vpop.f32.mrf.mxu0  ;;  %8954 = vmatpush3.bf16.msra.mxu1 %v11182_v63 }
 0x3d2   :  { %v3531_v13 = vadd.f32 %v11128_v31, %v3121_v11  ;;  %8955 = vmatprep.subr.bf16.mxu1 %v11194_v51  ;;  %v3635_v16 = vadd.f32 %v10897_v59, %v3539_v25  ;;  %v3523_v31 = vadd.f32 %v11057_v4, %v8785_v55  ;;  %v3518_v55 = vadd.f32 %v11098_v54, %v3108_v57  ;;  %v9628_v57 = vld [vmem:[%s12383_s0 + $0xa8] sm:$0xff]   ;;  %v3562_v11 = vpop.f32.mrf.mxu1 }
 0x3d3   :  { %v8790_v12 = vpop.f32.mrf.mxu0 }
 0x3d4   :  { %v3542_v17 = vadd.f32 %v11140_v50, %v8790_v12  ;;  %8948 = vmatmul.mubr.msk.bf16.gmra.mxu0 %vm170_vm0, %v9626_v1  ;;  %v3633_v50 = vadd.f32 %v10897_v59, %v3531_v13  ;;  %v3699_v8 = vmax.f32 %v3635_v16, 0.0  ;;  %v3631_v24 = vadd.f32 %v10897_v59, %v3523_v31  ;;  %v8870_v1 = vpop.f32.mrf.mxu1 }
 0x3d5   :  { %v3124_v29 = vpop.f32.mrf.mxu0  ;;  %8956 = vmatpush3.bf16.msra.mxu1 %v11194_v51  ;;  %8975 = vmatprep.mubr.msk.bf16.mxu0 %vm170_vm0, %v9627_v2  ;;  %v3630_v54 = vadd.f32 %v10897_v59, %v3518_v55  ;;  %v3629_v13 = vadd.f32 %v10897_v59, %v3515_v46  ;;  %v9630_v55 = vld [vmem:[%s12383_s0 + $0xb8] sm:$0xff]  }
 0x3d6   :  { %v3636_v22 = vadd.f32 %v10897_v59, %v3542_v17  ;;  %v3534_v27 = vadd.f32 %v11154_v53, %v3124_v29  ;;  %8957 = vmatprep.subr.bf16.mxu1 %v11206_v3  ;;  %v3697_v53 = vmax.f32 %v3633_v50, 0.0  ;;  %v3695_v61 = vmax.f32 %v3631_v24, 0.0 }
 0x3d7   :  { %v8793_v4 = vpop.f32.mrf.mxu0  ;;  %v3694_v12 = vmax.f32 %v3630_v54, 0.0  ;;  %v3693_v29 = vmax.f32 %v3629_v13, 0.0 }
 0x3d8   :  { %v3700_v39 = vmax.f32 %v3636_v22, 0.0  ;;  %v3634_v9 = vadd.f32 %v10897_v59, %v3534_v27  ;;  %v11243_v17 = vpack.c.bf16 %v3696_v26, %v3695_v61 }
 0x3d9   :  { %v3137_v28 = vpop.f32.mrf.mxu0  ;;  %8958 = vmatpush3.bf16.msra.mxu1 %v11206_v3 }
 0x3da   :  { %v3698_v5 = vmax.f32 %v3634_v9, 0.0  ;;  %v11226_v47 = vpack.c.bf16 %v3700_v39, %v3699_v8  ;;  %v11252_v8 = vpack.c.bf16 %v3694_v12, %v3693_v29  ;;  %v3565_v39 = vpop.f32.mrf.mxu1  ;;  %v3555_v9 = vadd.f32 %v11169_v62, %v8793_v4 }
 0x3db   :  { %v8794_v10 = vpop.f32.mrf.mxu0 }
 0x3dc   :  { %8960 = vmatmul.mubr.msk.bf16.vlgmr.msra.gmra.mxu1 %vm170_vm0, %v9628_v57  ;;  %8967 = vmatprep.subr.bf16.mxu0 %v11226_v47  ;;  %v11234_v25 = vpack.c.bf16 %v3698_v5, %v3697_v53  ;;  %v3558_v50 = vadd.f32 %v8866_v49, %v8794_v10  ;;  %v9631_v49 = vld [vmem:[%s12383_s0 + $0xe0] sm:$0xff]   ;;  %v9562_v5 = vld [vmem:[#allocation2 + $0xb8] sm:$0xff]   ;;  %v3639_v57 = vadd.f32 %v10897_v59, %v3555_v9  ;;  %v9636_v9 = vld [vmem:[%s12383_s0 + $0xf0] sm:$0xff]  }
 0x3dd   :  { %v3140_v20 = vpop.f32.mrf.mxu0  ;;  %8968 = vmatpush3.bf16.msra.mxu0 %v11226_v47  ;;  %8963 = vmatprep.mubr.msk.bf16.mxu1 %vm170_vm0, %v9629_v19 }
 0x3de   :  { %8969 = vmatprep.subr.bf16.mxu0 %v11234_v25  ;;  %v3640_v10 = vadd.f32 %v10897_v59, %v3558_v50  ;;  %v3550_v62 = vadd.f32 %v11208_v56, %v3140_v20  ;;  %v9632_v56 = vld [vmem:[%s12383_s0 + $0xc8] sm:$0xff]  }
 0x3df   :  { %v8797_v37 = vpop.f32.mrf.mxu0 }
 0x3e0   :  { %v3571_v16 = vadd.f32 %v8869_v41, %v8797_v37  ;;  %v9563_v37 = vld [vmem:[#allocation2 + $0xb0] sm:$0xff]   ;;  %v3704_v12 = vmax.f32 %v3640_v10, 0.0 }
 0x3e1   :  { %v3153_v31 = vpop.f32.mrf.mxu0  ;;  %8970 = vmatpush3.bf16.msra.mxu0 %v11234_v25 }
 0x3e2   :  { %v3563_v2 = vadd.f32 %v3562_v11, %v3153_v31  ;;  %8971 = vmatprep.subr.bf16.mxu0 %v11243_v17  ;;  %v3643_v27 = vadd.f32 %v10897_v59, %v3571_v16  ;;  %v3547_v11 = vadd.f32 %v11184_v34, %v3137_v28  ;;  %v3638_v16 = vadd.f32 %v10897_v59, %v3550_v62  ;;  %v9633_v34 = vld [vmem:[%s12383_s0 + $0xd0] sm:$0xff]   ;;  %v9564_v31 = vld [vmem:[#allocation2 + $0xa8] sm:$0xff]  }
 0x3e3   :  { %v8798_v22 = vpop.f32.mrf.mxu0  ;;  %v3703_v28 = vmax.f32 %v3639_v57, 0.0 }
 0x3e4   :  { %v3574_v44 = vadd.f32 %v8870_v1, %v8798_v22  ;;  %8964 = vmatmul.mubr.msk.bf16.gmra.mxu1 %vm170_vm0, %v9630_v55  ;;  %v3641_v24 = vadd.f32 %v10897_v59, %v3563_v2  ;;  %v3707_v4 = vmax.f32 %v3643_v27, 0.0  ;;  %v3637_v1 = vadd.f32 %v10897_v59, %v3547_v11  ;;  %v9565_v22 = vld [vmem:[#allocation2 + $0xa0] sm:$0xff]   ;;  %v9559_v55 = vld [vmem:[#allocation2 + $0x90] sm:$0xff]  }
 0x3e5   :  { %v3156_v41 = vpop.f32.mrf.mxu0  ;;  %8972 = vmatpush3.bf16.msra.mxu0 %v11243_v17  ;;  %8991 = vmatprep.mubr.msk.bf16.mxu1 %vm170_vm0, %v9631_v49  ;;  %v3702_v29 = vmax.f32 %v3638_v16, 0.0  ;;  %v11286_v2 = vpack.c.bf16 %v3704_v12, %v3703_v28  ;;  %v9561_v49 = vld [vmem:[#allocation2 + $0x80] sm:$0xff]  }
 0x3e6   :  { %v3644_v46 = vadd.f32 %v10897_v59, %v3574_v44  ;;  %v3566_v53 = vadd.f32 %v3565_v39, %v3156_v41  ;;  %8973 = vmatprep.subr.bf16.mxu0 %v11252_v8  ;;  %v3705_v19 = vmax.f32 %v3641_v24, 0.0  ;;  %v3701_v50 = vmax.f32 %v3637_v1, 0.0  ;;  %v9558_v44 = vld [vmem:[#allocation2 + $0x98] sm:$0xff]   ;;  %v9635_v39 = vld [vmem:[%s12383_s0 + $0xe8] sm:$0xff]  }
 0x3e7   :  { %v9560_v41 = vld [vmem:[#allocation2 + $0x88] sm:$0xff]   ;;  %v9637_v24 = vld [vmem:[%s12383_s0 + $0xf8] sm:$0xff]  }
 0x3e8   :  { %v3708_v26 = vmax.f32 %v3644_v46, 0.0  ;;  %v3642_v54 = vadd.f32 %v10897_v59, %v3566_v53  ;;  %v9634_v59 = vld [vmem:[%s12383_s0 + $0xd8] sm:$0xff]   ;;  %v11294_v27 = vpack.c.bf16 %v3702_v29, %v3701_v50 }
 0x3e9   :  { %8974 = vmatpush3.bf16.msra.mxu0 %v11252_v8 }
 0x3ea   :  { %v3706_v61 = vmax.f32 %v3642_v54, 0.0  ;;  %v11269_v13 = vpack.c.bf16 %v3708_v26, %v3707_v4  ;;  %8999 = vmatprep.subr.bf16.mxu0 %v9562_v5 }
 0x3ec   :  { %8976 = vmatmul.mubr.msk.bf16.vlgmr.msra.gmra.mxu0 %vm170_vm0, %v9632_v56  ;;  %8983 = vmatprep.subr.bf16.mxu1 %v11269_v13  ;;  %v11277_v20 = vpack.c.bf16 %v3706_v61, %v3705_v19  ;;  %v9638_v56 = vld [vmem:[%s12383_s0 + $0x20] sm:$0xff]  }
 0x3ed   :  { %8984 = vmatpush3.bf16.msra.mxu1 %v11269_v13  ;;  %8979 = vmatprep.mubr.msk.bf16.mxu0 %vm170_vm0, %v9633_v34 }
 0x3ee   :  { %8985 = vmatprep.subr.bf16.mxu1 %v11277_v20  ;;  %9000 = vmatpush3.bf16.msra.mxu0 %v9562_v5 }
 0x3ef   :  { %9001 = vmatprep.subr.bf16.mxu0 %v9563_v37 }
 0x3f1   :  { %8986 = vmatpush3.bf16.msra.mxu1 %v11277_v20 }
 0x3f2   :  { %8987 = vmatprep.subr.bf16.mxu1 %v11286_v2  ;;  %9002 = vmatpush3.bf16.msra.mxu0 %v9563_v37 }
 0x3f3   :  { %9003 = vmatprep.subr.bf16.mxu0 %v9564_v31 }
 0x3f4   :  { %8980 = vmatmul.mubr.msk.bf16.gmra.mxu0 %vm170_vm0, %v9634_v59 }
 0x3f5   :  { %8988 = vmatpush3.bf16.msra.mxu1 %v11286_v2 }
 0x3f6   :  { %8989 = vmatprep.subr.bf16.mxu1 %v11294_v27  ;;  %9004 = vmatpush3.bf16.msra.mxu0 %v9564_v31 }
 0x3f7   :  { %9005 = vmatprep.subr.bf16.mxu0 %v9565_v22 }
 0x3f9   :  { %8990 = vmatpush3.bf16.msra.mxu1 %v11294_v27 }
 0x3fa   :  { %9071 = vmatprep.subr.bf16.mxu1 %v9558_v44  ;;  %9006 = vmatpush3.bf16.msra.mxu0 %v9565_v22 }
 0x3fc   :  { %8992 = vmatmul.mubr.msk.bf16.vlgmr.msra.gmra.mxu1 %vm170_vm0, %v9635_v39 }
 0x3fd   :  { %9072 = vmatpush3.bf16.msra.mxu1 %v9558_v44  ;;  %8995 = vmatprep.mubr.msk.bf16.mxu1 %vm170_vm0, %v9636_v9 }
 0x3fe   :  { %9073 = vmatprep.subr.bf16.mxu1 %v9559_v55 }
 0x401   :  { %9074 = vmatpush3.bf16.msra.mxu1 %v9559_v55 }
 0x402   :  { %9075 = vmatprep.subr.bf16.mxu1 %v9560_v41 }
 0x404   :  { %8996 = vmatmul.mubr.msk.bf16.gmra.mxu1 %vm170_vm0, %v9637_v24 }
 0x405   :  { %9076 = vmatpush3.bf16.msra.mxu1 %v9560_v41  ;;  %9079 = vmatprep.mubr.msk.bf16.mxu1 %vm170_vm0, %v10932_v38 }
 0x406   :  { %9077 = vmatprep.subr.bf16.mxu1 %v9561_v49 }
 0x409   :  { %9078 = vmatpush3.bf16.msra.mxu1 %v9561_v49 }
 0x40c   :  { %9080 = vmatmul.mubr.msk.bf16.vlgmr.msra.gmra.mxu1 %vm170_vm0, %v10922_v52 }
 0x40d   :  { %9083 = vmatprep.mubr.msk.bf16.mxu1 %vm170_vm0, %v10914_v36 }
 0x414   :  { %9084 = vmatmul.mubr.msk.bf16.gmra.mxu1 %vm170_vm0, %v10910_v14 }
 0x415   :  { %9087 = vmatprep.mubr.msk.bf16.mxu1 %vm170_vm0, %v10984_v30 }
 0x41c   :  { %9088 = vmatmul.mubr.msk.bf16.gmra.mxu1 %vm170_vm0, %v10970_v40 }
 0x41d   :  { %9091 = vmatprep.mubr.msk.bf16.mxu1 %vm170_vm0, %v10958_v35 }
 0x424   :  { %9092 = vmatmul.mubr.msk.bf16.gmra.mxu1 %vm170_vm0, %v10950_v45 }
 0x425   :  { %9095 = vmatprep.mubr.msk.bf16.mxu1 %vm170_vm0, %v11040_v60 }
 0x42c   :  { %9096 = vmatmul.mubr.msk.bf16.gmra.mxu1 %vm170_vm0, %v11026_v32 }
 0x42d   :  { %9099 = vmatprep.mubr.msk.bf16.mxu1 %vm170_vm0, %v11014_v48 }
 0x434   :  { %9100 = vmatmul.mubr.msk.bf16.gmra.mxu1 %vm170_vm0, %v11006_v0 }
 0x435   :  { %9103 = vmatprep.mubr.msk.bf16.mxu1 %vm170_vm0, %v11096_v33 }
 0x43c   :  { %9104 = vmatmul.mubr.msk.bf16.gmra.mxu1 %vm170_vm0, %v11082_v42 }
 0x43d   :  { %9107 = vmatprep.mubr.msk.bf16.mxu1 %vm170_vm0, %v11070_v15 }
 0x444   :  { %9108 = vmatmul.mubr.msk.bf16.gmra.mxu1 %vm170_vm0, %v11062_v23 }
 0x445   :  { %9111 = vmatprep.mubr.msk.bf16.mxu1 %vm170_vm0, %v11152_v7 }
 0x44c   :  { %v8881_v14 = vpop.f32.mrf.mxu0  ;;  %9112 = vmatmul.mubr.msk.bf16.gmra.mxu1 %vm170_vm0, %v11138_v18 }
 0x44d   :  { %9115 = vmatprep.mubr.msk.bf16.mxu1 %vm170_vm0, %v11126_v21 }
 0x44e   :  { %v3775_v36 = vpop.f32.mrf.mxu0 }
 0x450   :  { %v8882_v52 = vpop.f32.mrf.mxu0 }
 0x451   :  { %v4262_v35 = vpack.c.bf16 %v8882_v52, %v8881_v14 }
 0x452   :  { %v3778_v38 = vpop.f32.mrf.mxu0 }
 0x453   :  { %v4261_v45 = vpack.c.bf16 %v3778_v38, %v3775_v36 }
 0x454   :  { %v8885_v40 = vpop.f32.mrf.mxu0  ;;  %9116 = vmatmul.mubr.msk.bf16.gmra.mxu1 %vm170_vm0, %v11118_v43 }
 0x455   :  { %9007 = vmatprep.mubr.msk.bf16.mxu0 %vm170_vm0, %v4261_v45  ;;  %9119 = vmatprep.mubr.msk.bf16.mxu1 %vm170_vm0, %v11206_v3 }
 0x456   :  { %v3791_v30 = vpop.f32.mrf.mxu0  ;;  %9008 = vmatmul.mubr.msk.bf16.vlgmr.msra.gmra.mxu0 %vm170_vm0, %v4262_v35 }
 0x458   :  { %v8886_v0 = vpop.f32.mrf.mxu0 }
 0x459   :  { %v4264_v60 = vpack.c.bf16 %v8886_v0, %v8885_v40 }
 0x45a   :  { %v3794_v48 = vpop.f32.mrf.mxu0 }
 0x45b   :  { %v4263_v32 = vpack.c.bf16 %v3794_v48, %v3791_v30 }
 0x45c   :  { %v8897_v23 = vpop.f32.mrf.mxu1  ;;  %9120 = vmatmul.mubr.msk.bf16.gmra.mxu1 %vm170_vm0, %v11194_v51 }
 0x45d   :  { %9011 = vmatprep.mubr.msk.bf16.mxu0 %vm170_vm0, %v4263_v32  ;;  %9123 = vmatprep.mubr.msk.bf16.mxu1 %vm170_vm0, %v11182_v63 }
 0x45e   :  { %v3840_v15 = vpop.f32.mrf.mxu1  ;;  %9012 = vmatmul.mubr.msk.bf16.gmra.mxu0 %vm170_vm0, %v4264_v60 }
 0x460   :  { %v8898_v42 = vpop.f32.mrf.mxu1 }
 0x461   :  { %v4266_v21 = vpack.c.bf16 %v8898_v42, %v8897_v23 }
 0x462   :  { %v3843_v33 = vpop.f32.mrf.mxu1 }
 0x463   :  { %v4265_v43 = vpack.c.bf16 %v3843_v33, %v3840_v15 }
 0x464   :  { %v8901_v18 = vpop.f32.mrf.mxu1  ;;  %9124 = vmatmul.mubr.msk.bf16.gmra.mxu1 %vm170_vm0, %v11174_v58 }
 0x465   :  { %9015 = vmatprep.mubr.msk.bf16.mxu0 %vm170_vm0, %v4265_v43  ;;  %9127 = vmatprep.mubr.msk.bf16.mxu1 %vm170_vm0, %v11252_v8 }
 0x466   :  { %v3856_v7 = vpop.f32.mrf.mxu1  ;;  %9016 = vmatmul.mubr.msk.bf16.gmra.mxu0 %vm170_vm0, %v4266_v21 }
 0x468   :  { %v8902_v63 = vpop.f32.mrf.mxu1 }
 0x469   :  { %v4268_v46 = vpack.c.bf16 %v8902_v63, %v8901_v18 }
 0x46a   :  { %v3859_v51 = vpop.f32.mrf.mxu1 }
 0x46b   :  { %v4267_v3 = vpack.c.bf16 %v3859_v51, %v3856_v7 }
 0x46c   :  { %v8913_v53 = vpop.f32.mrf.mxu0  ;;  %9128 = vmatmul.mubr.msk.bf16.gmra.mxu1 %vm170_vm0, %v11243_v17 }
 0x46d   :  { %9019 = vmatprep.mubr.msk.bf16.mxu0 %vm170_vm0, %v4267_v3  ;;  %9131 = vmatprep.mubr.msk.bf16.mxu1 %vm170_vm0, %v11234_v25 }
 0x46e   :  { %v3905_v58 = vpop.f32.mrf.mxu0  ;;  %9020 = vmatmul.mubr.msk.bf16.gmra.mxu0 %vm170_vm0, %v4268_v46 }
 0x470   :  { %v8914_v8 = vpop.f32.mrf.mxu0 }
 0x471   :  { %v4270_v62 = vpack.c.bf16 %v8914_v8, %v8913_v53 }
 0x472   :  { %v3908_v5 = vpop.f32.mrf.mxu0 }
 0x473   :  { %v4269_v10 = vpack.c.bf16 %v3908_v5, %v3905_v58 }
 0x474   :  { %v8917_v4 = vpop.f32.mrf.mxu0  ;;  %9132 = vmatmul.mubr.msk.bf16.gmra.mxu1 %vm170_vm0, %v11226_v47 }
 0x475   :  { %9023 = vmatprep.mubr.msk.bf16.mxu0 %vm170_vm0, %v4269_v10  ;;  %9135 = vmatprep.mubr.msk.bf16.mxu1 %vm170_vm0, %v11294_v27 }
 0x476   :  { %v3921_v17 = vpop.f32.mrf.mxu0  ;;  %9024 = vmatmul.mubr.msk.bf16.gmra.mxu0 %vm170_vm0, %v4270_v62 }
 0x478   :  { %v8918_v25 = vpop.f32.mrf.mxu0 }
 0x479   :  { %v4272_v57 = vpack.c.bf16 %v8918_v25, %v8917_v4 }
 0x47a   :  { %v3924_v26 = vpop.f32.mrf.mxu0 }
 0x47b   :  { %v4271_v54 = vpack.c.bf16 %v3924_v26, %v3921_v17 }
 0x47c   :  { %v8929_v11 = vpop.f32.mrf.mxu1  ;;  %9136 = vmatmul.mubr.msk.bf16.gmra.mxu1 %vm170_vm0, %v11286_v2 }
 0x47d   :  { %9027 = vmatprep.mubr.msk.bf16.mxu0 %vm170_vm0, %v4271_v54  ;;  %9139 = vmatprep.mubr.msk.bf16.mxu1 %vm170_vm0, %v11277_v20 }
 0x47e   :  { %v3970_v47 = vpop.f32.mrf.mxu1  ;;  %9028 = vmatmul.mubr.msk.bf16.gmra.mxu0 %vm170_vm0, %v4272_v57 }
 0x480   :  { %v8930_v19 = vpop.f32.mrf.mxu1 }
 0x481   :  { %v4274_v12 = vpack.c.bf16 %v8930_v19, %v8929_v11  ;;  %v9639_v11 = vld [vmem:[%s12383_s0] sm:$0xff]  }
 0x482   :  { %v3973_v61 = vpop.f32.mrf.mxu1 }
 0x483   :  { %v4273_v37 = vpack.c.bf16 %v3973_v61, %v3970_v47 }
 0x484   :  { %v8933_v16 = vpop.f32.mrf.mxu1  ;;  %9140 = vmatmul.mubr.msk.bf16.gmra.mxu1 %vm170_vm0, %v11269_v13 }
 0x485   :  { %9031 = vmatprep.mubr.msk.bf16.mxu0 %vm170_vm0, %v4273_v37  ;;  %9167 = vmatprep.mubr.msk.bf16.mxu1 %vm170_vm0, %v9638_v56 }
 0x486   :  { %v3986_v20 = vpop.f32.mrf.mxu1  ;;  %9032 = vmatmul.mubr.msk.bf16.gmra.mxu0 %vm170_vm0, %v4274_v12 }
 0x488   :  { %v8934_v34 = vpop.f32.mrf.mxu1 }
 0x489   :  { %v4276_v31 = vpack.c.bf16 %v8934_v34, %v8933_v16 }
 0x48a   :  { %v3989_v28 = vpop.f32.mrf.mxu1 }
 0x48b   :  { %v4275_v1 = vpack.c.bf16 %v3989_v28, %v3986_v20 }
 0x48c   :  { %v8945_v29 = vpop.f32.mrf.mxu0 }
 0x48d   :  { %9035 = vmatprep.mubr.msk.bf16.mxu0 %vm170_vm0, %v4275_v1 }
 0x48e   :  { %v4035_v2 = vpop.f32.mrf.mxu0  ;;  %9036 = vmatmul.mubr.msk.bf16.gmra.mxu0 %vm170_vm0, %v4276_v31 }
 0x490   :  { %v8946_v13 = vpop.f32.mrf.mxu0 }
 0x491   :  { %v4278_v59 = vpack.c.bf16 %v8946_v13, %v8945_v29 }
 0x492   :  { %v4038_v50 = vpop.f32.mrf.mxu0 }
 0x493   :  { %v4277_v22 = vpack.c.bf16 %v4038_v50, %v4035_v2 }
 0x494   :  { %v8949_v27 = vpop.f32.mrf.mxu0 }
 0x495   :  { %9039 = vmatprep.mubr.msk.bf16.mxu0 %vm170_vm0, %v4277_v22 }
 0x496   :  { %v4051_v44 = vpop.f32.mrf.mxu0  ;;  %9040 = vmatmul.mubr.msk.bf16.gmra.mxu0 %vm170_vm0, %v4278_v59 }
 0x498   :  { %v8950_v55 = vpop.f32.mrf.mxu0 }
 0x499   :  { %v4280_v41 = vpack.c.bf16 %v8950_v55, %v8949_v27 }
 0x49a   :  { %v4054_v39 = vpop.f32.mrf.mxu0 }
 0x49b   :  { %v4279_v9 = vpack.c.bf16 %v4054_v39, %v4051_v44 }
 0x49c   :  { %v8961_v49 = vpop.f32.mrf.mxu1 }
 0x49d   :  { %9043 = vmatprep.mubr.msk.bf16.mxu0 %vm170_vm0, %v4279_v9 }
 0x49e   :  { %v4100_v24 = vpop.f32.mrf.mxu1  ;;  %9044 = vmatmul.mubr.msk.bf16.gmra.mxu0 %vm170_vm0, %v4280_v41 }
 0x4a0   :  { %v8962_v14 = vpop.f32.mrf.mxu1 }
 0x4a1   :  { %v4282_v38 = vpack.c.bf16 %v8962_v14, %v8961_v49 }
 0x4a2   :  { %v4103_v36 = vpop.f32.mrf.mxu1 }
 0x4a3   :  { %v4281_v52 = vpack.c.bf16 %v4103_v36, %v4100_v24 }
 0x4a4   :  { %v8965_v45 = vpop.f32.mrf.mxu1 }
 0x4a5   :  { %9047 = vmatprep.mubr.msk.bf16.mxu0 %vm170_vm0, %v4281_v52 }
 0x4a6   :  { %v4116_v35 = vpop.f32.mrf.mxu1  ;;  %9048 = vmatmul.mubr.msk.bf16.gmra.mxu0 %vm170_vm0, %v4282_v38 }
 0x4a8   :  { %v8966_v40 = vpop.f32.mrf.mxu1 }
 0x4a9   :  { %v4284_v48 = vpack.c.bf16 %v8966_v40, %v8965_v45 }
 0x4aa   :  { %v4119_v30 = vpop.f32.mrf.mxu1 }
 0x4ab   :  { %v4283_v0 = vpack.c.bf16 %v4119_v30, %v4116_v35 }
 0x4ac   :  { %v8977_v32 = vpop.f32.mrf.mxu0 }
 0x4ad   :  { %9051 = vmatprep.mubr.msk.bf16.mxu0 %vm170_vm0, %v4283_v0 }
 0x4ae   :  { %v4165_v60 = vpop.f32.mrf.mxu0  ;;  %9052 = vmatmul.mubr.msk.bf16.gmra.mxu0 %vm170_vm0, %v4284_v48 }
 0x4b0   :  { %v8978_v23 = vpop.f32.mrf.mxu0 }
 0x4b1   :  { %v4286_v33 = vpack.c.bf16 %v8978_v23, %v8977_v32  ;;  %v5131_v32 = vsub.s32 2, %v10308_v6 }
 0x4b2   :  { %v4168_v15 = vpop.f32.mrf.mxu0 }
 0x4b3   :  { %v4285_v42 = vpack.c.bf16 %v4168_v15, %v4165_v60 }
 0x4b4   :  { %v8981_v43 = vpop.f32.mrf.mxu0 }
 0x4b5   :  { %9055 = vmatprep.mubr.msk.bf16.mxu0 %vm170_vm0, %v4285_v42 }
 0x4b6   :  { %v4181_v21 = vpop.f32.mrf.mxu0  ;;  %9056 = vmatmul.mubr.msk.bf16.gmra.mxu0 %vm170_vm0, %v4286_v33  ;;  %v9640_v33 = vld [vmem:[%s12388_s5] sm:$0xff] }
 0x4b8   :  { %v8982_v18 = vpop.f32.mrf.mxu0 }
 0x4b9   :  { %v4288_v51 = vpack.c.bf16 %v8982_v18, %v8981_v43  ;;  %v11475_v43 = vrot.slane %v9640_v33, %v5131_v32 }
 0x4ba   :  { %v4184_v7 = vpop.f32.mrf.mxu0 }
 0x4bb   :  { %v4287_v63 = vpack.c.bf16 %v4184_v7, %v4181_v21 }
 0x4bc   :  { %v8993_v3 = vpop.f32.mrf.mxu1 }
 0x4bd   :  { %9059 = vmatprep.mubr.msk.bf16.mxu0 %vm170_vm0, %v4287_v63 }
 0x4be   :  { %v4230_v46 = vpop.f32.mrf.mxu1  ;;  %9060 = vmatmul.mubr.msk.bf16.gmra.mxu0 %vm170_vm0, %v4288_v51 }
 0x4c0   :  { %v8994_v53 = vpop.f32.mrf.mxu1 }
 0x4c1   :  { %v4290_v5 = vpack.c.bf16 %v8994_v53, %v8993_v3 }
 0x4c2   :  { %v4233_v58 = vpop.f32.mrf.mxu1 }
 0x4c3   :  { %v4289_v8 = vpack.c.bf16 %v4233_v58, %v4230_v46 }
 0x4c4   :  { %v8997_v10 = vpop.f32.mrf.mxu1 }
 0x4c5   :  { %9063 = vmatprep.mubr.msk.bf16.mxu0 %vm170_vm0, %v4289_v8 }
 0x4c6   :  { %v4246_v62 = vpop.f32.mrf.mxu1  ;;  %9064 = vmatmul.mubr.msk.bf16.gmra.mxu0 %vm170_vm0, %v4290_v5 }
 0x4c8   :  { %v8998_v4 = vpop.f32.mrf.mxu1 }
 0x4c9   :  { %v4292_v26 = vpack.c.bf16 %v8998_v4, %v8997_v10 }
 0x4ca   :  { %v4249_v17 = vpop.f32.mrf.mxu1 }
 0x4cb   :  { %v4291_v25 = vpack.c.bf16 %v4249_v17, %v4246_v62 }
 0x4cc   :  { %v9081_v54 = vpop.f32.mrf.mxu1 }
 0x4cd   :  { %9067 = vmatprep.mubr.msk.bf16.mxu0 %vm170_vm0, %v4291_v25 }
 0x4ce   :  { %9068 = vmatmul.mubr.msk.bf16.gmra.mxu0 %vm170_vm0, %v4292_v26  ;;  %v11411_v57 = vpop.f32.mrf.mxu1 }
 0x4cf   :  { %9151 = vmatprep.mubr.msk.bf16.mxu0 %vm170_vm0, %v9639_v11 }
 0x4d0   :  { %v9082_v47 = vpop.f32.mrf.mxu1 }
 0x4d2   :  { %v4877_v19 = vpop.f32.mrf.mxu1 }
 0x4d4   :  { %v9085_v61 = vpop.f32.mrf.mxu1 }
 0x4d6   :  { %v4890_v37 = vpop.f32.mrf.mxu1 }
 0x4d8   :  { %v9086_v12 = vpop.f32.mrf.mxu1 }
 0x4da   :  { %v4893_v16 = vpop.f32.mrf.mxu1 }
 0x4dc   :  { %v11417_v56 = vpop.f32.mrf.mxu1 }
 0x4de   :  { %v11419_v20 = vpop.f32.mrf.mxu1 }
 0x4e0   :  { %v11421_v34 = vpop.f32.mrf.mxu1 }
 0x4e2   :  { %v11423_v28 = vpop.f32.mrf.mxu1 }
 0x4e4   :  { %v11425_v1 = vpop.f32.mrf.mxu1 }
 0x4e6   :  { %v11427_v31 = vpop.f32.mrf.mxu1 }
 0x4e8   :  { %v11429_v29 = vpop.f32.mrf.mxu1 }
 0x4ea   :  { %v11431_v2 = vpop.f32.mrf.mxu1 }
 0x4ec   :  { %v11433_v13 = vpop.f32.mrf.mxu1 }
 0x4ee   :  { %v11435_v50 = vpop.f32.mrf.mxu1 }
 0x4f0   :  { %v11437_v22 = vpop.f32.mrf.mxu1 }
 0x4f2   :  { %v11439_v59 = vpop.f32.mrf.mxu1 }
 0x4f4   :  { %v11441_v27 = vpop.f32.mrf.mxu1 }
 0x4f6   :  { %v11443_v44 = vpop.f32.mrf.mxu1 }
 0x4f8   :  { %v11445_v55 = vpop.f32.mrf.mxu1 }
 0x4fa   :  { %v11447_v39 = vpop.f32.mrf.mxu1 }
 0x4fc   :  { %v11449_v9 = vpop.f32.mrf.mxu1 }
 0x4fe   :  { %v11451_v41 = vpop.f32.mrf.mxu1 }
 0x500   :  { %v11453_v49 = vpop.f32.mrf.mxu1 }
 0x502   :  { %v11455_v24 = vpop.f32.mrf.mxu1 }
 0x504   :  { %v11457_v14 = vpop.f32.mrf.mxu1 }
 0x506   :  { %v11459_v36 = vpop.f32.mrf.mxu1 }
 0x508   :  { %v11461_v52 = vpop.f32.mrf.mxu1 }
 0x50a   :  { %v11463_v38 = vpop.f32.mrf.mxu1 }
 0x50c   :  { %v11465_v35 = vpop.f32.mrf.mxu1 }
 0x50e   :  { %v11467_v0 = vpop.f32.mrf.mxu1 }
 0x510   :  { %v11470_v15 = vpop.f32.mrf.mxu1 }
 0x512   :  { %v11478_v3 = vpop.f32.mrf.mxu1 }
 0x514   :  { %v11484_v11 = vpop.f32.mrf.mxu1 }
 0x516   :  { %v9009_v45 = vpop.f32.mrf.mxu0 }
 0x517   :  { %v4883_v46 = vadd.f32 %v9081_v54, %v9009_v45 }
 0x518   :  { %v4465_v40 = vpop.f32.mrf.mxu0 }
 0x519   :  { %v4875_v54 = vadd.f32 %v11411_v57, %v4465_v40 }
 0x51a   :  { %v9010_v30 = vpop.f32.mrf.mxu0 }
 0x51b   :  { %v4886_v18 = vadd.f32 %v9082_v47, %v9010_v30  ;;  %v5135_v47 = vadd.f32 %v11475_v43, %v4883_v46  ;;  %v5133_v57 = vadd.f32 %v11475_v43, %v4875_v54 }
 0x51c   :  { %v4468_v48 = vpop.f32.mrf.mxu0 }
 0x51d   :  { %v5136_v10 = vadd.f32 %v11475_v43, %v4886_v18  ;;  %v4878_v4 = vadd.f32 %v4877_v19, %v4468_v48  ;;  %v11494_v48 = vpop.f32.mrf.mxu1 }
 0x51e   :  { %v9013_v60 = vpop.f32.mrf.mxu0 }
 0x51f   :  { %v4899_v23 = vadd.f32 %v9085_v61, %v9013_v60  ;;  %v5200_v30 = vmax.f32 %v5136_v10, 0.0  ;;  %v5134_v32 = vadd.f32 %v11475_v43, %v4878_v4  ;;  %v11502_v18 = vpop.f32.mrf.mxu1 }
 0x520   :  { %v4481_v42 = vpop.f32.mrf.mxu0 }
 0x521   :  { %v4891_v21 = vadd.f32 %v4890_v37, %v4481_v42  ;;  %v5139_v63 = vadd.f32 %v11475_v43, %v4899_v23  ;;  %v5199_v23 = vmax.f32 %v5135_v47, 0.0  ;;  %v5198_v42 = vmax.f32 %v5134_v32, 0.0 }
 0x522   :  { %v9014_v7 = vpop.f32.mrf.mxu0 }
 0x523   :  { %v4902_v51 = vadd.f32 %v9086_v12, %v9014_v7  ;;  %v5137_v58 = vadd.f32 %v11475_v43, %v4891_v21  ;;  %v5203_v17 = vmax.f32 %v5139_v63, 0.0  ;;  %v11500_v21 = vpack.c.bf16 %v5200_v30, %v5199_v23 }
 0x524   :  { %v4484_v53 = vpop.f32.mrf.mxu0  ;;  %v5197_v63 = vmax.f32 %v5133_v57, 0.0 }
 0x525   :  { %v5140_v8 = vadd.f32 %v11475_v43, %v4902_v51  ;;  %v4894_v5 = vadd.f32 %v4893_v16, %v4484_v53  ;;  %v5201_v37 = vmax.f32 %v5137_v58, 0.0 }
 0x526   :  { %v9017_v62 = vpop.f32.mrf.mxu0 }
 0x527   :  { %v5204_v25 = vmax.f32 %v5140_v8, 0.0  ;;  %v5138_v26 = vadd.f32 %v11475_v43, %v4894_v5  ;;  %v11512_v5 = vpop.f32.mrf.mxu1  ;;  %v4915_v10 = vadd.f32 %v11417_v56, %v9017_v62 }
 0x528   :  { %v4497_v61 = vpop.f32.mrf.mxu0 }
 0x529   :  { %v5202_v12 = vmax.f32 %v5138_v26, 0.0  ;;  %v11488_v45 = vpack.c.bf16 %v5204_v25, %v5203_v17  ;;  %v11523_v62 = vpop.f32.mrf.mxu1 }
 0x52a   :  { %v9018_v16 = vpop.f32.mrf.mxu0 }
 0x52b   :  { %9143 = vmatprep.subr.bf16.mxu0 %v11488_v45  ;;  %v11492_v19 = vpack.c.bf16 %v5202_v12, %v5201_v37  ;;  %v4918_v46 = vadd.f32 %v11421_v34, %v9018_v16  ;;  %v5143_v37 = vadd.f32 %v11475_v43, %v4915_v10 }
 0x52c   :  { %v4500_v60 = vpop.f32.mrf.mxu0  ;;  %9144 = vmatpush3.bf16.msra.mxu0 %v11488_v45 }
 0x52d   :  { %9145 = vmatprep.subr.bf16.mxu0 %v11492_v19  ;;  %v5144_v25 = vadd.f32 %v11475_v43, %v4918_v46  ;;  %v4910_v26 = vadd.f32 %v11423_v28, %v4500_v60  ;;  %v9641_v60 = vld [vmem:[%s12383_s0 + $0x8] sm:$0xff]  }
 0x52e   :  { %v9021_v40 = vpop.f32.mrf.mxu0 }
 0x52f   :  { %v4931_v33 = vadd.f32 %v11425_v1, %v9021_v40  ;;  %v11510_v1 = vpack.c.bf16 %v5198_v42, %v5197_v63  ;;  %v5208_v57 = vmax.f32 %v5144_v25, 0.0  ;;  %v5142_v28 = vadd.f32 %v11475_v43, %v4910_v26  ;;  %v11538_v42 = vpop.f32.mrf.mxu1 }
 0x530   :  { %v4513_v7 = vpop.f32.mrf.mxu0  ;;  %9146 = vmatpush3.bf16.msra.mxu0 %v11492_v19 }
 0x531   :  { %v4923_v51 = vadd.f32 %v11427_v31, %v4513_v7  ;;  %9147 = vmatprep.subr.bf16.mxu0 %v11500_v21  ;;  %v5147_v58 = vadd.f32 %v11475_v43, %v4931_v33  ;;  %v5207_v33 = vmax.f32 %v5143_v37, 0.0 }
 0x532   :  { %v9022_v53 = vpop.f32.mrf.mxu0 }
 0x533   :  { %v4934_v8 = vadd.f32 %v11429_v29, %v9022_v53  ;;  %v5145_v31 = vadd.f32 %v11475_v43, %v4923_v51  ;;  %v5211_v47 = vmax.f32 %v5147_v58, 0.0  ;;  %v5206_v51 = vmax.f32 %v5142_v28, 0.0  ;;  %v11550_v58 = vpop.f32.mrf.mxu1 }
 0x534   :  { %v4516_v4 = vpop.f32.mrf.mxu0  ;;  %9148 = vmatpush3.bf16.msra.mxu0 %v11500_v21  ;;  %v11548_v53 = vpack.c.bf16 %v5208_v57, %v5207_v33 }
 0x535   :  { %v5148_v17 = vadd.f32 %v11475_v43, %v4934_v8  ;;  %v4926_v34 = vadd.f32 %v11431_v2, %v4516_v4  ;;  %9149 = vmatprep.subr.bf16.mxu0 %v11510_v1  ;;  %v4907_v2 = vadd.f32 %v11419_v20, %v4497_v61  ;;  %v5209_v16 = vmax.f32 %v5145_v31, 0.0  ;;  %v9642_v61 = vld [vmem:[%s12383_s0 + $0x10] sm:$0xff]  }
 0x536   :  { %v9025_v29 = vpop.f32.mrf.mxu0 }
 0x537   :  { %v5212_v54 = vmax.f32 %v5148_v17, 0.0  ;;  %v5146_v56 = vadd.f32 %v11475_v43, %v4926_v34  ;;  %v5141_v7 = vadd.f32 %v11475_v43, %v4907_v2 }
 0x538   :  { %v4529_v12 = vpop.f32.mrf.mxu0  ;;  %9150 = vmatpush3.bf16.msra.mxu0 %v11510_v1 }
 0x539   :  { %v5210_v30 = vmax.f32 %v5146_v56, 0.0  ;;  %v11528_v32 = vpack.c.bf16 %v5212_v54, %v5211_v47  ;;  %v5205_v10 = vmax.f32 %v5141_v7, 0.0  ;;  %v11564_v47 = vpop.f32.mrf.mxu1 }
 0x53a   :  { %v9026_v23 = vpop.f32.mrf.mxu0 }
 0x53b   :  { %9152 = vmatmul.mubr.msk.bf16.vlgmr.msra.gmra.mxu0 %vm170_vm0, %v9641_v60  ;;  %9159 = vmatprep.subr.bf16.mxu1 %v11528_v32  ;;  %v11536_v40 = vpack.c.bf16 %v5210_v30, %v5209_v16  ;;  %v4950_v31 = vadd.f32 %v11437_v22, %v9026_v23  ;;  %v11562_v26 = vpack.c.bf16 %v5206_v51, %v5205_v10  ;;  %v9644_v22 = vld [vmem:[%s12383_s0 + $0x40] sm:$0xff]   ;;  %v11579_v57 = vpop.f32.mrf.mxu1 }
 0x53c   :  { %v4532_v20 = vpop.f32.mrf.mxu0  ;;  %9160 = vmatpush3.bf16.msra.mxu1 %v11528_v32  ;;  %9155 = vmatprep.mubr.msk.bf16.mxu0 %vm170_vm0, %v9642_v61 }
 0x53d   :  { %9161 = vmatprep.subr.bf16.mxu1 %v11536_v40  ;;  %v5152_v2 = vadd.f32 %v11475_v43, %v4950_v31 }
 0x53e   :  { %v9029_v63 = vpop.f32.mrf.mxu0 }
 0x53f   :  { %v4963_v46 = vadd.f32 %v11441_v27, %v9029_v63  ;;  %v9643_v27 = vld [vmem:[%s12383_s0 + $0x18] sm:$0xff]   ;;  %v5216_v51 = vmax.f32 %v5152_v2, 0.0 }
 0x540   :  { %v4545_v8 = vpop.f32.mrf.mxu0  ;;  %9162 = vmatpush3.bf16.msra.mxu1 %v11536_v40 }
 0x541   :  { %v4955_v4 = vadd.f32 %v11443_v44, %v4545_v8  ;;  %9163 = vmatprep.subr.bf16.mxu1 %v11548_v53  ;;  %v5155_v34 = vadd.f32 %v11475_v43, %v4963_v46  ;;  %v4947_v44 = vadd.f32 %v11433_v13, %v9025_v29  ;;  %v4942_v29 = vadd.f32 %v11439_v59, %v4532_v20  ;;  %v9645_v20 = vld [vmem:[%s12383_s0 + $0x28] sm:$0xff]   ;;  %v11594_v8 = vpop.f32.mrf.mxu1 }
 0x542   :  { %v9030_v17 = vpop.f32.mrf.mxu0 }
 0x543   :  { %v4966_v25 = vadd.f32 %v11445_v55, %v9030_v17  ;;  %9156 = vmatmul.mubr.msk.bf16.gmra.mxu0 %vm170_vm0, %v9643_v27  ;;  %v5153_v55 = vadd.f32 %v11475_v43, %v4955_v4  ;;  %v5219_v16 = vmax.f32 %v5155_v34, 0.0  ;;  %v5151_v28 = vadd.f32 %v11475_v43, %v4947_v44  ;;  %v11606_v27 = vpop.f32.mrf.mxu1 }
 0x544   :  { %v4548_v54 = vpop.f32.mrf.mxu0  ;;  %9164 = vmatpush3.bf16.msra.mxu1 %v11548_v53  ;;  %9183 = vmatprep.mubr.msk.bf16.mxu0 %vm170_vm0, %v9644_v22  ;;  %v5150_v59 = vadd.f32 %v11475_v43, %v4942_v29 }
 0x545   :  { %v5156_v56 = vadd.f32 %v11475_v43, %v4966_v25  ;;  %v4958_v37 = vadd.f32 %v11447_v39, %v4548_v54  ;;  %9165 = vmatprep.subr.bf16.mxu1 %v11562_v26  ;;  %v4939_v39 = vadd.f32 %v11435_v50, %v4529_v12  ;;  %v5217_v61 = vmax.f32 %v5153_v55, 0.0  ;;  %v9646_v12 = vld [vmem:[%s12383_s0 + $0x30] sm:$0xff]  }
 0x546   :  { %v9033_v13 = vpop.f32.mrf.mxu0  ;;  %v5215_v10 = vmax.f32 %v5151_v28, 0.0  ;;  %v5214_v17 = vmax.f32 %v5150_v59, 0.0 }
 0x547   :  { %v5220_v30 = vmax.f32 %v5156_v56, 0.0  ;;  %v5154_v23 = vadd.f32 %v11475_v43, %v4958_v37  ;;  %v5149_v4 = vadd.f32 %v11475_v43, %v4939_v39 }
 0x548   :  { %v4561_v60 = vpop.f32.mrf.mxu0  ;;  %9166 = vmatpush3.bf16.msra.mxu1 %v11562_v26  ;;  %v11604_v25 = vpack.c.bf16 %v5216_v51, %v5215_v10 }
 0x549   :  { %v5218_v33 = vmax.f32 %v5154_v23, 0.0  ;;  %v11584_v7 = vpack.c.bf16 %v5220_v30, %v5219_v16  ;;  %v5213_v54 = vmax.f32 %v5149_v4, 0.0  ;;  %v11620_v16 = vpop.f32.mrf.mxu1 }
 0x54a   :  { %v9034_v63 = vpop.f32.mrf.mxu0 }
 0x54b   :  { %9168 = vmatmul.mubr.msk.bf16.vlgmr.msra.gmra.mxu1 %vm170_vm0, %v9645_v20  ;;  %9175 = vmatprep.subr.bf16.mxu0 %v11584_v7  ;;  %v11592_v46 = vpack.c.bf16 %v5218_v33, %v5217_v61  ;;  %v4982_v55 = vadd.f32 %v11453_v49, %v9034_v63  ;;  %v11618_v29 = vpack.c.bf16 %v5214_v17, %v5213_v54  ;;  %v9648_v49 = vld [vmem:[%s12383_s0 + $0x60] sm:$0xff]   ;;  %v11635_v51 = vpop.f32.mrf.mxu1 }
 0x54c   :  { %v4564_v50 = vpop.f32.mrf.mxu0  ;;  %9176 = vmatpush3.bf16.msra.mxu0 %v11584_v7  ;;  %9171 = vmatprep.mubr.msk.bf16.mxu1 %vm170_vm0, %v9646_v12 }
 0x54d   :  { %9177 = vmatprep.subr.bf16.mxu0 %v11592_v46  ;;  %v5160_v39 = vadd.f32 %v11475_v43, %v4982_v55 }
 0x54e   :  { %v9037_v31 = vpop.f32.mrf.mxu0 }
 0x54f   :  { %v4995_v34 = vadd.f32 %v11457_v14, %v9037_v31  ;;  %v9647_v14 = vld [vmem:[%s12383_s0 + $0x38] sm:$0xff]   ;;  %v5224_v17 = vmax.f32 %v5160_v39, 0.0 }
 0x550   :  { %v4577_v44 = vpop.f32.mrf.mxu0  ;;  %9178 = vmatpush3.bf16.msra.mxu0 %v11592_v46 }
 0x551   :  { %v4987_v22 = vadd.f32 %v11459_v36, %v4577_v44  ;;  %9179 = vmatprep.subr.bf16.mxu0 %v11604_v25  ;;  %v5163_v37 = vadd.f32 %v11475_v43, %v4995_v34  ;;  %v4979_v36 = vadd.f32 %v11449_v9, %v9033_v13  ;;  %v4974_v13 = vadd.f32 %v11455_v24, %v4564_v50  ;;  %v9649_v50 = vld [vmem:[%s12383_s0 + $0x48] sm:$0xff]   ;;  %v11650_v44 = vpop.f32.mrf.mxu1 }
 0x552   :  { %v9038_v56 = vpop.f32.mrf.mxu0 }
 0x553   :  { %v4998_v2 = vadd.f32 %v11461_v52, %v9038_v56  ;;  %9172 = vmatmul.mubr.msk.bf16.gmra.mxu1 %vm170_vm0, %v9647_v14  ;;  %v5161_v52 = vadd.f32 %v11475_v43, %v4987_v22  ;;  %v5227_v61 = vmax.f32 %v5163_v37, 0.0  ;;  %v5159_v59 = vadd.f32 %v11475_v43, %v4979_v36  ;;  %v11662_v14 = vpop.f32.mrf.mxu1 }
 0x554   :  { %v4580_v30 = vpop.f32.mrf.mxu0  ;;  %9180 = vmatpush3.bf16.msra.mxu0 %v11604_v25  ;;  %9199 = vmatprep.mubr.msk.bf16.mxu1 %vm170_vm0, %v9648_v49  ;;  %v5158_v24 = vadd.f32 %v11475_v43, %v4974_v13 }
 0x555   :  { %v5164_v23 = vadd.f32 %v11475_v43, %v4998_v2  ;;  %v4990_v28 = vadd.f32 %v11463_v38, %v4580_v30  ;;  %9181 = vmatprep.subr.bf16.mxu0 %v11618_v29  ;;  %v4971_v38 = vadd.f32 %v11451_v41, %v4561_v60  ;;  %v5225_v12 = vmax.f32 %v5161_v52, 0.0  ;;  %v9650_v60 = vld [vmem:[%s12383_s0 + $0x50] sm:$0xff]  }
 0x556   :  { %v9041_v9 = vpop.f32.mrf.mxu0  ;;  %v5223_v54 = vmax.f32 %v5159_v59, 0.0  ;;  %v5222_v56 = vmax.f32 %v5158_v24, 0.0 }
 0x557   :  { %v5228_v33 = vmax.f32 %v5164_v23, 0.0  ;;  %v5162_v63 = vadd.f32 %v11475_v43, %v4990_v28  ;;  %v5157_v22 = vadd.f32 %v11475_v43, %v4971_v38 }
 0x558   :  { %v4593_v20 = vpop.f32.mrf.mxu0  ;;  %9182 = vmatpush3.bf16.msra.mxu0 %v11618_v29  ;;  %v11660_v2 = vpack.c.bf16 %v5224_v17, %v5223_v54 }
 0x559   :  { %v5226_v10 = vmax.f32 %v5162_v63, 0.0  ;;  %v11640_v4 = vpack.c.bf16 %v5228_v33, %v5227_v61  ;;  %v5221_v30 = vmax.f32 %v5157_v22, 0.0  ;;  %v11676_v61 = vpop.f32.mrf.mxu1 }
 0x55a   :  { %v9042_v31 = vpop.f32.mrf.mxu0 }
 0x55b   :  { %9184 = vmatmul.mubr.msk.bf16.vlgmr.msra.gmra.mxu0 %vm170_vm0, %v9649_v50  ;;  %9191 = vmatprep.subr.bf16.mxu1 %v11640_v4  ;;  %v11648_v34 = vpack.c.bf16 %v5226_v10, %v5225_v12  ;;  %v5014_v52 = vadd.f32 %v11470_v15, %v9042_v31  ;;  %v11674_v13 = vpack.c.bf16 %v5222_v56, %v5221_v30  ;;  %v9652_v15 = vld [vmem:[%s12383_s0 + $0x80] sm:$0xff]   ;;  %v11691_v17 = vpop.f32.mrf.mxu1 }
 0x55c   :  { %v4596_v41 = vpop.f32.mrf.mxu0  ;;  %9192 = vmatpush3.bf16.msra.mxu1 %v11640_v4  ;;  %9187 = vmatprep.mubr.msk.bf16.mxu0 %vm170_vm0, %v9650_v60 }
 0x55d   :  { %9193 = vmatprep.subr.bf16.mxu1 %v11648_v34  ;;  %v5168_v38 = vadd.f32 %v11475_v43, %v5014_v52 }
 0x55e   :  { %v9045_v55 = vpop.f32.mrf.mxu0 }
 0x55f   :  { %v5027_v37 = vadd.f32 %v11484_v11, %v9045_v55  ;;  %v9651_v11 = vld [vmem:[%s12383_s0 + $0x58] sm:$0xff]   ;;  %v5232_v56 = vmax.f32 %v5168_v38, 0.0 }
 0x560   :  { %v4609_v36 = vpop.f32.mrf.mxu0  ;;  %9194 = vmatpush3.bf16.msra.mxu1 %v11648_v34 }
 0x561   :  { %v5019_v49 = vadd.f32 %v11494_v48, %v4609_v36  ;;  %9195 = vmatprep.subr.bf16.mxu1 %v11660_v2  ;;  %v5171_v28 = vadd.f32 %v11475_v43, %v5027_v37  ;;  %v5011_v48 = vadd.f32 %v11465_v35, %v9041_v9  ;;  %v5006_v9 = vadd.f32 %v11478_v3, %v4596_v41  ;;  %v9653_v41 = vld [vmem:[%s12383_s0 + $0x68] sm:$0xff]   ;;  %v11706_v36 = vpop.f32.mrf.mxu1 }
 0x562   :  { %v9046_v23 = vpop.f32.mrf.mxu0 }
 0x563   :  { %v5030_v39 = vadd.f32 %v11502_v18, %v9046_v23  ;;  %9188 = vmatmul.mubr.msk.bf16.gmra.mxu0 %vm170_vm0, %v9651_v11  ;;  %v5169_v18 = vadd.f32 %v11475_v43, %v5019_v49  ;;  %v5235_v12 = vmax.f32 %v5171_v28, 0.0  ;;  %v5167_v24 = vadd.f32 %v11475_v43, %v5011_v48  ;;  %v11718_v11 = vpop.f32.mrf.mxu1 }
 0x564   :  { %v4612_v33 = vpop.f32.mrf.mxu0  ;;  %9196 = vmatpush3.bf16.msra.mxu1 %v11660_v2  ;;  %9215 = vmatprep.mubr.msk.bf16.mxu0 %vm170_vm0, %v9652_v15  ;;  %v5166_v3 = vadd.f32 %v11475_v43, %v5006_v9 }
 0x565   :  { %v5172_v63 = vadd.f32 %v11475_v43, %v5030_v39  ;;  %v5022_v59 = vadd.f32 %v11512_v5, %v4612_v33  ;;  %9197 = vmatprep.subr.bf16.mxu1 %v11674_v13  ;;  %v5003_v5 = vadd.f32 %v11467_v0, %v4593_v20  ;;  %v5233_v60 = vmax.f32 %v5169_v18, 0.0  ;;  %v9654_v20 = vld [vmem:[%s12383_s0 + $0x70] sm:$0xff]  }
 0x566   :  { %v9049_v35 = vpop.f32.mrf.mxu0  ;;  %v5231_v30 = vmax.f32 %v5167_v24, 0.0  ;;  %v5230_v23 = vmax.f32 %v5166_v3, 0.0 }
 0x567   :  { %v5236_v10 = vmax.f32 %v5172_v63, 0.0  ;;  %v5170_v31 = vadd.f32 %v11475_v43, %v5022_v59  ;;  %v5165_v49 = vadd.f32 %v11475_v43, %v5003_v5 }
 0x568   :  { %v4625_v50 = vpop.f32.mrf.mxu0  ;;  %9198 = vmatpush3.bf16.msra.mxu1 %v11674_v13  ;;  %v11716_v39 = vpack.c.bf16 %v5232_v56, %v5231_v30 }
 0x569   :  { %v5234_v54 = vmax.f32 %v5170_v31, 0.0  ;;  %v11696_v22 = vpack.c.bf16 %v5236_v10, %v5235_v12  ;;  %v5229_v33 = vmax.f32 %v5165_v49, 0.0  ;;  %v11732_v12 = vpop.f32.mrf.mxu1 }
 0x56a   :  { %v9050_v55 = vpop.f32.mrf.mxu0 }
 0x56b   :  { %9200 = vmatmul.mubr.msk.bf16.vlgmr.msra.gmra.mxu1 %vm170_vm0, %v9653_v41  ;;  %9207 = vmatprep.subr.bf16.mxu0 %v11696_v22  ;;  %v11704_v37 = vpack.c.bf16 %v5234_v54, %v5233_v60  ;;  %v5046_v18 = vadd.f32 %v11550_v58, %v9050_v55  ;;  %v11730_v9 = vpack.c.bf16 %v5230_v23, %v5229_v33  ;;  %v9656_v58 = vld [vmem:[%s12383_s0 + $0xa0] sm:$0xff]   ;;  %v11747_v56 = vpop.f32.mrf.mxu1 }
 0x56c   :  { %v4628_v0 = vpop.f32.mrf.mxu0  ;;  %9208 = vmatpush3.bf16.msra.mxu0 %v11696_v22  ;;  %9203 = vmatprep.mubr.msk.bf16.mxu1 %vm170_vm0, %v9654_v20 }
 0x56d   :  { %9209 = vmatprep.subr.bf16.mxu0 %v11704_v37  ;;  %v5176_v5 = vadd.f32 %v11475_v43, %v5046_v18 }
 0x56e   :  { %v9053_v52 = vpop.f32.mrf.mxu0 }
 0x56f   :  { %v5059_v28 = vadd.f32 %v11579_v57, %v9053_v52  ;;  %v9655_v57 = vld [vmem:[%s12383_s0 + $0x78] sm:$0xff]   ;;  %v5240_v23 = vmax.f32 %v5176_v5, 0.0 }
 0x570   :  { %v4641_v48 = vpop.f32.mrf.mxu0  ;;  %9210 = vmatpush3.bf16.msra.mxu0 %v11704_v37 }
 0x571   :  { %v5051_v15 = vadd.f32 %v11594_v8, %v4641_v48  ;;  %9211 = vmatprep.subr.bf16.mxu0 %v11716_v39  ;;  %v5179_v59 = vadd.f32 %v11475_v43, %v5059_v28  ;;  %v5043_v8 = vadd.f32 %v11523_v62, %v9049_v35  ;;  %v5038_v35 = vadd.f32 %v11564_v47, %v4628_v0  ;;  %v9657_v0 = vld [vmem:[%s12383_s0 + $0x88] sm:$0xff]   ;;  %v11762_v48 = vpop.f32.mrf.mxu1 }
 0x572   :  { %v9054_v63 = vpop.f32.mrf.mxu0 }
 0x573   :  { %v5062_v38 = vadd.f32 %v11606_v27, %v9054_v63  ;;  %9204 = vmatmul.mubr.msk.bf16.gmra.mxu1 %vm170_vm0, %v9655_v57  ;;  %v5177_v27 = vadd.f32 %v11475_v43, %v5051_v15  ;;  %v5243_v60 = vmax.f32 %v5179_v59, 0.0  ;;  %v5175_v3 = vadd.f32 %v11475_v43, %v5043_v8  ;;  %v9138_v57 = vpop.f32.mrf.mxu1 }
 0x574   :  { %v4644_v10 = vpop.f32.mrf.mxu0  ;;  %9212 = vmatpush3.bf16.msra.mxu0 %v11716_v39  ;;  %9231 = vmatprep.mubr.msk.bf16.mxu1 %vm170_vm0, %v9656_v58  ;;  %v5174_v47 = vadd.f32 %v11475_v43, %v5038_v35 }
 0x575   :  { %v5180_v31 = vadd.f32 %v11475_v43, %v5062_v38  ;;  %v5054_v24 = vadd.f32 %v11620_v16, %v4644_v10  ;;  %9213 = vmatprep.subr.bf16.mxu0 %v11730_v9  ;;  %v5035_v16 = vadd.f32 %v11538_v42, %v4625_v50  ;;  %v5241_v20 = vmax.f32 %v5177_v27, 0.0  ;;  %v9658_v50 = vld [vmem:[%s12383_s0 + $0x90] sm:$0xff]  }
 0x576   :  { %v9057_v62 = vpop.f32.mrf.mxu0  ;;  %v5239_v33 = vmax.f32 %v5175_v3, 0.0  ;;  %v5238_v63 = vmax.f32 %v5174_v47, 0.0 }
 0x577   :  { %v5244_v54 = vmax.f32 %v5180_v31, 0.0  ;;  %v5178_v55 = vadd.f32 %v11475_v43, %v5054_v24  ;;  %v5173_v15 = vadd.f32 %v11475_v43, %v5035_v16 }
 0x578   :  { %v4657_v41 = vpop.f32.mrf.mxu0  ;;  %9214 = vmatpush3.bf16.msra.mxu0 %v11730_v9  ;;  %v11772_v38 = vpack.c.bf16 %v5240_v23, %v5239_v33 }
 0x579   :  { %v5242_v30 = vmax.f32 %v5178_v55, 0.0  ;;  %v11752_v49 = vpack.c.bf16 %v5244_v54, %v5243_v60  ;;  %v5237_v10 = vmax.f32 %v5173_v15, 0.0  ;;  %v11786_v60 = vpop.f32.mrf.mxu1 }
 0x57a   :  { %v9058_v52 = vpop.f32.mrf.mxu0 }
 0x57b   :  { %9216 = vmatmul.mubr.msk.bf16.vlgmr.msra.gmra.mxu0 %vm170_vm0, %v9657_v0  ;;  %9223 = vmatprep.subr.bf16.mxu1 %v11752_v49  ;;  %v11760_v28 = vpack.c.bf16 %v5242_v30, %v5241_v20  ;;  %v5078_v27 = vadd.f32 %v11662_v14, %v9058_v52  ;;  %v11784_v35 = vpack.c.bf16 %v5238_v63, %v5237_v10  ;;  %v9660_v14 = vld [vmem:[%s12383_s0 + $0xc0] sm:$0xff]   ;;  %v9141_v23 = vpop.f32.mrf.mxu1 }
 0x57c   :  { %v4660_v42 = vpop.f32.mrf.mxu0  ;;  %9224 = vmatpush3.bf16.msra.mxu1 %v11752_v49  ;;  %9219 = vmatprep.mubr.msk.bf16.mxu0 %vm170_vm0, %v9658_v50  ;;  %v5067_v50 = vadd.f32 %v11650_v44, %v4657_v41  ;;  %v9662_v41 = vld [vmem:[%s12383_s0 + $0xb0] sm:$0xff]  }
 0x57d   :  { %9225 = vmatprep.subr.bf16.mxu1 %v11760_v28  ;;  %v5184_v16 = vadd.f32 %v11475_v43, %v5078_v27 }
 0x57e   :  { %v9061_v18 = vpop.f32.mrf.mxu0 }
 0x57f   :  { %v5091_v59 = vadd.f32 %v11691_v17, %v9061_v18  ;;  %v9659_v17 = vld [vmem:[%s12383_s0 + $0x98] sm:$0xff]   ;;  %v5248_v63 = vmax.f32 %v5184_v16, 0.0 }
 0x580   :  { %v4673_v8 = vpop.f32.mrf.mxu0  ;;  %9226 = vmatpush3.bf16.msra.mxu1 %v11760_v28 }
 0x581   :  { %v5083_v58 = vadd.f32 %v11706_v36, %v4673_v8  ;;  %9227 = vmatprep.subr.bf16.mxu1 %v11772_v38  ;;  %v5187_v24 = vadd.f32 %v11475_v43, %v5091_v59  ;;  %v5075_v36 = vadd.f32 %v11635_v51, %v9057_v62  ;;  %v5070_v62 = vadd.f32 %v11676_v61, %v4660_v42  ;;  %v9661_v42 = vld [vmem:[%s12383_s0 + $0xa8] sm:$0xff]   ;;  %v5114_v8 = vpop.f32.mrf.mxu1 }
 0x582   :  { %v9062_v31 = vpop.f32.mrf.mxu0 }
 0x583   :  { %v5094_v5 = vadd.f32 %v11718_v11, %v9062_v31  ;;  %9220 = vmatmul.mubr.msk.bf16.gmra.mxu0 %vm170_vm0, %v9659_v17  ;;  %v5185_v11 = vadd.f32 %v11475_v43, %v5083_v58  ;;  %v5251_v20 = vmax.f32 %v5187_v24, 0.0  ;;  %v5183_v47 = vadd.f32 %v11475_v43, %v5075_v36  ;;  %v9142_v17 = vpop.f32.mrf.mxu1 }
 0x584   :  { %v4676_v54 = vpop.f32.mrf.mxu0  ;;  %9228 = vmatpush3.bf16.msra.mxu1 %v11772_v38  ;;  %9247 = vmatprep.mubr.msk.bf16.mxu0 %vm170_vm0, %v9660_v14  ;;  %v5182_v61 = vadd.f32 %v11475_v43, %v5070_v62  ;;  %v5181_v58 = vadd.f32 %v11475_v43, %v5067_v50  ;;  %v9663_v62 = vld [vmem:[%s12383_s0 + $0xb8] sm:$0xff]  }
 0x585   :  { %v5188_v55 = vadd.f32 %v11475_v43, %v5094_v5  ;;  %v5086_v3 = vadd.f32 %v11732_v12, %v4676_v54  ;;  %9229 = vmatprep.subr.bf16.mxu1 %v11784_v35  ;;  %v5249_v12 = vmax.f32 %v5185_v11, 0.0  ;;  %v5247_v10 = vmax.f32 %v5183_v47, 0.0 }
 0x586   :  { %v9065_v51 = vpop.f32.mrf.mxu0  ;;  %v5246_v31 = vmax.f32 %v5182_v61, 0.0  ;;  %v5245_v54 = vmax.f32 %v5181_v58, 0.0 }
 0x587   :  { %v5252_v30 = vmax.f32 %v5188_v55, 0.0  ;;  %v5186_v52 = vadd.f32 %v11475_v43, %v5086_v3  ;;  %v11821_v5 = vpack.c.bf16 %v5248_v63, %v5247_v10 }
 0x588   :  { %v4689_v0 = vpop.f32.mrf.mxu0  ;;  %9230 = vmatpush3.bf16.msra.mxu1 %v11784_v35 }
 0x589   :  { %v5250_v33 = vmax.f32 %v5186_v52, 0.0  ;;  %v11804_v15 = vpack.c.bf16 %v5252_v30, %v5251_v20  ;;  %v11830_v20 = vpack.c.bf16 %v5246_v31, %v5245_v54  ;;  %v5117_v30 = vpop.f32.mrf.mxu1  ;;  %v5107_v52 = vadd.f32 %v11747_v56, %v9065_v51 }
 0x58a   :  { %v9066_v18 = vpop.f32.mrf.mxu0 }
 0x58b   :  { %9232 = vmatmul.mubr.msk.bf16.vlgmr.msra.gmra.mxu1 %vm170_vm0, %v9661_v42  ;;  %9239 = vmatprep.subr.bf16.mxu0 %v11804_v15  ;;  %v11812_v59 = vpack.c.bf16 %v5250_v33, %v5249_v12  ;;  %v5110_v11 = vadd.f32 %v9138_v57, %v9066_v18  ;;  %v9664_v57 = vld [vmem:[%s12383_s0 + $0xe0] sm:$0xff]   ;;  %v9570_v33 = vld [vmem:[#allocation2 + $0xf8] sm:$0xff]   ;;  %v5191_v42 = vadd.f32 %v11475_v43, %v5107_v52  ;;  %v9669_v52 = vld [vmem:[%s12383_s0 + $0xf0] sm:$0xff]  }
 0x58c   :  { %v4692_v44 = vpop.f32.mrf.mxu0  ;;  %9240 = vmatpush3.bf16.msra.mxu0 %v11804_v15  ;;  %9235 = vmatprep.mubr.msk.bf16.mxu1 %vm170_vm0, %v9662_v41 }
 0x58d   :  { %9241 = vmatprep.subr.bf16.mxu0 %v11812_v59  ;;  %v5192_v18 = vadd.f32 %v11475_v43, %v5110_v11  ;;  %v5102_v56 = vadd.f32 %v11786_v60, %v4692_v44  ;;  %v9665_v60 = vld [vmem:[%s12383_s0 + $0xc8] sm:$0xff]  }
 0x58e   :  { %v9069_v27 = vpop.f32.mrf.mxu0 }
 0x58f   :  { %v5123_v24 = vadd.f32 %v9141_v23, %v9069_v27  ;;  %v9571_v27 = vld [vmem:[#allocation2 + $0xf0] sm:$0xff]   ;;  %v5256_v31 = vmax.f32 %v5192_v18, 0.0 }
 0x590   :  { %v4705_v36 = vpop.f32.mrf.mxu0  ;;  %9242 = vmatpush3.bf16.msra.mxu0 %v11812_v59 }
 0x591   :  { %v5115_v14 = vadd.f32 %v5114_v8, %v4705_v36  ;;  %9243 = vmatprep.subr.bf16.mxu0 %v11821_v5  ;;  %v5195_v3 = vadd.f32 %v11475_v43, %v5123_v24  ;;  %v5099_v8 = vadd.f32 %v11762_v48, %v4689_v0  ;;  %v5190_v24 = vadd.f32 %v11475_v43, %v5102_v56  ;;  %v9666_v48 = vld [vmem:[%s12383_s0 + $0xd0] sm:$0xff]   ;;  %v9572_v36 = vld [vmem:[#allocation2 + $0xe8] sm:$0xff]  }
 0x592   :  { %v9070_v55 = vpop.f32.mrf.mxu0  ;;  %v5255_v0 = vmax.f32 %v5191_v42, 0.0 }
 0x593   :  { %v5126_v16 = vadd.f32 %v9142_v17, %v9070_v55  ;;  %9236 = vmatmul.mubr.msk.bf16.gmra.mxu1 %vm170_vm0, %v9663_v62  ;;  %v5193_v47 = vadd.f32 %v11475_v43, %v5115_v14  ;;  %v5259_v51 = vmax.f32 %v5195_v3, 0.0  ;;  %v5189_v17 = vadd.f32 %v11475_v43, %v5099_v8  ;;  %v9573_v55 = vld [vmem:[#allocation2 + $0xe0] sm:$0xff]   ;;  %v9567_v62 = vld [vmem:[#allocation2 + $0xd0] sm:$0xff]  }
 0x594   :  { %v4708_v23 = vpop.f32.mrf.mxu0  ;;  %9244 = vmatpush3.bf16.msra.mxu0 %v11821_v5  ;;  %9263 = vmatprep.mubr.msk.bf16.mxu1 %vm170_vm0, %v9664_v57  ;;  %v5254_v54 = vmax.f32 %v5190_v24, 0.0  ;;  %v11864_v14 = vpack.c.bf16 %v5256_v31, %v5255_v0  ;;  %v9569_v57 = vld [vmem:[#allocation2 + $0xc0] sm:$0xff]  }
 0x595   :  { %v5196_v50 = vadd.f32 %v11475_v43, %v5126_v16  ;;  %v5118_v12 = vadd.f32 %v5117_v30, %v4708_v23  ;;  %9245 = vmatprep.subr.bf16.mxu0 %v11830_v20  ;;  %v5257_v41 = vmax.f32 %v5193_v47, 0.0  ;;  %v5253_v11 = vmax.f32 %v5189_v17, 0.0  ;;  %v9566_v16 = vld [vmem:[#allocation2 + $0xd8] sm:$0xff]   ;;  %v9668_v30 = vld [vmem:[%s12383_s0 + $0xe8] sm:$0xff]  }
 0x596   :  { %v9568_v23 = vld [vmem:[#allocation2 + $0xc8] sm:$0xff]   ;;  %v9670_v47 = vld [vmem:[%s12383_s0 + $0xf8] sm:$0xff]  }
 0x597   :  { %v5260_v63 = vmax.f32 %v5196_v50, 0.0  ;;  %v5194_v61 = vadd.f32 %v11475_v43, %v5118_v12  ;;  %v9667_v43 = vld [vmem:[%s12383_s0 + $0xd8] sm:$0xff]   ;;  %v11872_v3 = vpack.c.bf16 %v5254_v54, %v5253_v11 }
 0x598   :  { %9246 = vmatpush3.bf16.msra.mxu0 %v11830_v20 }
 0x599   :  { %v5258_v10 = vmax.f32 %v5194_v61, 0.0  ;;  %v11847_v58 = vpack.c.bf16 %v5260_v63, %v5259_v51  ;;  %9271 = vmatprep.subr.bf16.mxu0 %v9570_v33 }
 0x59b   :  { %9248 = vmatmul.mubr.msk.bf16.vlgmr.msra.gmra.mxu0 %vm170_vm0, %v9665_v60  ;;  %9255 = vmatprep.subr.bf16.mxu1 %v11847_v58  ;;  %v11855_v44 = vpack.c.bf16 %v5258_v10, %v5257_v41 }
 0x59c   :  { %9256 = vmatpush3.bf16.msra.mxu1 %v11847_v58  ;;  %9251 = vmatprep.mubr.msk.bf16.mxu0 %vm170_vm0, %v9666_v48 }
 0x59d   :  { %9257 = vmatprep.subr.bf16.mxu1 %v11855_v44  ;;  %9272 = vmatpush3.bf16.msra.mxu0 %v9570_v33 }
 0x59e   :  { %9273 = vmatprep.subr.bf16.mxu0 %v9571_v27 }
 0x5a0   :  { %9258 = vmatpush3.bf16.msra.mxu1 %v11855_v44 }
 0x5a1   :  { %9259 = vmatprep.subr.bf16.mxu1 %v11864_v14  ;;  %9274 = vmatpush3.bf16.msra.mxu0 %v9571_v27 }
 0x5a2   :  { %9275 = vmatprep.subr.bf16.mxu0 %v9572_v36 }
 0x5a3   :  { %9252 = vmatmul.mubr.msk.bf16.gmra.mxu0 %vm170_vm0, %v9667_v43 }
 0x5a4   :  { %9260 = vmatpush3.bf16.msra.mxu1 %v11864_v14 }
 0x5a5   :  { %9261 = vmatprep.subr.bf16.mxu1 %v11872_v3  ;;  %9276 = vmatpush3.bf16.msra.mxu0 %v9572_v36 }
 0x5a6   :  { %9277 = vmatprep.subr.bf16.mxu0 %v9573_v55 }
 0x5a8   :  { %9262 = vmatpush3.bf16.msra.mxu1 %v11872_v3 }
 0x5a9   :  { %9343 = vmatprep.subr.bf16.mxu1 %v9566_v16  ;;  %9278 = vmatpush3.bf16.msra.mxu0 %v9573_v55 }
 0x5ab   :  { %9264 = vmatmul.mubr.msk.bf16.vlgmr.msra.gmra.mxu1 %vm170_vm0, %v9668_v30 }
 0x5ac   :  { %9344 = vmatpush3.bf16.msra.mxu1 %v9566_v16  ;;  %9267 = vmatprep.mubr.msk.bf16.mxu1 %vm170_vm0, %v9669_v52 }
 0x5ad   :  { %9345 = vmatprep.subr.bf16.mxu1 %v9567_v62 }
 0x5b0   :  { %9346 = vmatpush3.bf16.msra.mxu1 %v9567_v62 }
 0x5b1   :  { %9347 = vmatprep.subr.bf16.mxu1 %v9568_v23 }
 0x5b3   :  { %9268 = vmatmul.mubr.msk.bf16.gmra.mxu1 %vm170_vm0, %v9670_v47 }
 0x5b4   :  { %9348 = vmatpush3.bf16.msra.mxu1 %v9568_v23  ;;  %9351 = vmatprep.mubr.msk.bf16.mxu1 %vm170_vm0, %v11510_v1 }
 0x5b5   :  { %9349 = vmatprep.subr.bf16.mxu1 %v9569_v57 }
 0x5b8   :  { %9350 = vmatpush3.bf16.msra.mxu1 %v9569_v57 }
 0x5bb   :  { %9352 = vmatmul.mubr.msk.bf16.vlgmr.msra.gmra.mxu1 %vm170_vm0, %v11500_v21 }
 0x5bc   :  { %9355 = vmatprep.mubr.msk.bf16.mxu1 %vm170_vm0, %v11492_v19 }
 0x5c3   :  { %9356 = vmatmul.mubr.msk.bf16.gmra.mxu1 %vm170_vm0, %v11488_v45 }
 0x5c4   :  { %9359 = vmatprep.mubr.msk.bf16.mxu1 %vm170_vm0, %v11562_v26 }
 0x5cb   :  { %9360 = vmatmul.mubr.msk.bf16.gmra.mxu1 %vm170_vm0, %v11548_v53 }
 0x5cc   :  { %9363 = vmatprep.mubr.msk.bf16.mxu1 %vm170_vm0, %v11536_v40 }
 0x5d3   :  { %9364 = vmatmul.mubr.msk.bf16.gmra.mxu1 %vm170_vm0, %v11528_v32 }
 0x5d4   :  { %9367 = vmatprep.mubr.msk.bf16.mxu1 %vm170_vm0, %v11618_v29 }
 0x5db   :  { %9368 = vmatmul.mubr.msk.bf16.gmra.mxu1 %vm170_vm0, %v11604_v25 }
 0x5dc   :  { %9371 = vmatprep.mubr.msk.bf16.mxu1 %vm170_vm0, %v11592_v46 }
 0x5e3   :  { %9372 = vmatmul.mubr.msk.bf16.gmra.mxu1 %vm170_vm0, %v11584_v7 }
 0x5e4   :  { %9375 = vmatprep.mubr.msk.bf16.mxu1 %vm170_vm0, %v11674_v13 }
 0x5eb   :  { %9376 = vmatmul.mubr.msk.bf16.gmra.mxu1 %vm170_vm0, %v11660_v2 }
 0x5ec   :  { %9379 = vmatprep.mubr.msk.bf16.mxu1 %vm170_vm0, %v11648_v34 }
 0x5f3   :  { %9380 = vmatmul.mubr.msk.bf16.gmra.mxu1 %vm170_vm0, %v11640_v4 }
 0x5f4   :  { %9383 = vmatprep.mubr.msk.bf16.mxu1 %vm170_vm0, %v11730_v9 }
 0x5fb   :  { %v9153_v45 = vpop.f32.mrf.mxu0  ;;  %9384 = vmatmul.mubr.msk.bf16.gmra.mxu1 %vm170_vm0, %v11716_v39 }
 0x5fc   :  { %9387 = vmatprep.mubr.msk.bf16.mxu1 %vm170_vm0, %v11704_v37 }
 0x5fd   :  { %v5327_v19 = vpop.f32.mrf.mxu0 }
 0x5ff   :  { %v9154_v21 = vpop.f32.mrf.mxu0 }
 0x600   :  { %v5814_v40 = vpack.c.bf16 %v9154_v21, %v9153_v45 }
 0x601   :  { %v5330_v1 = vpop.f32.mrf.mxu0 }
 0x602   :  { %v5813_v32 = vpack.c.bf16 %v5330_v1, %v5327_v19 }
 0x603   :  { %v9157_v53 = vpop.f32.mrf.mxu0  ;;  %9388 = vmatmul.mubr.msk.bf16.gmra.mxu1 %vm170_vm0, %v11696_v22 }
 0x604   :  { %9279 = vmatprep.mubr.msk.bf16.mxu0 %vm170_vm0, %v5813_v32  ;;  %9391 = vmatprep.mubr.msk.bf16.mxu1 %vm170_vm0, %v11784_v35 }
 0x605   :  { %v5343_v26 = vpop.f32.mrf.mxu0  ;;  %9280 = vmatmul.mubr.msk.bf16.vlgmr.msra.gmra.mxu0 %vm170_vm0, %v5814_v40 }
 0x607   :  { %v9158_v7 = vpop.f32.mrf.mxu0 }
 0x608   :  { %v5816_v29 = vpack.c.bf16 %v9158_v7, %v9157_v53 }
 0x609   :  { %v5346_v46 = vpop.f32.mrf.mxu0 }
 0x60a   :  { %v5815_v25 = vpack.c.bf16 %v5346_v46, %v5343_v26 }
 0x60b   :  { %v9169_v4 = vpop.f32.mrf.mxu1  ;;  %9392 = vmatmul.mubr.msk.bf16.gmra.mxu1 %vm170_vm0, %v11772_v38 }
 0x60c   :  { %9283 = vmatprep.mubr.msk.bf16.mxu0 %vm170_vm0, %v5815_v25  ;;  %9395 = vmatprep.mubr.msk.bf16.mxu1 %vm170_vm0, %v11760_v28 }
 0x60d   :  { %v5392_v34 = vpop.f32.mrf.mxu1  ;;  %9284 = vmatmul.mubr.msk.bf16.gmra.mxu0 %vm170_vm0, %v5816_v29 }
 0x60f   :  { %v9170_v2 = vpop.f32.mrf.mxu1 }
 0x610   :  { %v5818_v37 = vpack.c.bf16 %v9170_v2, %v9169_v4 }
 0x611   :  { %v5395_v13 = vpop.f32.mrf.mxu1 }
 0x612   :  { %v5817_v22 = vpack.c.bf16 %v5395_v13, %v5392_v34 }
 0x613   :  { %v9173_v39 = vpop.f32.mrf.mxu1  ;;  %9396 = vmatmul.mubr.msk.bf16.gmra.mxu1 %vm170_vm0, %v11752_v49 }
 0x614   :  { %9287 = vmatprep.mubr.msk.bf16.mxu0 %vm170_vm0, %v5817_v22  ;;  %9399 = vmatprep.mubr.msk.bf16.mxu1 %vm170_vm0, %v11830_v20 }
 0x615   :  { %v5408_v9 = vpop.f32.mrf.mxu1  ;;  %9288 = vmatmul.mubr.msk.bf16.gmra.mxu0 %vm170_vm0, %v5818_v37 }
 0x617   :  { %v9174_v28 = vpop.f32.mrf.mxu1 }
 0x618   :  { %v5820_v50 = vpack.c.bf16 %v9174_v28, %v9173_v39 }
 0x619   :  { %v5411_v38 = vpop.f32.mrf.mxu1 }
 0x61a   :  { %v5819_v35 = vpack.c.bf16 %v5411_v38, %v5408_v9 }
 0x61b   :  { %v9185_v12 = vpop.f32.mrf.mxu0  ;;  %9400 = vmatmul.mubr.msk.bf16.gmra.mxu1 %vm170_vm0, %v11821_v5 }
 0x61c   :  { %9291 = vmatprep.mubr.msk.bf16.mxu0 %vm170_vm0, %v5819_v35  ;;  %9403 = vmatprep.mubr.msk.bf16.mxu1 %vm170_vm0, %v11812_v59 }
 0x61d   :  { %v5457_v49 = vpop.f32.mrf.mxu0  ;;  %9292 = vmatmul.mubr.msk.bf16.gmra.mxu0 %vm170_vm0, %v5820_v50 }
 0x61f   :  { %v9186_v20 = vpop.f32.mrf.mxu0 }
 0x620   :  { %v5822_v56 = vpack.c.bf16 %v9186_v20, %v9185_v12 }
 0x621   :  { %v5460_v33 = vpop.f32.mrf.mxu0 }
 0x622   :  { %v5821_v18 = vpack.c.bf16 %v5460_v33, %v5457_v49 }
 0x623   :  { %v9189_v51 = vpop.f32.mrf.mxu0  ;;  %9404 = vmatmul.mubr.msk.bf16.gmra.mxu1 %vm170_vm0, %v11804_v15 }
 0x624   :  { %9295 = vmatprep.mubr.msk.bf16.mxu0 %vm170_vm0, %v5821_v18  ;;  %9407 = vmatprep.mubr.msk.bf16.mxu1 %vm170_vm0, %v11872_v3 }
 0x625   :  { %v5473_v5 = vpop.f32.mrf.mxu0  ;;  %9296 = vmatmul.mubr.msk.bf16.gmra.mxu0 %vm170_vm0, %v5822_v56 }
 0x627   :  { %v9190_v59 = vpop.f32.mrf.mxu0 }
 0x628   :  { %v5824_v42 = vpack.c.bf16 %v9190_v59, %v9189_v51 }
 0x629   :  { %v5476_v63 = vpop.f32.mrf.mxu0 }
 0x62a   :  { %v5823_v61 = vpack.c.bf16 %v5476_v63, %v5473_v5 }
 0x62b   :  { %v9201_v8 = vpop.f32.mrf.mxu1  ;;  %9408 = vmatmul.mubr.msk.bf16.gmra.mxu1 %vm170_vm0, %v11864_v14 }
 0x62c   :  { %9299 = vmatprep.mubr.msk.bf16.mxu0 %vm170_vm0, %v5823_v61  ;;  %9411 = vmatprep.mubr.msk.bf16.mxu1 %vm170_vm0, %v11855_v44 }
 0x62d   :  { %v5522_v15 = vpop.f32.mrf.mxu1  ;;  %9300 = vmatmul.mubr.msk.bf16.gmra.mxu0 %vm170_vm0, %v5824_v42 }
 0x62f   :  { %v9202_v41 = vpop.f32.mrf.mxu1 }
 0x630   :  { %v5826_v31 = vpack.c.bf16 %v9202_v41, %v9201_v8 }
 0x631   :  { %v5525_v10 = vpop.f32.mrf.mxu1 }
 0x632   :  { %v5825_v27 = vpack.c.bf16 %v5525_v10, %v5522_v15 }
 0x633   :  { %v9205_v24 = vpop.f32.mrf.mxu1  ;;  %9412 = vmatmul.mubr.msk.bf16.gmra.mxu1 %vm170_vm0, %v11847_v58 }
 0x634   :  { %9303 = vmatprep.mubr.msk.bf16.mxu0 %vm170_vm0, %v5825_v27 }
 0x635   :  { %v5538_v60 = vpop.f32.mrf.mxu1  ;;  %9304 = vmatmul.mubr.msk.bf16.gmra.mxu0 %vm170_vm0, %v5826_v31 }
 0x637   :  { %v9206_v48 = vpop.f32.mrf.mxu1 }
 0x638   :  { %v5828_v44 = vpack.c.bf16 %v9206_v48, %v9205_v24 }
 0x639   :  { %v5541_v0 = vpop.f32.mrf.mxu1 }
 0x63a   :  { %v5827_v17 = vpack.c.bf16 %v5541_v0, %v5538_v60 }
 0x63b   :  { %v9217_v36 = vpop.f32.mrf.mxu0 }
 0x63c   :  { %9307 = vmatprep.mubr.msk.bf16.mxu0 %vm170_vm0, %v5827_v17 }
 0x63d   :  { %v5587_v54 = vpop.f32.mrf.mxu0  ;;  %9308 = vmatmul.mubr.msk.bf16.gmra.mxu0 %vm170_vm0, %v5828_v44 }
 0x63f   :  { %v9218_v14 = vpop.f32.mrf.mxu0 }
 0x640   :  { %v5830_v43 = vpack.c.bf16 %v9218_v14, %v9217_v36 }
 0x641   :  { %v5590_v11 = vpop.f32.mrf.mxu0 }
 0x642   :  { %v5829_v55 = vpack.c.bf16 %v5590_v11, %v5587_v54 }
 0x643   :  { %v9221_v58 = vpop.f32.mrf.mxu0 }
 0x644   :  { %9311 = vmatprep.mubr.msk.bf16.mxu0 %vm170_vm0, %v5829_v55 }
 0x645   :  { %v5603_v3 = vpop.f32.mrf.mxu0  ;;  %9312 = vmatmul.mubr.msk.bf16.gmra.mxu0 %vm170_vm0, %v5830_v43 }
 0x647   :  { %v9222_v16 = vpop.f32.mrf.mxu0 }
 0x648   :  { %v5832_v52 = vpack.c.bf16 %v9222_v16, %v9221_v58 }
 0x649   :  { %v5606_v62 = vpop.f32.mrf.mxu0 }
 0x64a   :  { %v5831_v30 = vpack.c.bf16 %v5606_v62, %v5603_v3 }
 0x64b   :  { %v9233_v23 = vpop.f32.mrf.mxu1 }
 0x64c   :  { %9315 = vmatprep.mubr.msk.bf16.mxu0 %vm170_vm0, %v5831_v30 }
 0x64d   :  { %v5652_v57 = vpop.f32.mrf.mxu1  ;;  %9316 = vmatmul.mubr.msk.bf16.gmra.mxu0 %vm170_vm0, %v5832_v52 }
 0x64f   :  { %v9234_v47 = vpop.f32.mrf.mxu1 }
 0x650   :  { %v5834_v21 = vpack.c.bf16 %v9234_v47, %v9233_v23 }
 0x651   :  { %v5655_v45 = vpop.f32.mrf.mxu1 }
 0x652   :  { %v5833_v19 = vpack.c.bf16 %v5655_v45, %v5652_v57 }
 0x653   :  { %v9237_v1 = vpop.f32.mrf.mxu1 }
 0x654   :  { %9319 = vmatprep.mubr.msk.bf16.mxu0 %vm170_vm0, %v5833_v19 }
 0x655   :  { %v5668_v32 = vpop.f32.mrf.mxu1  ;;  %9320 = vmatmul.mubr.msk.bf16.gmra.mxu0 %vm170_vm0, %v5834_v21 }
 0x657   :  { %v9238_v40 = vpop.f32.mrf.mxu1 }
 0x658   :  { %v5836_v7 = vpack.c.bf16 %v9238_v40, %v9237_v1 }
 0x659   :  { %v5671_v53 = vpop.f32.mrf.mxu1 }
 0x65a   :  { %v5835_v26 = vpack.c.bf16 %v5671_v53, %v5668_v32 }
 0x65b   :  { %v9249_v46 = vpop.f32.mrf.mxu0 }
 0x65c   :  { %9323 = vmatprep.mubr.msk.bf16.mxu0 %vm170_vm0, %v5835_v26 }
 0x65d   :  { %v5717_v25 = vpop.f32.mrf.mxu0  ;;  %9324 = vmatmul.mubr.msk.bf16.gmra.mxu0 %vm170_vm0, %v5836_v7 }
 0x65f   :  { %v9250_v29 = vpop.f32.mrf.mxu0 }
 0x660   :  { %v5838_v2 = vpack.c.bf16 %v9250_v29, %v9249_v46 }
 0x661   :  { %v5720_v4 = vpop.f32.mrf.mxu0 }
 0x662   :  { %v5837_v34 = vpack.c.bf16 %v5720_v4, %v5717_v25 }
 0x663   :  { %v9253_v13 = vpop.f32.mrf.mxu0 }
 0x664   :  { %9327 = vmatprep.mubr.msk.bf16.mxu0 %vm170_vm0, %v5837_v34 }
 0x665   :  { %v5733_v22 = vpop.f32.mrf.mxu0  ;;  %9328 = vmatmul.mubr.msk.bf16.gmra.mxu0 %vm170_vm0, %v5838_v2 }
 0x667   :  { %v9254_v37 = vpop.f32.mrf.mxu0 }
 0x668   :  { %v5840_v28 = vpack.c.bf16 %v9254_v37, %v9253_v13 }
 0x669   :  { %v5736_v39 = vpop.f32.mrf.mxu0 }
 0x66a   :  { %v5839_v9 = vpack.c.bf16 %v5736_v39, %v5733_v22 }
 0x66b   :  { %v9265_v38 = vpop.f32.mrf.mxu1 }
 0x66c   :  { %9331 = vmatprep.mubr.msk.bf16.mxu0 %vm170_vm0, %v5839_v9 }
 0x66d   :  { %v5782_v35 = vpop.f32.mrf.mxu1  ;;  %9332 = vmatmul.mubr.msk.bf16.gmra.mxu0 %vm170_vm0, %v5840_v28 }
 0x66f   :  { %v9266_v50 = vpop.f32.mrf.mxu1 }
 0x670   :  { %v5842_v20 = vpack.c.bf16 %v9266_v50, %v9265_v38 }
 0x671   :  { %v5785_v12 = vpop.f32.mrf.mxu1 }
 0x672   :  { %v5841_v49 = vpack.c.bf16 %v5785_v12, %v5782_v35 }
 0x673   :  { %v9269_v33 = vpop.f32.mrf.mxu1 }
 0x674   :  { %9335 = vmatprep.mubr.msk.bf16.mxu0 %vm170_vm0, %v5841_v49 }
 0x675   :  { %v5798_v18 = vpop.f32.mrf.mxu1  ;;  %9336 = vmatmul.mubr.msk.bf16.gmra.mxu0 %vm170_vm0, %v5842_v20 }
 0x677   :  { %v9270_v56 = vpop.f32.mrf.mxu1 }
 0x678   :  { %v5844_v59 = vpack.c.bf16 %v9270_v56, %v9269_v33  ;;  %v6814_v33 = vld [vmem:[%s12385_s2 + $0x8] sm:$0xff]  ;;  %v6816_v56 = vld [vmem:[%s12385_s2 + $0x18] sm:$0xff] }
 0x679   :  { %v5801_v51 = vpop.f32.mrf.mxu1  ;;  %6951 = vmatprep.mubr.f32.mxu1 %v6816_v56 }
 0x67a   :  { %v5843_v5 = vpack.c.bf16 %v5801_v51, %v5798_v18 }
 0x67b   :  { %v11983_v63 = vpop.f32.mrf.mxu1 }
 0x67c   :  { %12395 = vst [vmem:[#allocation12_spill] sm:$0xff] %v11983_v63  ;;  %9339 = vmatprep.mubr.msk.bf16.mxu0 %vm170_vm0, %v5843_v5 }
 0x67d   :  { %9340 = vmatmul.mubr.msk.bf16.gmra.mxu0 %vm170_vm0, %v5844_v59  ;;  %v11987_v61 = vpop.f32.mrf.mxu1 }
 0x67e   :  { %12396 = vst [vmem:[#allocation13_spill] sm:$0xff] %v11987_v61  ;;  %6881 = vmatprep.mubr.f32.mxu0 %v6814_v33 }
 0x67f   :  { %v11989_v42 = vpop.f32.mrf.mxu1 }
 0x681   :  { %v11991_v8 = vpop.f32.mrf.mxu1 }
 0x682   :  { %12397 = vst [vmem:[#allocation14_spill] sm:$0xff] %v11991_v8 }
 0x683   :  { %v11993_v15 = vpop.f32.mrf.mxu1 }
 0x685   :  { %v11995_v41 = vpop.f32.mrf.mxu1 }
 0x687   :  { %v9358_v10 = vpop.f32.mrf.mxu1 }
 0x689   :  { %v11997_v27 = vpop.f32.mrf.mxu1 }
 0x68b   :  { %v11999_v31 = vpop.f32.mrf.mxu1 }
 0x68d   :  { %v12001_v24 = vpop.f32.mrf.mxu1 }
 0x68f   :  { %v12003_v60 = vpop.f32.mrf.mxu1 }
 0x691   :  { %v12005_v48 = vpop.f32.mrf.mxu1 }
 0x693   :  { %v12007_v0 = vpop.f32.mrf.mxu1 }
 0x695   :  { %v12009_v17 = vpop.f32.mrf.mxu1 }
 0x697   :  { %v12011_v44 = vpop.f32.mrf.mxu1 }
 0x699   :  { %v12013_v36 = vpop.f32.mrf.mxu1 }
 0x69b   :  { %v12015_v54 = vpop.f32.mrf.mxu1 }
 0x69d   :  { %v12017_v14 = vpop.f32.mrf.mxu1 }
 0x69e   :  { %12398 = vst [vmem:[#allocation15_spill] sm:$0xff] %v12017_v14 }
 0x69f   :  { %v12019_v11 = vpop.f32.mrf.mxu1 }
 0x6a1   :  { %v12021_v55 = vpop.f32.mrf.mxu1 }
 0x6a2   :  { %12399 = vst [vmem:[#allocation16_spill] sm:$0xff] %v12021_v55 }
 0x6a3   :  { %v12023_v43 = vpop.f32.mrf.mxu1 }
 0x6a5   :  { %v12025_v58 = vpop.f32.mrf.mxu1 }
 0x6a7   :  { %v12027_v3 = vpop.f32.mrf.mxu1 }
 0x6a9   :  { %v12029_v16 = vpop.f32.mrf.mxu1 }
 0x6ab   :  { %v12031_v62 = vpop.f32.mrf.mxu1 }
 0x6ad   :  { %v12033_v30 = vpop.f32.mrf.mxu1 }
 0x6af   :  { %v12035_v52 = vpop.f32.mrf.mxu1 }
 0x6b1   :  { %v12037_v23 = vpop.f32.mrf.mxu1 }
 0x6b3   :  { %v9381_v57 = vpop.f32.mrf.mxu1 }
 0x6b5   :  { %v12039_v47 = vpop.f32.mrf.mxu1 }
 0x6b7   :  { %v9382_v45 = vpop.f32.mrf.mxu1 }
 0x6b9   :  { %v12041_v19 = vpop.f32.mrf.mxu1 }
 0x6bb   :  { %v12045_v1 = vpop.f32.mrf.mxu1 }
 0x6bc   :  { %12400 = vst [vmem:[#allocation17_spill] sm:$0xff] %v12045_v1 }
 0x6bd   :  { %v12051_v53 = vpop.f32.mrf.mxu1 }
 0x6be   :  { %12402 = vst [vmem:[#allocation19_spill] sm:$0xff] %v12051_v53 }
 0x6bf   :  { %v12057_v46 = vpop.f32.mrf.mxu1 }
 0x6c0   :  { %12404 = vst [vmem:[#allocation21_spill] sm:$0xff] %v12057_v46 }
 0x6c1   :  { %v12063_v34 = vpop.f32.mrf.mxu1 }
 0x6c2   :  { %12405 = vst [vmem:[#allocation22_spill] sm:$0xff] %v12063_v34 }
 0x6c3   :  { %v12069_v22 = vpop.f32.mrf.mxu1 }
 0x6c4   :  { %12406 = vst [vmem:[#allocation23_spill] sm:$0xff] %v12069_v22 }
 0x6c5   :  { %v12043_v21 = vpop.f32.mrf.mxu0  ;;  %v12073_v9 = vpop.f32.mrf.mxu1 }
 0x6c6   :  { %12407 = vst [vmem:[#allocation24_spill] sm:$0xff] %v12073_v9 }
 0x6c7   :  { %v12047_v32 = vpop.f32.mrf.mxu0  ;;  %v12077_v35 = vpop.f32.mrf.mxu1 }
 0x6c8   :  { %12401 = vst [vmem:[#allocation18_spill] sm:$0xff] %v12047_v32  ;;  %v6683_v32 = vsub.s32 3, %v10308_v6 }
 0x6c9   :  { %v12049_v40 = vpop.f32.mrf.mxu0  ;;  %v12079_v49 = vpop.f32.mrf.mxu1 }
 0x6ca   :  { %12408 = vst [vmem:[#allocation25_spill] sm:$0xff] %v12079_v49 }
 0x6cb   :  { %v12053_v26 = vpop.f32.mrf.mxu0  ;;  %v12089_v51 = vpop.f32.mrf.mxu1 }
 0x6cc   :  { %12403 = vst [vmem:[#allocation20_spill] sm:$0xff] %v12053_v26  ;;  %12409 = vst [vmem:[#allocation26_spill] sm:$0xff] %v12089_v51 }
 0x6cd   :  { %v12055_v7 = vpop.f32.mrf.mxu0 }
 0x6cf   :  { %v12059_v25 = vpop.f32.mrf.mxu0 }
 0x6d1   :  { %v9286_v29 = vpop.f32.mrf.mxu0 }
 0x6d2   :  { %v12061_v4 = vadd.f32 %v9358_v10, %v9286_v29  ;;  %v12095_v10 = vpop.f32.mrf.mxu1 }
 0x6d3   :  { %v12065_v2 = vpop.f32.mrf.mxu0  ;;  %12411 = vst [vmem:[#allocation28_spill] sm:$0xff] %v12095_v10 }
 0x6d4   :  { %v12101_v34 = vpop.f32.mrf.mxu1 }
 0x6d5   :  { %v12067_v13 = vpop.f32.mrf.mxu0  ;;  %12413 = vst [vmem:[#allocation30_spill] sm:$0xff] %v12101_v34 }
 0x6d6   :  { %v12107_v46 = vpop.f32.mrf.mxu1 }
 0x6d7   :  { %v12071_v37 = vpop.f32.mrf.mxu0  ;;  %12414 = vst [vmem:[#allocation31_spill] sm:$0xff] %v12107_v46  ;;  %v12122_v46 = vld [vmem:[%s12388_s5] sm:$0xff] }
 0x6d8   :  { %v12111_v56 = vpop.f32.mrf.mxu1  ;;  %12418 = vst [vmem:[#allocation35_spill] sm:$0xff] %v12122_v46 }
 0x6d9   :  { %v9290_v39 = vpop.f32.mrf.mxu0  ;;  %12415 = vst [vmem:[#allocation32_spill] sm:$0xff] %v12111_v56  ;;  %v12125_v56 = vrot.slane %v12122_v46, %v6683_v32 }
 0x6da   :  { %v12113_v10 = vpop.f32.mrf.mxu1 }
 0x6db   :  { %v12075_v28 = vpop.f32.mrf.mxu0  ;;  %12416 = vst [vmem:[#allocation33_spill] sm:$0xff] %v12113_v10 }
 0x6dc   :  { %v12116_v34 = vpop.f32.mrf.mxu1 }
 0x6dd   :  { %v9293_v38 = vpop.f32.mrf.mxu0  ;;  %12417 = vst [vmem:[#allocation34_spill] sm:$0xff] %v12116_v34 }
 0x6de   :  { %v6483_v10 = vadd.f32 %v12007_v0, %v9293_v38  ;;  %v12128_v6 = vpop.f32.mrf.mxu1 }
 0x6df   :  { %v6065_v50 = vpop.f32.mrf.mxu0 }
 0x6e0   :  { %v6699_v46 = vadd.f32 %v12125_v56, %v6483_v10  ;;  %v6475_v0 = vadd.f32 %v12009_v17, %v6065_v50 }
 0x6e1   :  { %v9294_v12 = vpop.f32.mrf.mxu0 }
 0x6e2   :  { %v6697_v50 = vadd.f32 %v12125_v56, %v6475_v0 }
 0x6e3   :  { %v6068_v20 = vpop.f32.mrf.mxu0 }
 0x6e5   :  { %v12084_v18 = vpop.f32.mrf.mxu0 }
 0x6e7   :  { %v12091_v5 = vpop.f32.mrf.mxu0 }
 0x6e8   :  { %12410 = vst [vmem:[#allocation27_spill] sm:$0xff] %v12091_v5  ;;  %v6486_v5 = vadd.f32 %v12011_v44, %v9294_v12  ;;  %v6478_v44 = vadd.f32 %v12013_v36, %v6068_v20  ;;  %v6470_v20 = vadd.f32 %v12003_v60, %v9290_v39 }
 0x6e9   :  { %v12093_v59 = vpop.f32.mrf.mxu0 }
 0x6ea   :  { %v6700_v34 = vadd.f32 %v12125_v56, %v6486_v5 }
 0x6eb   :  { %v12097_v29 = vpop.f32.mrf.mxu0 }
 0x6ec   :  { %12412 = vst [vmem:[#allocation29_spill] sm:$0xff] %v12097_v29 }
 0x6ed   :  { %v12099_v53 = vpop.f32.mrf.mxu0 }
 0x6ef   :  { %v12103_v33 = vpop.f32.mrf.mxu0 }
 0x6f1   :  { %v12105_v1 = vpop.f32.mrf.mxu0 }
 0x6f3   :  { %v12109_v9 = vpop.f32.mrf.mxu0 }
 0x6f5   :  { %v9305_v49 = vpop.f32.mrf.mxu0 }
 0x6f7   :  { %v6113_v22 = vpop.f32.mrf.mxu0 }
 0x6f9   :  { %v9306_v51 = vpop.f32.mrf.mxu0 }
 0x6fb   :  { %v6116_v61 = vpop.f32.mrf.mxu0 }
 0x6fc   :  { %v6526_v39 = vadd.f32 %v12037_v23, %v6116_v61  ;;  %v6459_v23 = vadd.f32 %v12001_v24, %v12071_v37  ;;  %v6515_v24 = vadd.f32 %v12023_v43, %v12099_v53  ;;  %v6692_v53 = vadd.f32 %v12125_v56, %v12061_v4 }
 0x6fd   :  { %v9309_v14 = vpop.f32.mrf.mxu0  ;;  %v6443_v4 = vadd.f32 %v11995_v41, %v12059_v25  ;;  %v6499_v25 = vadd.f32 %v12015_v54, %v12084_v18  ;;  %v12422_v18 = vld [vmem:[#allocation20_spill] sm:$0xff] }
 0x6fe   :  { %v6547_v26 = vadd.f32 %v9381_v57, %v9309_v14 }
 0x6ff   :  { %v6129_v8 = vpop.f32.mrf.mxu0 }
 0x700   :  { %v6715_v14 = vadd.f32 %v12125_v56, %v6547_v26  ;;  %v6539_v57 = vadd.f32 %v12039_v47, %v6129_v8  ;;  %v12143_v26 = vpop.f32.mrf.mxu1  ;;  %v6764_v8 = vmax.f32 %v6700_v34, 0.0  ;;  %v6698_v47 = vadd.f32 %v12125_v56, %v6478_v44 }
 0x701   :  { %v9310_v55 = vpop.f32.mrf.mxu0  ;;  %v6523_v44 = vadd.f32 %v12033_v30, %v6113_v22 }
 0x702   :  { %v6550_v29 = vadd.f32 %v9382_v45, %v9310_v55  ;;  %v6534_v45 = vadd.f32 %v12035_v52, %v9306_v51  ;;  %v6779_v10 = vmax.f32 %v6715_v14, 0.0  ;;  %v6713_v17 = vadd.f32 %v12125_v56, %v6539_v57 }
 0x703   :  { %v6132_v12 = vpop.f32.mrf.mxu0  ;;  %v6763_v52 = vmax.f32 %v6699_v46, 0.0  ;;  %v6761_v14 = vmax.f32 %v6697_v50, 0.0 }
 0x704   :  { %v6716_v63 = vadd.f32 %v12125_v56, %v6550_v29  ;;  %v6542_v32 = vadd.f32 %v12041_v19, %v6132_v12  ;;  %v6531_v19 = vadd.f32 %v12031_v62, %v9305_v49  ;;  %v6712_v34 = vadd.f32 %v12125_v56, %v6534_v45  ;;  %v12160_v29 = vpop.f32.mrf.mxu1 }
 0x705   :  { %v12138_v55 = vpop.f32.mrf.mxu0  ;;  %v6696_v62 = vadd.f32 %v12125_v56, %v6470_v20  ;;  %v6462_v49 = vadd.f32 %v12005_v48, %v12075_v28  ;;  %v6777_v12 = vmax.f32 %v6713_v17, 0.0  ;;  %v6518_v48 = vadd.f32 %v12027_v3, %v12105_v1 }
 0x706   :  { %v6780_v38 = vmax.f32 %v6716_v63, 0.0  ;;  %v6714_v36 = vadd.f32 %v12125_v56, %v6542_v32  ;;  %v6467_v63 = vadd.f32 %v11999_v31, %v12067_v13  ;;  %v6762_v31 = vmax.f32 %v6698_v47, 0.0  ;;  %v12175_v22 = vpop.f32.mrf.mxu1 }
 0x707   :  { %v12146_v5 = vpop.f32.mrf.mxu0  ;;  %v6711_v13 = vadd.f32 %v12125_v56, %v6531_v19  ;;  %v6776_v28 = vmax.f32 %v6712_v34, 0.0  ;;  %v6710_v32 = vadd.f32 %v12125_v56, %v6526_v39  ;;  %v6760_v0 = vmax.f32 %v6696_v62, 0.0 }
 0x708   :  { %8231 = vmatprep.subr.mxu0 %v6780_v38  ;;  %v6778_v51 = vmax.f32 %v6714_v36, 0.0  ;;  %v6695_v61 = vadd.f32 %v12125_v56, %v6467_v63  ;;  %v6694_v30 = vadd.f32 %v12125_v56, %v6462_v49  ;;  %v6709_v38 = vadd.f32 %v12125_v56, %v6523_v44  ;;  %v12420_v44 = vld [vmem:[#allocation29_spill] sm:$0xff] }
 0x709   :  { %v12153_v60 = vpop.f32.mrf.mxu0  ;;  %8232 = vmatpush3.msra.mxu0 %v6764_v8  ;;  %v6775_v37 = vmax.f32 %v6711_v13, 0.0  ;;  %v6451_v3 = vadd.f32 %v11993_v15, %v12055_v7  ;;  %v6693_v36 = vadd.f32 %v12125_v56, %v6459_v23  ;;  %v6708_v8 = vadd.f32 %v12125_v56, %v6518_v48 }
 0x70a   :  { %8233 = vmatprep.subr.mxu0 %v6779_v10  ;;  %v6759_v1 = vmax.f32 %v6695_v61, 0.0  ;;  %v6510_v47 = vadd.f32 %v12029_v16, %v12109_v9  ;;  %v6774_v19 = vmax.f32 %v6710_v32, 0.0  ;;  %v6446_v15 = vadd.f32 %v11997_v27, %v12065_v2  ;;  %v12195_v10 = vpop.f32.mrf.mxu1 }
 0x70b   :  { %v12162_v46 = vpop.f32.mrf.mxu0  ;;  %8234 = vmatpush3.msra.mxu0 %v6763_v52  ;;  %v6758_v7 = vmax.f32 %v6694_v30, 0.0  ;;  %v6707_v63 = vadd.f32 %v12125_v56, %v6515_v24  ;;  %v6507_v16 = vadd.f32 %v12025_v58, %v12103_v33  ;;  %v6773_v9 = vmax.f32 %v6709_v38, 0.0  ;;  %v12424_v30 = vld [vmem:[#allocation27_spill] sm:$0xff] }
 0x70c   :  { %8235 = vmatprep.subr.mxu0 %v6778_v51  ;;  %v6757_v52 = vmax.f32 %v6693_v36, 0.0  ;;  %v6502_v2 = vadd.f32 %v12019_v11, %v12093_v59  ;;  %v6772_v50 = vmax.f32 %v6708_v8, 0.0  ;;  %v6706_v34 = vadd.f32 %v12125_v56, %v6510_v47  ;;  %v12213_v51 = vpop.f32.mrf.mxu1  ;;  %v12419_v59 = vld [vmem:[#allocation12_spill] sm:$0xff]  ;;  %v12425_v24 = vld [vmem:[#allocation15_spill] sm:$0xff]  ;;  %v12427_v36 = vld [vmem:[#allocation13_spill] sm:$0xff] }
 0x70d   :  { %v12169_v57 = vpop.f32.mrf.mxu0  ;;  %8236 = vmatpush3.msra.mxu0 %v6762_v31  ;;  %v6438_v58 = vadd.f32 %v11989_v42, %v12049_v40  ;;  %v6756_v33 = vmax.f32 %v6692_v53, 0.0  ;;  %v6690_v39 = vadd.f32 %v12125_v56, %v6446_v15  ;;  %v6771_v62 = vmax.f32 %v6707_v63, 0.0 }
 0x70e   :  { %8237 = vmatprep.subr.mxu0 %v6777_v12  ;;  %v6705_v11 = vadd.f32 %v12125_v56, %v6507_v16  ;;  %v6435_v49 = vadd.f32 %v12419_v59, %v12043_v21  ;;  %v6689_v42 = vadd.f32 %v12125_v56, %v6443_v4  ;;  %v6704_v13 = vadd.f32 %v12125_v56, %v6502_v2  ;;  %v12421_v12 = vld [vmem:[#allocation16_spill] sm:$0xff]  ;;  %v12231_v21 = vpop.f32.mrf.mxu1  ;;  %v6964_v59 = vld [vmem:[#allocation5 + $0x38] sm:$0xff] }
 0x70f   :  { %v12177_v45 = vpop.f32.mrf.mxu0  ;;  %8238 = vmatpush3.msra.mxu0 %v6761_v14  ;;  %v6494_v61 = vadd.f32 %v12421_v12, %v12420_v44  ;;  %v6770_v23 = vmax.f32 %v6706_v34, 0.0  ;;  %v6688_v54 = vadd.f32 %v12125_v56, %v6438_v58  ;;  %v12423_v14 = vld [vmem:[#allocation14_spill] sm:$0xff]  ;;  %v6962_v12 = vld [vmem:[#allocation5 + $0x28] sm:$0xff] }
 0x710   :  { %8239 = vmatprep.subr.mxu0 %v6776_v28  ;;  %v6430_v48 = vadd.f32 %v12423_v14, %v12422_v18  ;;  %v6754_v28 = vmax.f32 %v6690_v39, 0.0  ;;  %v6769_v38 = vmax.f32 %v6705_v11, 0.0  ;;  %v6753_v8 = vmax.f32 %v6689_v42, 0.0  ;;  %v12245_v63 = vpop.f32.mrf.mxu1  ;;  %v6813_v11 = vld [vmem:[%s12385_s2] sm:$0xff] }
 0x711   :  { %v9318_v20 = vpop.f32.mrf.mxu0  ;;  %8240 = vmatpush3.msra.mxu0 %v6760_v0  ;;  %v6703_v0 = vadd.f32 %v12125_v56, %v6499_v25  ;;  %v6702_v53 = vadd.f32 %v12125_v56, %v6494_v61  ;;  %v6752_v15 = vmax.f32 %v6688_v54, 0.0  ;;  %v9744_v42 = vmov 0.0   ;;  %v6961_v54 = vld [vmem:[#allocation5 + $0x20] sm:$0xff] }
 0x712   :  { %v12189_v43 = vadd.f32 %v12077_v35, %v9318_v20  ;;  %8241 = vmatprep.subr.mxu0 %v6775_v37  ;;  %v6691_v35 = vadd.f32 %v12125_v56, %v6451_v3  ;;  %v6491_v37 = vadd.f32 %v12425_v24, %v12424_v30  ;;  %v6687_v3 = vadd.f32 %v12125_v56, %v6435_v49  ;;  %v12251_v58 = vpop.f32.mrf.mxu1 }
 0x713   :  { %v12197_v17 = vpop.f32.mrf.mxu0  ;;  %8242 = vmatpush3.msra.mxu0 %v6759_v1  ;;  %v12426_v1 = vld [vmem:[#allocation18_spill] sm:$0xff] }
 0x714   :  { %8243 = vmatprep.subr.mxu0 %v6774_v19  ;;  %v6755_v31 = vmax.f32 %v6691_v35, 0.0  ;;  %v6427_v20 = vadd.f32 %v12427_v36, %v12426_v1  ;;  %v6768_v19 = vmax.f32 %v6704_v13, 0.0  ;;  %v6701_v35 = vadd.f32 %v12125_v56, %v6491_v37  ;;  %v9409_v49 = vpop.f32.mrf.mxu1  ;;  %v6963_v13 = vld [vmem:[#allocation5 + $0x30] sm:$0xff] }
 0x715   :  { %v12205_v27 = vpop.f32.mrf.mxu0  ;;  %8244 = vmatpush3.msra.mxu0 %v6758_v7  ;;  %v6686_v7 = vadd.f32 %v12125_v56, %v6430_v48  ;;  %v6751_v4 = vmax.f32 %v6687_v3, 0.0 }
 0x716   :  { %8245 = vmatprep.subr.mxu0 %v6773_v9  ;;  %v6767_v9 = vmax.f32 %v6703_v0, 0.0  ;;  %v6765_v39 = vmax.f32 %v6701_v35, 0.0  ;;  %v6650_v61 = vpop.f32.mrf.mxu1 }
 0x717   :  { %v12215_v41 = vpop.f32.mrf.mxu0  ;;  %8246 = vmatpush3.msra.mxu0 %v6757_v52  ;;  %v6685_v52 = vadd.f32 %v12125_v56, %v6427_v20  ;;  %v6750_v34 = vmax.f32 %v6686_v7, 0.0 }
 0x718   :  { %8247 = vmatprep.subr.mxu0 %v6772_v50  ;;  %v6766_v50 = vmax.f32 %v6702_v53, 0.0  ;;  %v9410_v14 = vpop.f32.mrf.mxu1 }
 0x719   :  { %v12223_v40 = vpop.f32.mrf.mxu0  ;;  %8248 = vmatpush3.msra.mxu0 %v6756_v33  ;;  %v6749_v25 = vmax.f32 %v6685_v52, 0.0 }
 0x71a   :  { %8249 = vmatprep.subr.mxu0 %v6771_v62  ;;  %v6653_v0 = vpop.f32.mrf.mxu1 }
 0x71b   :  { %v12233_v32 = vpop.f32.mrf.mxu0  ;;  %8250 = vmatpush3.msra.mxu0 %v6755_v31 }
 0x71c   :  { %8251 = vmatprep.subr.mxu0 %v6770_v23  ;;  %v9413_v37 = vpop.f32.mrf.mxu1 }
 0x71d   :  { %v12241_v47 = vpop.f32.mrf.mxu0  ;;  %8252 = vmatpush3.msra.mxu0 %v6754_v28 }
 0x71e   :  { %8253 = vmatprep.subr.mxu0 %v6769_v38  ;;  %v6666_v1 = vpop.f32.mrf.mxu1 }
 0x71f   :  { %v12247_v16 = vpop.f32.mrf.mxu0  ;;  %8254 = vmatpush3.msra.mxu0 %v6753_v8 }
 0x720   :  { %8255 = vmatprep.subr.mxu0 %v6768_v19  ;;  %v9414_v8 = vpop.f32.mrf.mxu1  ;;  %v12428_v19 = vld [vmem:[#allocation34_spill] sm:$0xff] }
 0x721   :  { %v9326_v2 = vpop.f32.mrf.mxu0  ;;  %8256 = vmatpush3.msra.mxu0 %v6752_v15 }
 0x722   :  { %8257 = vmatprep.subr.mxu0 %v6767_v9  ;;  %v6614_v53 = vadd.f32 %v12428_v19, %v9326_v2  ;;  %v12429_v9 = vld [vmem:[#allocation32_spill] sm:$0xff]  ;;  %v12431_v19 = vld [vmem:[#allocation30_spill] sm:$0xff] }
 0x723   :  { %v6196_v33 = vpop.f32.mrf.mxu0  ;;  %8258 = vmatpush3.msra.mxu0 %v6751_v4  ;;  %v6611_v35 = vadd.f32 %v12429_v9, %v12241_v47  ;;  %v12432_v9 = vld [vmem:[#allocation26_spill] sm:$0xff] }
 0x724   :  { %8259 = vmatprep.subr.mxu0 %v6766_v50  ;;  %v6669_v50 = vpop.f32.mrf.mxu1 }
 0x725   :  { %v12253_v62 = vpop.f32.mrf.mxu0  ;;  %8260 = vmatpush3.msra.mxu0 %v6750_v34  ;;  %v6732_v34 = vadd.f32 %v12125_v56, %v6614_v53  ;;  %v6731_v2 = vadd.f32 %v12125_v56, %v6611_v35  ;;  %v6598_v53 = vadd.f32 %v12431_v19, %v12223_v40  ;;  %v6595_v35 = vadd.f32 %v12432_v9, %v12205_v27  ;;  %v12438_v9 = vld [vmem:[#allocation21_spill] sm:$0xff] }
 0x726   :  { %8261 = vmatprep.subr.mxu0 %v6765_v39  ;;  %v6606_v39 = vadd.f32 %v12128_v6, %v6196_v33 }
 0x727   :  { %v12258_v31 = vpop.f32.mrf.mxu0  ;;  %8262 = vmatpush3.msra.mxu0 %v6749_v25  ;;  %v6796_v6 = vmax.f32 %v6732_v34, 0.0  ;;  %v6728_v40 = vadd.f32 %v12125_v56, %v6598_v53 }
 0x728   :  { %6882 = vmatmul.mubr.f32.vlgmr.msra.gmra.mxu0 %v6813_v11  ;;  %9415 = vmatprep.subr.mxu0 %v9744_v42  ;;  %v6730_v33 = vadd.f32 %v12125_v56, %v6606_v39 }
 0x729   :  { %v12261_v44 = vpop.f32.mrf.mxu0  ;;  %9416 = vmatpush3.msra.mxu0 %v6964_v59  ;;  %9431 = vmatprep.mubr.msk.f32.mxu0 %vm9745_vm1, %v9744_v42 }
 0x72a   :  { %9417 = vmatprep.subr.mxu0 %v9744_v42 }
 0x72b   :  { %v12264_v23 = vpop.f32.mrf.mxu0  ;;  %9418 = vmatpush3.msra.mxu0 %v6963_v13 }
 0x72c   :  { %9419 = vmatprep.subr.mxu0 %v9744_v42 }
 0x72d   :  { %v12267_v18 = vpop.f32.mrf.mxu0  ;;  %9420 = vmatpush3.msra.mxu0 %v6962_v12 }
 0x72e   :  { %9421 = vmatprep.subr.mxu0 %v9744_v42 }
 0x72f   :  { %v12270_v48 = vpop.f32.mrf.mxu0  ;;  %9422 = vmatpush3.msra.mxu0 %v6961_v54  ;;  %v12430_v54 = vld [vmem:[#allocation33_spill] sm:$0xff] }
 0x730   :  { %9423 = vmatprep.subr.mxu0 %v9744_v42 }
 0x731   :  { %v9334_v28 = vpop.f32.mrf.mxu0 }
 0x733   :  { %v12273_v30 = vpop.f32.mrf.mxu0 }
 0x735   :  { %v9337_v24 = vpop.f32.mrf.mxu0 }
 0x737   :  { %v6241_v38 = vpop.f32.mrf.mxu0 }
 0x738   :  { %v6651_v39 = vadd.f32 %v6650_v61, %v6241_v38  ;;  %v6643_v61 = vadd.f32 %v12213_v51, %v12267_v18  ;;  %v6724_v51 = vadd.f32 %v12125_v56, %v12189_v43  ;;  %v12436_v18 = vld [vmem:[#allocation25_spill] sm:$0xff]  ;;  %v6630_v43 = vadd.f32 %v12175_v22, %v12261_v44 }
 0x739   :  { %v9338_v3 = vpop.f32.mrf.mxu0  ;;  %v6574_v19 = vadd.f32 %v12436_v18, %v12197_v17  ;;  %v12439_v22 = vld [vmem:[#allocation17_spill] sm:$0xff] }
 0x73a   :  { %v6662_v47 = vadd.f32 %v9410_v14, %v9338_v3  ;;  %v6563_v44 = vadd.f32 %v12439_v22, %v12138_v55  ;;  %v7050_v18 = vld [vmem:[#allocation5 + $0x78] sm:$0xff] }
 0x73b   :  { %v6244_v36 = vpop.f32.mrf.mxu0 }
 0x73c   :  { %v6744_v14 = vadd.f32 %v12125_v56, %v6662_v47  ;;  %v6654_v3 = vadd.f32 %v6653_v0, %v6244_v36  ;;  %v6646_v36 = vadd.f32 %v12245_v63, %v9334_v28 }
 0x73d   :  { %v9341_v20 = vpop.f32.mrf.mxu0 }
 0x73e   :  { %v6675_v7 = vadd.f32 %v9413_v37, %v9341_v20  ;;  %v6603_v37 = vadd.f32 %v12430_v54, %v12247_v16  ;;  %v6741_v54 = vadd.f32 %v12125_v56, %v6651_v39  ;;  %v6740_v28 = vadd.f32 %v12125_v56, %v6646_v36 }
 0x73f   :  { %v6257_v15 = vpop.f32.mrf.mxu0  ;;  %v6719_v39 = vadd.f32 %v12125_v56, %v6563_v44 }
 0x740   :  { %v6747_v11 = vadd.f32 %v12125_v56, %v6675_v7  ;;  %v6667_v59 = vadd.f32 %v6666_v1, %v6257_v15  ;;  %v6659_v7 = vadd.f32 %v9409_v49, %v9337_v24  ;;  %v6729_v16 = vadd.f32 %v12125_v56, %v6603_v37  ;;  %v12433_v49 = vld [vmem:[#allocation31_spill] sm:$0xff] }
 0x741   :  { %v9342_v4 = vpop.f32.mrf.mxu0  ;;  %v6590_v24 = vadd.f32 %v12433_v49, %v12233_v32  ;;  %v6792_v32 = vmax.f32 %v6728_v40, 0.0  ;;  %v6804_v17 = vmax.f32 %v6740_v28, 0.0  ;;  %v7054_v28 = vld [vmem:[#allocation5 + $0x98] sm:$0xff] }
 0x742   :  { %v6678_v52 = vadd.f32 %v9414_v8, %v9342_v4  ;;  %v6811_v1 = vmax.f32 %v6747_v11, 0.0  ;;  %v6745_v15 = vadd.f32 %v12125_v56, %v6667_v59  ;;  %v6795_v4 = vmax.f32 %v6731_v2, 0.0  ;;  %v12434_v11 = vld [vmem:[#allocation28_spill] sm:$0xff] }
 0x743   :  { %v6260_v25 = vpop.f32.mrf.mxu0  ;;  %v6743_v34 = vadd.f32 %v12125_v56, %v6659_v7  ;;  %v6587_v59 = vadd.f32 %v12434_v11, %v12215_v41  ;;  %v6793_v0 = vmax.f32 %v6729_v16, 0.0  ;;  %v6726_v2 = vadd.f32 %v12125_v56, %v6590_v24  ;;  %v12435_v41 = vld [vmem:[#allocation23_spill] sm:$0xff] }
 0x744   :  { %v6748_v13 = vadd.f32 %v12125_v56, %v6678_v52  ;;  %v6670_v12 = vadd.f32 %v6669_v50, %v6260_v25  ;;  %v6794_v50 = vmax.f32 %v6730_v33, 0.0  ;;  %v6809_v27 = vmax.f32 %v6745_v15, 0.0 }
 0x745   :  { %v6727_v25 = vadd.f32 %v12125_v56, %v6595_v35  ;;  %v6807_v38 = vmax.f32 %v6743_v34, 0.0  ;;  %v6579_v37 = vadd.f32 %v12435_v41, %v12169_v57  ;;  %v6725_v63 = vadd.f32 %v12125_v56, %v6587_v59  ;;  %v7058_v41 = vld [vmem:[#allocation5 + $0xb8] sm:$0xff] }
 0x746   :  { %v6812_v20 = vmax.f32 %v6748_v13, 0.0  ;;  %v6746_v8 = vadd.f32 %v12125_v56, %v6670_v12  ;;  %v6808_v13 = vmax.f32 %v6744_v14, 0.0  ;;  %v6742_v12 = vadd.f32 %v12125_v56, %v6654_v3 }
 0x747   :  { %v6791_v47 = vmax.f32 %v6727_v25, 0.0  ;;  %v6790_v53 = vmax.f32 %v6726_v2, 0.0  ;;  %v6739_v57 = vadd.f32 %v12125_v56, %v6643_v61  ;;  %v6805_v33 = vmax.f32 %v6741_v54, 0.0  ;;  %v6815_v2 = vld [vmem:[%s12385_s2 + $0x10] sm:$0xff]  ;;  %v6960_v61 = vld [vmem:[#allocation5 + $0x18] sm:$0xff]  ;;  %v6957_v54 = vld [vmem:[#allocation5] sm:$0xff] }
 0x748   :  { %8266 = vmatprep.subr.mxu1 %v6812_v20  ;;  %v6810_v52 = vmax.f32 %v6746_v8, 0.0  ;;  %v6638_v20 = vadd.f32 %v12251_v58, %v12273_v30  ;;  %v6806_v8 = vmax.f32 %v6742_v12, 0.0  ;;  %v6723_v7 = vadd.f32 %v12125_v56, %v6579_v37  ;;  %v12437_v58 = vld [vmem:[#allocation24_spill] sm:$0xff]  ;;  %9424 = vmatpush3.msra.mxu0 %v6960_v61  ;;  %s9746_s2 = smov [#allocation7]  }
 0x749   :  { %8267 = vmatpush3.msra.mxu1 %v6796_v6  ;;  %v6635_v6 = vadd.f32 %v12231_v21, %v12270_v48  ;;  %v6571_v30 = vadd.f32 %v12437_v58, %v12177_v45  ;;  %v6566_v35 = vadd.f32 %v12438_v9, %v12153_v60  ;;  %v6788_v21 = vmax.f32 %v6724_v51, 0.0  ;;  %9425 = vmatprep.subr.mxu0 %v9744_v42  ;;  %v7057_v37 = vld [vmem:[#allocation5 + $0xb0] sm:$0xff]  ;;  %v7051_v51 = vld [vmem:[#allocation5 + $0x80] sm:$0xff]  ;;  %v7044_v9 = vld [vmem:[#allocation5 + $0x48] sm:$0xff]  ;;  %s7140_s21 = sshll.u32 %s9746_s2, 4  ;;  %s7141_s21 = int_to_ptr.vmem [resolvable:$true] %s7140_s21 }
 0x74a   :  { %8268 = vmatprep.subr.mxu1 %v6811_v1  ;;  %v6789_v1 = vmax.f32 %v6725_v63, 0.0  ;;  %v6738_v15 = vadd.f32 %v12125_v56, %v6638_v20  ;;  %v6722_v48 = vadd.f32 %v12125_v56, %v6574_v19  ;;  %v6803_v45 = vmax.f32 %v6739_v57, 0.0  ;;  %v7055_v63 = vld [vmem:[#allocation5 + $0xa0] sm:$0xff]  ;;  %v7053_v20 = vld [vmem:[#allocation5 + $0x90] sm:$0xff]  ;;  %s9712_s22 = scalar_lea.vmem %s7141_s21, 128  ;;  %p9717_p11 = scmp.lt.s32.totalorder %s7141_s21, %s7141_s21 }
 0x74b   :  { %8269 = vmatpush3.msra.mxu1 %v6795_v4  ;;  %v6627_v4 = vadd.f32 %v12143_v26, %v12253_v62  ;;  %v6737_v16 = vadd.f32 %v12125_v56, %v6635_v6  ;;  %v6787_v14 = vmax.f32 %v6723_v7, 0.0  ;;  %v6721_v3 = vadd.f32 %v12125_v56, %v6571_v30  ;;  %v12440_v62 = vld [vmem:[#allocation22_spill] sm:$0xff]  ;;  %v7049_v19 = vld [vmem:[#allocation5 + $0x70] sm:$0xff]  ;;  %v7046_v6 = vld [vmem:[#allocation5 + $0x58] sm:$0xff]  ;;  %p9713_p10 = scmp.ne.s32.totalorder %s7141_s21, %s9712_s22  ;;  %p9718_p12 = scmp.lt.s32.totalorder %s9712_s22, %s9712_s22 }
 0x74c   :  { %8270 = vmatprep.subr.mxu1 %v6810_v52  ;;  %v6736_v60 = vadd.f32 %v12125_v56, %v6630_v43  ;;  %v6622_v52 = vadd.f32 %v12195_v10, %v12264_v23  ;;  %v6802_v40 = vmax.f32 %v6738_v15, 0.0  ;;  %v6720_v26 = vadd.f32 %v12125_v56, %v6566_v35  ;;  %v12441_v10 = vld [vmem:[#allocation19_spill] sm:$0xff]  ;;  %v7047_v57 = vld [vmem:[#allocation5 + $0x60] sm:$0xff]  ;;  %v7045_v15 = vld [vmem:[#allocation5 + $0x50] sm:$0xff] }
 0x74d   :  { %8271 = vmatpush3.msra.mxu1 %v6794_v50  ;;  %v6558_v49 = vadd.f32 %v12440_v62, %v12162_v46  ;;  %v6786_v24 = vmax.f32 %v6722_v48, 0.0  ;;  %v6735_v55 = vadd.f32 %v12125_v56, %v6627_v4  ;;  %v6619_v50 = vadd.f32 %v12160_v29, %v12258_v31  ;;  %v7043_v35 = vld [vmem:[#allocation5 + $0x40] sm:$0xff]  ;;  %v12443_v4 = vld [vmem:[#allocation35_spill] sm:$0xff]  ;;  %p9719_p13 = por %p9718_p12, %p9717_p11 }
 0x74e   :  { %8272 = vmatprep.subr.mxu1 %v6809_v27  ;;  %v6801_v34 = vmax.f32 %v6737_v16, 0.0  ;;  %v6555_v23 = vadd.f32 %v12441_v10, %v12146_v5  ;;  %v6785_v27 = vmax.f32 %v6721_v3, 0.0  ;;  %v6800_v25 = vmax.f32 %v6736_v60, 0.0 }
 0x74f   :  { %8273 = vmatpush3.msra.mxu1 %v6793_v0  ;;  %v6734_v11 = vadd.f32 %v12125_v56, %v6622_v52  ;;  %v6784_v46 = vmax.f32 %v6720_v26, 0.0  ;;  %v6718_v59 = vadd.f32 %v12125_v56, %v6558_v49  ;;  %v6799_v0 = vmax.f32 %v6735_v55, 0.0  ;;  %p9720_p0 = pnand %p9719_p13, %p9713_p10 }
 0x750   :  { %8274 = vmatprep.subr.mxu1 %v6808_v13  ;;  %v6733_v29 = vadd.f32 %v12125_v56, %v6619_v50  ;;  %v6783_v31 = vmax.f32 %v6719_v39, 0.0  ;;  %v6717_v36 = vadd.f32 %v12125_v56, %v6555_v23  ;;  %v6959_v56 = vld [vmem:[#allocation5 + $0x10] sm:$0xff] }
 0x751   :  { %8275 = vmatpush3.msra.mxu1 %v6792_v32  ;;  %v6798_v13 = vmax.f32 %v6734_v11, 0.0  ;;  %v6782_v5 = vmax.f32 %v6718_v59, 0.0  ;;  %9426 = vmatpush3.msra.mxu0 %v6959_v56 }
 0x752   :  { %8276 = vmatprep.subr.mxu1 %v6807_v38  ;;  %v6797_v12 = vmax.f32 %v6733_v29, 0.0  ;;  %v6781_v32 = vmax.f32 %v6717_v36, 0.0  ;;  %9427 = vmatprep.subr.mxu0 %v9744_v42  ;;  %v6958_v38 = vld [vmem:[#allocation5 + $0x8] sm:$0xff] }
 0x753   :  { %8277 = vmatpush3.msra.mxu1 %v6791_v47  ;;  %9428 = vmatpush3.msra.mxu0 %v6958_v38  ;;  %v7056_v47 = vld [vmem:[#allocation5 + $0xa8] sm:$0xff] }
 0x754   :  { %8278 = vmatprep.subr.mxu1 %v6806_v8  ;;  %9429 = vmatprep.subr.mxu0 %v9744_v42  ;;  %v7052_v8 = vld [vmem:[#allocation5 + $0x88] sm:$0xff] }
 0x755   :  { %8279 = vmatpush3.msra.mxu1 %v6790_v53  ;;  %9430 = vmatpush3.msra.mxu0 %v6957_v54  ;;  %v7048_v53 = vld [vmem:[#allocation5 + $0x68] sm:$0xff] }
 0x756   :  { %8280 = vmatprep.subr.mxu1 %v6805_v33 }
 0x757   :  { %8281 = vmatpush3.msra.mxu1 %v6789_v1 }
 0x758   :  { %8282 = vmatprep.subr.mxu1 %v6804_v17 }
 0x759   :  { %8283 = vmatpush3.msra.mxu1 %v6788_v21  ;;  %v12442_v21 = vld [vmem:[#allocation11_spill] sm:$0xff] }
 0x75a   :  { %8284 = vmatprep.subr.mxu1 %v6803_v45  ;;  %v6967_v48 = vsub.s32 4, %v12442_v21  ;;  %v7061_v3 = vsub.s32 5, %v12442_v21 }
 0x75b   :  { %8285 = vmatpush3.msra.mxu1 %v6787_v14 }
 0x75c   :  { %8286 = vmatprep.subr.mxu1 %v6802_v40  ;;  %v6968_v45 = vrot.slane %v12443_v4, %v6967_v48  ;;  %v7062_v60 = vrot.slane %v12443_v4, %v7061_v3 }
 0x75d   :  { %8287 = vmatpush3.msra.mxu1 %v6786_v24 }
 0x75e   :  { %8288 = vmatprep.subr.mxu1 %v6801_v34 }
 0x75f   :  { %8289 = vmatpush3.msra.mxu1 %v6785_v27 }
 0x760   :  { %8290 = vmatprep.subr.mxu1 %v6800_v25 }
 0x761   :  { %8291 = vmatpush3.msra.mxu1 %v6784_v46 }
 0x762   :  { %8292 = vmatprep.subr.mxu1 %v6799_v0 }
 0x763   :  { %8293 = vmatpush3.msra.mxu1 %v6783_v31 }
 0x764   :  { %8294 = vmatprep.subr.mxu1 %v6798_v13 }
 0x765   :  { %8295 = vmatpush3.msra.mxu1 %v6782_v5 }
 0x766   :  { %8296 = vmatprep.subr.mxu1 %v6797_v12 }
 0x767   :  { %8297 = vmatpush3.msra.mxu1 %v6781_v32 }
 0x768   :  { %6952 = vmatmul.mubr.f32.vlgmr.msra.gmra.mxu1 %v6815_v2  ;;  %9434 = vmatprep.subr.mxu1 %v9744_v42 }
 0x769   :  { %9466 = vmatprep.mubr.msk.f32.mxu1 %vm9745_vm1, %v9744_v42  ;;  %9435 = vmatpush3.msra.mxu1 %v7058_v41 }
 0x76a   :  { %9436 = vmatprep.subr.mxu1 %v9744_v42 }
 0x76b   :  { %9437 = vmatpush3.msra.mxu1 %v7057_v37 }
 0x76c   :  { %9438 = vmatprep.subr.mxu1 %v9744_v42 }
 0x76d   :  { %9439 = vmatpush3.msra.mxu1 %v7056_v47 }
 0x76e   :  { %9440 = vmatprep.subr.mxu1 %v9744_v42 }
 0x76f   :  { %9441 = vmatpush3.msra.mxu1 %v7055_v63 }
 0x770   :  { %9442 = vmatprep.subr.mxu1 %v9744_v42 }
 0x771   :  { %9443 = vmatpush3.msra.mxu1 %v7054_v28 }
 0x772   :  { %9444 = vmatprep.subr.mxu1 %v9744_v42 }
 0x773   :  { %9445 = vmatpush3.msra.mxu1 %v7053_v20 }
 0x774   :  { %9446 = vmatprep.subr.mxu1 %v9744_v42 }
 0x775   :  { %9447 = vmatpush3.msra.mxu1 %v7052_v8 }
 0x776   :  { %9448 = vmatprep.subr.mxu1 %v9744_v42 }
 0x777   :  { %9449 = vmatpush3.msra.mxu1 %v7051_v51 }
 0x778   :  { %9450 = vmatprep.subr.mxu1 %v9744_v42 }
 0x779   :  { %9451 = vmatpush3.msra.mxu1 %v7050_v18 }
 0x77a   :  { %9452 = vmatprep.subr.mxu1 %v9744_v42 }
 0x77b   :  { %9453 = vmatpush3.msra.mxu1 %v7049_v19 }
 0x77c   :  { %9454 = vmatprep.subr.mxu1 %v9744_v42 }
 0x77d   :  { %9455 = vmatpush3.msra.mxu1 %v7048_v53 }
 0x77e   :  { %9456 = vmatprep.subr.mxu1 %v9744_v42 }
 0x77f   :  { %9457 = vmatpush3.msra.mxu1 %v7047_v57 }
 0x780   :  { %9458 = vmatprep.subr.mxu1 %v9744_v42 }
 0x781   :  { %9459 = vmatpush3.msra.mxu1 %v7046_v6 }
 0x782   :  { %9460 = vmatprep.subr.mxu1 %v9744_v42 }
 0x783   :  { %9461 = vmatpush3.msra.mxu1 %v7045_v15 }
 0x784   :  { %9462 = vmatprep.subr.mxu1 %v9744_v42 }
 0x785   :  { %9463 = vmatpush3.msra.mxu1 %v7044_v9 }
 0x786   :  { %9464 = vmatprep.subr.mxu1 %v9744_v42 }
 0x787   :  { %9465 = vmatpush3.msra.mxu1 %v7043_v35 }
 0x7e8   :  { %v8263_v33 = vpop.f32.mrf.mxu0 }
 0x7ea   :  { %v8264_v58 = vpop.f32.mrf.mxu0 }
 0x7eb   :  { %v8265_v1 = vadd.f32 %v8264_v58, %v8263_v33 }
 0x828   :  { %v8298_v7 = vpop.f32.mrf.mxu1 }
 0x82a   :  { %v8299_v30 = vpop.f32.mrf.mxu1 }
 0x82b   :  { %v8300_v43 = vadd.f32 %v8299_v30, %v8298_v7 }
 0x82d   :  { %v6954_v17 = vadd.f32 %v8300_v43, %v8265_v1 }
 0x82f   :  { %9432 = vmatmul.mubr.msk.f32.vlgmr.msra.gmra.mxu0 %vm170_vm0, %v6954_v17 }
 0x8ef   :  { %v7038_v16 = vpop.f32.mrf.mxu0 }
 0x8f0   :  { %v7039_v22 = vadd.f32 %v7038_v16, %v6968_v45 }
 0x8f1   :  { %v9433_v44 = vpop.f32.mrf.mxu0 }
 0x8f2   :  { %v7042_v14 = vmax.f32 %v7039_v22, 0.0 }
 0x8f4   :  { %9467 = vmatmul.mubr.f32.vlgmr.msra.gmra.mxu1 %v7042_v14 }
 0x9b4   :  { %v7129_v52 = vpop.f32.mrf.mxu1 }
 0x9b5   :  { %v7130_v40 = vadd.f32 %v7129_v52, %v7062_v60 }
 0x9b6   :  { %v9468_v42 = vpop.f32.mrf.mxu1 }
 0x9b7   :  { %7133 = vst [vmem:[#allocation7] sm:$0xff] %v7130_v40 }
 0x9b8   :  { %9723 = shalt.err (!%p9720_p0)
}
 0x9b9   :  { %7143 = dma.vmem_to_hbm [thread:$0]  %s7141_s21, 128, %s12389_s6, [#allocation4]  }
 0x9ba   :  { %9736 = dma.done.wait [#allocation4], 128  }
 0x9bb   :  { %9737 = vsyncadd [#allocation4], 4294967168 }
 0x9bc   :  { %7147 = vsyncpa [#allocation3], 1 }
 0x9bd   :  { %7148 = vsyncpa [#allocation6], 1 }
 0x9be   :  { %7149 = vsyncpa [#allocation4], 1 }

</bundles_post_ra>
